<compile_context>
chip_gen: v6e
topology: v6e:2x2x1
jax: 0.10.0
libtpu: 0.0.40
codegen_flags: <defaults>
</compile_context>

<pallas_src>
import math
import numpy as np
import jax
import jax.numpy as jnp
from jax.experimental import pallas as pl
from jax.experimental.pallas import tpu as pltpu

CHANNEL = 8      # stand-in for settings.channel  (W*C = 16*8 = 128 -> lane-dense rows)
LEAK = 0.2


# --------------------------------------------------------------------------------------
# Host-side construction of the constant matrices that encode the spatial operators
# --------------------------------------------------------------------------------------

def _shift_mats(h, smax):
    """(2*smax+1, h, h):  (S_k @ X)[i, :] = X[i + (k - smax), :]  (zeros outside)."""
    out = np.zeros((2 * smax + 1, h, h), np.float32)
    for k, s in enumerate(range(-smax, smax + 1)):
        for i in range(h):
            j = i + s
            if 0 <= j < h:
                out[k, i, j] = 1.0
    return out


def _tap_select(w, k):
    """(k, w, w): T[dx, wp, wo] = 1  iff  wp == wo + dx - k//2  and 0 <= wp < w."""
    p = k // 2
    t = np.zeros((k, w, w), np.float32)
    for dx in range(k):
        for wo in range(w):
            wp = wo + dx - p
            if 0 <= wp < w:
                t[dx, wp, wo] = 1.0
    return t


def _conv_right(wgt, w):
    """HWIO weight (K,K,Ci,Co) -> (K, w*Ci, w*Co) matrices N_dy with
       conv_same(x, wgt) == sum_dy RowShift(dy - K//2) @ x_rowimage @ N_dy ."""
    k, _, ci, co = wgt.shape
    t = jnp.asarray(_tap_select(w, k))
    n = jnp.einsum('xpw,yxio->ypiwo', t, wgt)        # (K, w, Ci, w, Co)
    return n.reshape(k, w * ci, w * co)


def _pool_rows(hout):
    out = np.zeros((2, hout, 2 * hout), np.float32)
    for j in range(2):
        for i in range(hout):
            out[j, i, 2 * i + j] = 1.0
    return out


def _pool_cols(wout, c):
    out = np.zeros((2, 2 * wout * c, wout * c), np.float32)
    for j in range(2):
        for w in range(wout):
            for ch in range(c):
                out[j, (2 * w + j) * c + ch, w * c + ch] = 1.0
    return out


def _up_row(hin, f):
    out = np.zeros((hin * f, hin), np.float32)
    for i in range(hin * f):
        out[i, i // f] = 1.0
    return out


def _up_col(win, c, f):
    out = np.zeros((win * c, win * f * c), np.float32)
    for wo in range(win * f):
        for ch in range(c):
            out[(wo // f) * c + ch, wo * c + ch] = 1.0
    return out


def _gap_mats(w, c):
    a = np.zeros((w * c, c), np.float32)
    at = np.zeros((c, w * c), np.float32)
    for wo in range(w):
        for ch in range(c):
            a[wo * c + ch, ch] = 1.0
            at[ch, wo * c + ch] = 1.0
    return a, at


def _prep_constants(params, h, w, c):
    wc = w * c
    sh16 = _shift_mats(h, 2)
    sh8 = _shift_mats(h // 2, 1)
    sh4 = _shift_mats(h // 4, 1)

    n3 = _conv_right(params['w3'], w)
    n5 = _conv_right(params['w5'], w)
    n13 = _conv_right(params['w13'], w)
    n15 = _conv_right(params['w15'], w)
    n351a = _conv_right(params['w351'][:, :, :c, :], w)
    n351b = _conv_right(params['w351'][:, :, c:, :], w)
    n352a = _conv_right(params['w352'][:, :, :c, :], w // 2)
    n352b = _conv_right(params['w352'][:, :, c:, :], w // 2)
    n354a = _conv_right(params['w354'][:, :, :c, :], w // 4)
    n354b = _conv_right(params['w354'][:, :, c:, :], w // 4)
    n124a = _conv_right(params['w124'][:, :, 0 * c:1 * c, :], w)
    n124b = _conv_right(params['w124'][:, :, 1 * c:2 * c, :], w)
    n124c = _conv_right(params['w124'][:, :, 2 * c:3 * c, :], w)

    # fold the nearest upsample (columns) of the 8x8 / 4x4 branches into conv124's rights
    u2c = jnp.asarray(_up_col(w // 2, c, 2))          # (wc/2, wc)
    u4c = jnp.asarray(_up_col(w // 4, c, 4))          # (wc/4, wc)
    p124b = jnp.einsum('ab,kbc->kac', u2c, n124b)     # (3, wc/2, wc)
    p124c = jnp.einsum('ab,kbc->kac', u4c, n124c)     # (3, wc/4, wc)

    # fold the nearest upsample (rows) with conv124's row shifts
    su2 = np.einsum('kij,jm->kim', sh16[1:4], _up_row(h // 2, 2))   # (3, h, h/2)
    su4 = np.einsum('kij,jm->kim', sh16[1:4], _up_row(h // 4, 4))   # (3, h, h/4)

    r2 = _pool_rows(h // 2)
    cp2 = _pool_cols(w // 2, c)
    r2b = _pool_rows(h // 4)
    cp2b = _pool_cols(w // 4, c)

    a, at = _gap_mats(w, c)
    a_mean = a / float(h * w)

    def brow(bvec, reps):
        row = jnp.tile(bvec, reps)
        return jnp.pad(row, (0, wc - row.shape[0]))

    bias = jnp.stack([
        brow(params['b3'], w), brow(params['b5'], w),
        brow(params['b13'], w), brow(params['b15'], w),
        brow(params['b351'], w), brow(params['b352'], w // 2),
        brow(params['b354'], w // 4), brow(params['b124'], w),
    ])

    return [sh16, sh8, sh4,
            n3, n5, n13, n15,
            n351a, n351b, n352a, n352b, n354a, n354b,
            n124a, p124b, p124c,
            r2, cp2, r2b, cp2b,
            su2, su4, a_mean, at, bias]


# --------------------------------------------------------------------------------------
# Fused Pallas kernel: one batch element per grid step, everything stays in VMEM
# --------------------------------------------------------------------------------------

def _mva_kernel(*refs):
    (x_ref, sh16, sh8, sh4,
     n3, n5, n13, n15,
     n351a, n351b, n352a, n352b, n354a, n354b,
     n124a, p124b, p124c,
     r2, cp2, r2b, cp2b,
     su2, su4, amean_ref, at_ref, bias_ref,
     o_ref) = refs

    def mm(a, b):
        return jnp.dot(a, b, preferred_element_type=jnp.float32)

    def lrelu(v):
        return jnp.where(v >= 0.0, v, LEAK * v)

    x = x_ref[0]                       # (H, W*C) lane-dense row image
    bias = bias_ref[...]               # (8, W*C)
    amean = amean_ref[...]             # (W*C, C)  (includes 1/(H*W))
    at = at_ref[...]                   # (C, W*C)
    wc = x.shape[1]
    wc2, wc4 = wc // 2, wc // 4

    # row-shifted copies of the input for vertical taps -2..+2
    xs = [mm(sh16[k], x) for k in range(5)]

    conv3 = lrelu(sum(mm(xs[d + 1], n3[d]) for d in range(3)) + bias[0:1, :])
    conv5 = lrelu(sum(mm(xs[d], n5[d]) for d in range(5)) + bias[1:2, :])

    c3s = [mm(sh16[d + 1], conv3) for d in range(3)]
    c5s = [mm(sh16[d + 1], conv5) for d in range(3)]
    conv13 = lrelu(sum(mm(c3s[d], n13[d]) for d in range(3)) + bias[2:3, :])
    conv15 = lrelu(sum(mm(c5s[d], n15[d]) for d in range(3)) + bias[3:4, :])

    # channel attention: global average pool -> sigmoid -> broadcast over W
    def attn(v):
        m = mm(jnp.sum(v, axis=0, keepdims=True), amean)      # (1, C) per-channel mean
        s = 1.0 / (1.0 + jnp.exp(-m))                          # sigmoid
        return mm(s, at)                                       # (1, W*C)

    avg3 = attn(conv13)
    avg5 = attn(conv15)

    # 2x2 max pool via row / column selection matmuls; 4x4 pool == 2x2 applied twice
    def mp2(v, rr, cc):
        vr = jnp.maximum(mm(rr[0], v), mm(rr[1], v))
        return jnp.maximum(mm(vr, cc[0]), mm(vr, cc[1]))

    m32 = mp2(conv3, r2, cp2)          # (H/2, W/2*C)
    m34 = mp2(m32, r2b, cp2b)          # (H/4, W/4*C)
    m52 = mp2(conv5, r2, cp2)
    m54 = mp2(m52, r2b, cp2b)

    pool32 = m32 * avg3[:, :wc2]
    pool34 = m34 * avg3[:, :wc4]
    pool52 = m52 * avg5[:, :wc2]
    pool54 = m54 * avg5[:, :wc4]
    # pool31 / pool51 are only consumed row-shifted inside conv351; the per-channel
    # attention scale commutes with the row shift, so reuse c3s / c5s.
    p31s = [v * avg3 for v in c3s]
    p51s = [v * avg5 for v in c5s]

    conv351 = lrelu(sum(mm(p31s[d], n351a[d]) + mm(p51s[d], n351b[d])
                        for d in range(3)) + bias[4:5, :])

    p32s = [mm(sh8[d], pool32) for d in range(3)]
    p52s = [mm(sh8[d], pool52) for d in range(3)]
    conv352 = lrelu(sum(mm(p32s[d], n352a[d]) + mm(p52s[d], n352b[d])
                        for d in range(3)) + bias[5:6, :wc2])

    p34s = [mm(sh4[d], pool34) for d in range(3)]
    p54s = [mm(sh4[d], pool54) for d in range(3)]
    conv354 = lrelu(sum(mm(p34s[d], n354a[d]) + mm(p54s[d], n354b[d])
                        for d in range(3)) + bias[6:7, :wc4])

    # conv124 over [conv351 | up2(conv352) | up4(conv354)]; the nearest upsample and
    # the channel concat are folded into su2/su4 (left) and p124b/p124c (right).
    c351s = [mm(sh16[d + 1], conv351) for d in range(3)]
    c352u = [mm(su2[d], conv352) for d in range(3)]
    c354u = [mm(su4[d], conv354) for d in range(3)]
    conv124 = lrelu(sum(mm(c351s[d], n124a[d]) + mm(c352u[d], p124b[d])
                        + mm(c354u[d], p124c[d]) for d in range(3)) + bias[7:8, :])

    o_ref[0] = (conv124 + x).astype(o_ref.dtype)    # residual add, full-lane store


# --------------------------------------------------------------------------------------
# Wrapper + parameters
# --------------------------------------------------------------------------------------

def multi_view_aggregation(x_nchw, params):
    b, c, h, w = x_nchw.shape
    assert h % 4 == 0 and w % 4 == 0
    wc = w * c
    x = jnp.transpose(x_nchw, (0, 2, 3, 1)).reshape(b, h, wc)   # lane-dense row images

    consts = _prep_constants(params, h, w, c)

    def const_spec(a):
        zeros = (0,) * a.ndim
        return pl.BlockSpec(a.shape, lambda i, _z=zeros: _z)

    in_specs = [pl.BlockSpec((1, h, wc), lambda i: (i, 0, 0))]
    in_specs += [const_spec(a) for a in consts]

    out = pl.pallas_call(
        _mva_kernel,
        out_shape=jax.ShapeDtypeStruct((b, h, wc), x.dtype),
        grid=(b,),
        in_specs=in_specs,
        out_specs=pl.BlockSpec((1, h, wc), lambda i: (i, 0, 0)),
        compiler_params=pltpu.CompilerParams(
            dimension_semantics=("parallel",)),
    )(x, *consts)

    return jnp.transpose(out.reshape(b, h, w, c), (0, 3, 1, 2))  # back to NCHW


def init_params(key, c=CHANNEL):
    ks = jax.random.split(key, 16)

    def conv_init(kw, kb, k, cin, cout):
        fan_in = k * k * cin
        w = jax.random.normal(kw, (k, k, cin, cout), jnp.float32) / math.sqrt(fan_in)
        b = jax.random.normal(kb, (cout,), jnp.float32) * 0.01
        return w, b

    p = {}
    p['w3'],   p['b3']   = conv_init(ks[0],  ks[1],  3, c, c)
    p['w5'],   p['b5']   = conv_init(ks[2],  ks[3],  5, c, c)
    p['w13'],  p['b13']  = conv_init(ks[4],  ks[5],  3, c, c)
    p['w15'],  p['b15']  = conv_init(ks[6],  ks[7],  3, c, c)
    p['w351'], p['b351'] = conv_init(ks[8],  ks[9],  3, 2 * c, c)
    p['w352'], p['b352'] = conv_init(ks[10], ks[11], 3, 2 * c, c)
    p['w354'], p['b354'] = conv_init(ks[12], ks[13], 3, 2 * c, c)
    p['w124'], p['b124'] = conv_init(ks[14], ks[15], 3, 3 * c, c)
    return p


if __name__ == "__main__":
    key = jax.random.PRNGKey(0)
    kx, kp = jax.random.split(key)
    B, C, H, W = 2, CHANNEL, 16, 16
    x = jax.random.normal(kx, (B, C, H, W), jnp.float32)   # NCHW like the PyTorch module
    params = init_params(kp, C)

    fwd = jax.jit(multi_view_aggregation)
    out = fwd(x, params)
    jax.block_until_ready(out)
    assert out.shape == (B, C, H, W), out.shape
    print("KERNEL_OK")
</pallas_src>

<mosaic_0001>
module attributes {stable_mosaic.version = 11 : i64} {
  func.func @_mva_kernel(%arg0: i32, %arg1: memref<1x16x128xf32, #tpu.memory_space<vmem>>, %arg2: memref<5x16x16xf32, #tpu.memory_space<vmem>>, %arg3: memref<3x8x8xf32, #tpu.memory_space<vmem>>, %arg4: memref<3x4x4xf32, #tpu.memory_space<vmem>>, %arg5: memref<3x128x128xf32, #tpu.memory_space<vmem>>, %arg6: memref<5x128x128xf32, #tpu.memory_space<vmem>>, %arg7: memref<3x128x128xf32, #tpu.memory_space<vmem>>, %arg8: memref<3x128x128xf32, #tpu.memory_space<vmem>>, %arg9: memref<3x128x128xf32, #tpu.memory_space<vmem>>, %arg10: memref<3x128x128xf32, #tpu.memory_space<vmem>>, %arg11: memref<3x64x64xf32, #tpu.memory_space<vmem>>, %arg12: memref<3x64x64xf32, #tpu.memory_space<vmem>>, %arg13: memref<3x32x32xf32, #tpu.memory_space<vmem>>, %arg14: memref<3x32x32xf32, #tpu.memory_space<vmem>>, %arg15: memref<3x128x128xf32, #tpu.memory_space<vmem>>, %arg16: memref<3x64x128xf32, #tpu.memory_space<vmem>>, %arg17: memref<3x32x128xf32, #tpu.memory_space<vmem>>, %arg18: memref<2x8x16xf32, #tpu.memory_space<vmem>>, %arg19: memref<2x128x64xf32, #tpu.memory_space<vmem>>, %arg20: memref<2x4x8xf32, #tpu.memory_space<vmem>>, %arg21: memref<2x64x32xf32, #tpu.memory_space<vmem>>, %arg22: memref<3x16x8xf32, #tpu.memory_space<vmem>>, %arg23: memref<3x16x4xf32, #tpu.memory_space<vmem>>, %arg24: memref<128x8xf32, #tpu.memory_space<vmem>>, %arg25: memref<8x128xf32, #tpu.memory_space<vmem>>, %arg26: memref<8x128xf32, #tpu.memory_space<vmem>>, %arg27: memref<1x16x128xf32, #tpu.memory_space<vmem>>) attributes {dimension_semantics = [#tpu.dimension_semantics<parallel>], iteration_bounds = array<i64: 2>, scalar_prefetch = 0 : i64, scratch_operands = 0 : i64, tpu.core_type = #tpu.core_type<tc>, window_params = [{transform_indices = @transform_0, window_bounds = array<i64: 1, 16, 128>}, {pipeline_mode = #tpu.pipeline_mode<synchronous>, transform_indices = @transform_1, window_bounds = array<i64: 5, 16, 16>}, {pipeline_mode = #tpu.pipeline_mode<synchronous>, transform_indices = @transform_2, window_bounds = array<i64: 3, 8, 8>}, {pipeline_mode = #tpu.pipeline_mode<synchronous>, transform_indices = @transform_3, window_bounds = array<i64: 3, 4, 4>}, {pipeline_mode = #tpu.pipeline_mode<synchronous>, transform_indices = @transform_4, window_bounds = array<i64: 3, 128, 128>}, {pipeline_mode = #tpu.pipeline_mode<synchronous>, transform_indices = @transform_5, window_bounds = array<i64: 5, 128, 128>}, {pipeline_mode = #tpu.pipeline_mode<synchronous>, transform_indices = @transform_6, window_bounds = array<i64: 3, 128, 128>}, {pipeline_mode = #tpu.pipeline_mode<synchronous>, transform_indices = @transform_7, window_bounds = array<i64: 3, 128, 128>}, {pipeline_mode = #tpu.pipeline_mode<synchronous>, transform_indices = @transform_8, window_bounds = array<i64: 3, 128, 128>}, {pipeline_mode = #tpu.pipeline_mode<synchronous>, transform_indices = @transform_9, window_bounds = array<i64: 3, 128, 128>}, {pipeline_mode = #tpu.pipeline_mode<synchronous>, transform_indices = @transform_10, window_bounds = array<i64: 3, 64, 64>}, {pipeline_mode = #tpu.pipeline_mode<synchronous>, transform_indices = @transform_11, window_bounds = array<i64: 3, 64, 64>}, {pipeline_mode = #tpu.pipeline_mode<synchronous>, transform_indices = @transform_12, window_bounds = array<i64: 3, 32, 32>}, {pipeline_mode = #tpu.pipeline_mode<synchronous>, transform_indices = @transform_13, window_bounds = array<i64: 3, 32, 32>}, {pipeline_mode = #tpu.pipeline_mode<synchronous>, transform_indices = @transform_14, window_bounds = array<i64: 3, 128, 128>}, {pipeline_mode = #tpu.pipeline_mode<synchronous>, transform_indices = @transform_15, window_bounds = array<i64: 3, 64, 128>}, {pipeline_mode = #tpu.pipeline_mode<synchronous>, transform_indices = @transform_16, window_bounds = array<i64: 3, 32, 128>}, {pipeline_mode = #tpu.pipeline_mode<synchronous>, transform_indices = @transform_17, window_bounds = array<i64: 2, 8, 16>}, {pipeline_mode = #tpu.pipeline_mode<synchronous>, transform_indices = @transform_18, window_bounds = array<i64: 2, 128, 64>}, {pipeline_mode = #tpu.pipeline_mode<synchronous>, transform_indices = @transform_19, window_bounds = array<i64: 2, 4, 8>}, {pipeline_mode = #tpu.pipeline_mode<synchronous>, transform_indices = @transform_20, window_bounds = array<i64: 2, 64, 32>}, {pipeline_mode = #tpu.pipeline_mode<synchronous>, transform_indices = @transform_21, window_bounds = array<i64: 3, 16, 8>}, {pipeline_mode = #tpu.pipeline_mode<synchronous>, transform_indices = @transform_22, window_bounds = array<i64: 3, 16, 4>}, {pipeline_mode = #tpu.pipeline_mode<synchronous>, transform_indices = @transform_23, window_bounds = array<i64: 128, 8>}, {pipeline_mode = #tpu.pipeline_mode<synchronous>, transform_indices = @transform_24, window_bounds = array<i64: 8, 128>}, {pipeline_mode = #tpu.pipeline_mode<synchronous>, transform_indices = @transform_25, window_bounds = array<i64: 8, 128>}, {transform_indices = @transform_26, window_bounds = array<i64: 1, 16, 128>}]} {
    %c0 = arith.constant 0 : index
    %c0_0 = arith.constant 0 : index
    %c0_1 = arith.constant 0 : index
    %0 = vector.load %arg1[%c0, %c0_0, %c0_1] : memref<1x16x128xf32, #tpu.memory_space<vmem>>, vector<1x16x128xf32>
    %1 = vector.shape_cast %0 : vector<1x16x128xf32> to vector<16x128xf32>
    %c0_2 = arith.constant 0 : index
    %c0_3 = arith.constant 0 : index
    %2 = vector.load %arg26[%c0_2, %c0_3] : memref<8x128xf32, #tpu.memory_space<vmem>>, vector<8x128xf32>
    %c0_4 = arith.constant 0 : index
    %c0_5 = arith.constant 0 : index
    %3 = vector.load %arg24[%c0_4, %c0_5] : memref<128x8xf32, #tpu.memory_space<vmem>>, vector<128x8xf32>
    %c0_6 = arith.constant 0 : index
    %c0_7 = arith.constant 0 : index
    %4 = vector.load %arg25[%c0_6, %c0_7] : memref<8x128xf32, #tpu.memory_space<vmem>>, vector<8x128xf32>
    %c0_8 = arith.constant 0 : index
    %c0_9 = arith.constant 0 : index
    %c0_10 = arith.constant 0 : index
    %5 = vector.load %arg2[%c0_8, %c0_9, %c0_10] : memref<5x16x16xf32, #tpu.memory_space<vmem>>, vector<1x16x16xf32>
    %6 = vector.shape_cast %5 : vector<1x16x16xf32> to vector<16x16xf32>
    %cst = arith.constant dense<0.000000e+00> : vector<16x128xf32>
    %7 = tpu.matmul %6, %1, %cst {dimension_numbers = #tpu.dot_dimension_numbers<[1], [0], [0], [1], [0, 0, 1, 1], [], []>} : vector<16x16xf32>, vector<16x128xf32>, vector<16x128xf32> -> vector<16x128xf32>
    %c1 = arith.constant 1 : index
    %c0_11 = arith.constant 0 : index
    %c0_12 = arith.constant 0 : index
    %8 = vector.load %arg2[%c1, %c0_11, %c0_12] : memref<5x16x16xf32, #tpu.memory_space<vmem>>, vector<1x16x16xf32>
    %9 = vector.shape_cast %8 : vector<1x16x16xf32> to vector<16x16xf32>
    %cst_13 = arith.constant dense<0.000000e+00> : vector<16x128xf32>
    %10 = tpu.matmul %9, %1, %cst_13 {dimension_numbers = #tpu.dot_dimension_numbers<[1], [0], [0], [1], [0, 0, 1, 1], [], []>} : vector<16x16xf32>, vector<16x128xf32>, vector<16x128xf32> -> vector<16x128xf32>
    %c2 = arith.constant 2 : index
    %c0_14 = arith.constant 0 : index
    %c0_15 = arith.constant 0 : index
    %11 = vector.load %arg2[%c2, %c0_14, %c0_15] : memref<5x16x16xf32, #tpu.memory_space<vmem>>, vector<1x16x16xf32>
    %12 = vector.shape_cast %11 : vector<1x16x16xf32> to vector<16x16xf32>
    %cst_16 = arith.constant dense<0.000000e+00> : vector<16x128xf32>
    %13 = tpu.matmul %12, %1, %cst_16 {dimension_numbers = #tpu.dot_dimension_numbers<[1], [0], [0], [1], [0, 0, 1, 1], [], []>} : vector<16x16xf32>, vector<16x128xf32>, vector<16x128xf32> -> vector<16x128xf32>
    %c3 = arith.constant 3 : index
    %c0_17 = arith.constant 0 : index
    %c0_18 = arith.constant 0 : index
    %14 = vector.load %arg2[%c3, %c0_17, %c0_18] : memref<5x16x16xf32, #tpu.memory_space<vmem>>, vector<1x16x16xf32>
    %15 = vector.shape_cast %14 : vector<1x16x16xf32> to vector<16x16xf32>
    %cst_19 = arith.constant dense<0.000000e+00> : vector<16x128xf32>
    %16 = tpu.matmul %15, %1, %cst_19 {dimension_numbers = #tpu.dot_dimension_numbers<[1], [0], [0], [1], [0, 0, 1, 1], [], []>} : vector<16x16xf32>, vector<16x128xf32>, vector<16x128xf32> -> vector<16x128xf32>
    %c4 = arith.constant 4 : index
    %c0_20 = arith.constant 0 : index
    %c0_21 = arith.constant 0 : index
    %17 = vector.load %arg2[%c4, %c0_20, %c0_21] : memref<5x16x16xf32, #tpu.memory_space<vmem>>, vector<1x16x16xf32>
    %18 = vector.shape_cast %17 : vector<1x16x16xf32> to vector<16x16xf32>
    %cst_22 = arith.constant dense<0.000000e+00> : vector<16x128xf32>
    %19 = tpu.matmul %18, %1, %cst_22 {dimension_numbers = #tpu.dot_dimension_numbers<[1], [0], [0], [1], [0, 0, 1, 1], [], []>} : vector<16x16xf32>, vector<16x128xf32>, vector<16x128xf32> -> vector<16x128xf32>
    %c0_23 = arith.constant 0 : index
    %c0_24 = arith.constant 0 : index
    %c0_25 = arith.constant 0 : index
    %20 = vector.load %arg5[%c0_23, %c0_24, %c0_25] : memref<3x128x128xf32, #tpu.memory_space<vmem>>, vector<1x128x128xf32>
    %21 = vector.shape_cast %20 : vector<1x128x128xf32> to vector<128x128xf32>
    %cst_26 = arith.constant dense<0.000000e+00> : vector<16x128xf32>
    %22 = tpu.matmul %10, %21, %cst_26 {dimension_numbers = #tpu.dot_dimension_numbers<[1], [0], [0], [1], [0, 0, 1, 1], [], []>} : vector<16x128xf32>, vector<128x128xf32>, vector<16x128xf32> -> vector<16x128xf32>
    %cst_27 = arith.constant 0.000000e+00 : f32
    %23 = vector.broadcast %cst_27 : f32 to vector<16x128xf32>
    %24 = arith.addf %23, %22 : vector<16x128xf32>
    %c1_28 = arith.constant 1 : index
    %c0_29 = arith.constant 0 : index
    %c0_30 = arith.constant 0 : index
    %25 = vector.load %arg5[%c1_28, %c0_29, %c0_30] : memref<3x128x128xf32, #tpu.memory_space<vmem>>, vector<1x128x128xf32>
    %26 = vector.shape_cast %25 : vector<1x128x128xf32> to vector<128x128xf32>
    %cst_31 = arith.constant dense<0.000000e+00> : vector<16x128xf32>
    %27 = tpu.matmul %13, %26, %cst_31 {dimension_numbers = #tpu.dot_dimension_numbers<[1], [0], [0], [1], [0, 0, 1, 1], [], []>} : vector<16x128xf32>, vector<128x128xf32>, vector<16x128xf32> -> vector<16x128xf32>
    %28 = arith.addf %24, %27 : vector<16x128xf32>
    %c2_32 = arith.constant 2 : index
    %c0_33 = arith.constant 0 : index
    %c0_34 = arith.constant 0 : index
    %29 = vector.load %arg5[%c2_32, %c0_33, %c0_34] : memref<3x128x128xf32, #tpu.memory_space<vmem>>, vector<1x128x128xf32>
    %30 = vector.shape_cast %29 : vector<1x128x128xf32> to vector<128x128xf32>
    %cst_35 = arith.constant dense<0.000000e+00> : vector<16x128xf32>
    %31 = tpu.matmul %16, %30, %cst_35 {dimension_numbers = #tpu.dot_dimension_numbers<[1], [0], [0], [1], [0, 0, 1, 1], [], []>} : vector<16x128xf32>, vector<128x128xf32>, vector<16x128xf32> -> vector<16x128xf32>
    %32 = arith.addf %28, %31 : vector<16x128xf32>
    %33 = vector.extract_strided_slice %2 {offsets = [0, 0], sizes = [1, 128], strides = [1, 1]} : vector<8x128xf32> to vector<1x128xf32>
    %34 = vector.broadcast %33 : vector<1x128xf32> to vector<16x128xf32>
    %35 = arith.addf %32, %34 : vector<16x128xf32>
    %cst_36 = arith.constant 0.000000e+00 : f32
    %36 = vector.broadcast %cst_36 : f32 to vector<16x128xf32>
    %37 = arith.cmpf oge, %35, %36 : vector<16x128xf32>
    %cst_37 = arith.constant 2.000000e-01 : f32
    %38 = vector.broadcast %cst_37 : f32 to vector<16x128xf32>
    %39 = arith.mulf %38, %35 : vector<16x128xf32>
    %40 = arith.select %37, %35, %39 : vector<16x128xi1>, vector<16x128xf32>
    %c0_38 = arith.constant 0 : index
    %c0_39 = arith.constant 0 : index
    %c0_40 = arith.constant 0 : index
    %41 = vector.load %arg6[%c0_38, %c0_39, %c0_40] : memref<5x128x128xf32, #tpu.memory_space<vmem>>, vector<1x128x128xf32>
    %42 = vector.shape_cast %41 : vector<1x128x128xf32> to vector<128x128xf32>
    %cst_41 = arith.constant dense<0.000000e+00> : vector<16x128xf32>
    %43 = tpu.matmul %7, %42, %cst_41 {dimension_numbers = #tpu.dot_dimension_numbers<[1], [0], [0], [1], [0, 0, 1, 1], [], []>} : vector<16x128xf32>, vector<128x128xf32>, vector<16x128xf32> -> vector<16x128xf32>
    %cst_42 = arith.constant 0.000000e+00 : f32
    %44 = vector.broadcast %cst_42 : f32 to vector<16x128xf32>
    %45 = arith.addf %44, %43 : vector<16x128xf32>
    %c1_43 = arith.constant 1 : index
    %c0_44 = arith.constant 0 : index
    %c0_45 = arith.constant 0 : index
    %46 = vector.load %arg6[%c1_43, %c0_44, %c0_45] : memref<5x128x128xf32, #tpu.memory_space<vmem>>, vector<1x128x128xf32>
    %47 = vector.shape_cast %46 : vector<1x128x128xf32> to vector<128x128xf32>
    %cst_46 = arith.constant dense<0.000000e+00> : vector<16x128xf32>
    %48 = tpu.matmul %10, %47, %cst_46 {dimension_numbers = #tpu.dot_dimension_numbers<[1], [0], [0], [1], [0, 0, 1, 1], [], []>} : vector<16x128xf32>, vector<128x128xf32>, vector<16x128xf32> -> vector<16x128xf32>
    %49 = arith.addf %45, %48 : vector<16x128xf32>
    %c2_47 = arith.constant 2 : index
    %c0_48 = arith.constant 0 : index
    %c0_49 = arith.constant 0 : index
    %50 = vector.load %arg6[%c2_47, %c0_48, %c0_49] : memref<5x128x128xf32, #tpu.memory_space<vmem>>, vector<1x128x128xf32>
    %51 = vector.shape_cast %50 : vector<1x128x128xf32> to vector<128x128xf32>
    %cst_50 = arith.constant dense<0.000000e+00> : vector<16x128xf32>
    %52 = tpu.matmul %13, %51, %cst_50 {dimension_numbers = #tpu.dot_dimension_numbers<[1], [0], [0], [1], [0, 0, 1, 1], [], []>} : vector<16x128xf32>, vector<128x128xf32>, vector<16x128xf32> -> vector<16x128xf32>
    %53 = arith.addf %49, %52 : vector<16x128xf32>
    %c3_51 = arith.constant 3 : index
    %c0_52 = arith.constant 0 : index
    %c0_53 = arith.constant 0 : index
    %54 = vector.load %arg6[%c3_51, %c0_52, %c0_53] : memref<5x128x128xf32, #tpu.memory_space<vmem>>, vector<1x128x128xf32>
    %55 = vector.shape_cast %54 : vector<1x128x128xf32> to vector<128x128xf32>
    %cst_54 = arith.constant dense<0.000000e+00> : vector<16x128xf32>
    %56 = tpu.matmul %16, %55, %cst_54 {dimension_numbers = #tpu.dot_dimension_numbers<[1], [0], [0], [1], [0, 0, 1, 1], [], []>} : vector<16x128xf32>, vector<128x128xf32>, vector<16x128xf32> -> vector<16x128xf32>
    %57 = arith.addf %53, %56 : vector<16x128xf32>
    %c4_55 = arith.constant 4 : index
    %c0_56 = arith.constant 0 : index
    %c0_57 = arith.constant 0 : index
    %58 = vector.load %arg6[%c4_55, %c0_56, %c0_57] : memref<5x128x128xf32, #tpu.memory_space<vmem>>, vector<1x128x128xf32>
    %59 = vector.shape_cast %58 : vector<1x128x128xf32> to vector<128x128xf32>
    %cst_58 = arith.constant dense<0.000000e+00> : vector<16x128xf32>
    %60 = tpu.matmul %19, %59, %cst_58 {dimension_numbers = #tpu.dot_dimension_numbers<[1], [0], [0], [1], [0, 0, 1, 1], [], []>} : vector<16x128xf32>, vector<128x128xf32>, vector<16x128xf32> -> vector<16x128xf32>
    %61 = arith.addf %57, %60 : vector<16x128xf32>
    %62 = vector.extract_strided_slice %2 {offsets = [1, 0], sizes = [1, 128], strides = [1, 1]} : vector<8x128xf32> to vector<1x128xf32>
    %63 = vector.broadcast %62 : vector<1x128xf32> to vector<16x128xf32>
    %64 = arith.addf %61, %63 : vector<16x128xf32>
    %cst_59 = arith.constant 0.000000e+00 : f32
    %65 = vector.broadcast %cst_59 : f32 to vector<16x128xf32>
    %66 = arith.cmpf oge, %64, %65 : vector<16x128xf32>
    %cst_60 = arith.constant 2.000000e-01 : f32
    %67 = vector.broadcast %cst_60 : f32 to vector<16x128xf32>
    %68 = arith.mulf %67, %64 : vector<16x128xf32>
    %69 = arith.select %66, %64, %68 : vector<16x128xi1>, vector<16x128xf32>
    %c1_61 = arith.constant 1 : index
    %c0_62 = arith.constant 0 : index
    %c0_63 = arith.constant 0 : index
    %70 = vector.load %arg2[%c1_61, %c0_62, %c0_63] : memref<5x16x16xf32, #tpu.memory_space<vmem>>, vector<1x16x16xf32>
    %71 = vector.shape_cast %70 : vector<1x16x16xf32> to vector<16x16xf32>
    %cst_64 = arith.constant dense<0.000000e+00> : vector<16x128xf32>
    %72 = tpu.matmul %71, %40, %cst_64 {dimension_numbers = #tpu.dot_dimension_numbers<[1], [0], [0], [1], [0, 0, 1, 1], [], []>} : vector<16x16xf32>, vector<16x128xf32>, vector<16x128xf32> -> vector<16x128xf32>
    %c2_65 = arith.constant 2 : index
    %c0_66 = arith.constant 0 : index
    %c0_67 = arith.constant 0 : index
    %73 = vector.load %arg2[%c2_65, %c0_66, %c0_67] : memref<5x16x16xf32, #tpu.memory_space<vmem>>, vector<1x16x16xf32>
    %74 = vector.shape_cast %73 : vector<1x16x16xf32> to vector<16x16xf32>
    %cst_68 = arith.constant dense<0.000000e+00> : vector<16x128xf32>
    %75 = tpu.matmul %74, %40, %cst_68 {dimension_numbers = #tpu.dot_dimension_numbers<[1], [0], [0], [1], [0, 0, 1, 1], [], []>} : vector<16x16xf32>, vector<16x128xf32>, vector<16x128xf32> -> vector<16x128xf32>
    %c3_69 = arith.constant 3 : index
    %c0_70 = arith.constant 0 : index
    %c0_71 = arith.constant 0 : index
    %76 = vector.load %arg2[%c3_69, %c0_70, %c0_71] : memref<5x16x16xf32, #tpu.memory_space<vmem>>, vector<1x16x16xf32>
    %77 = vector.shape_cast %76 : vector<1x16x16xf32> to vector<16x16xf32>
    %cst_72 = arith.constant dense<0.000000e+00> : vector<16x128xf32>
    %78 = tpu.matmul %77, %40, %cst_72 {dimension_numbers = #tpu.dot_dimension_numbers<[1], [0], [0], [1], [0, 0, 1, 1], [], []>} : vector<16x16xf32>, vector<16x128xf32>, vector<16x128xf32> -> vector<16x128xf32>
    %c1_73 = arith.constant 1 : index
    %c0_74 = arith.constant 0 : index
    %c0_75 = arith.constant 0 : index
    %79 = vector.load %arg2[%c1_73, %c0_74, %c0_75] : memref<5x16x16xf32, #tpu.memory_space<vmem>>, vector<1x16x16xf32>
    %80 = vector.shape_cast %79 : vector<1x16x16xf32> to vector<16x16xf32>
    %cst_76 = arith.constant dense<0.000000e+00> : vector<16x128xf32>
    %81 = tpu.matmul %80, %69, %cst_76 {dimension_numbers = #tpu.dot_dimension_numbers<[1], [0], [0], [1], [0, 0, 1, 1], [], []>} : vector<16x16xf32>, vector<16x128xf32>, vector<16x128xf32> -> vector<16x128xf32>
    %c2_77 = arith.constant 2 : index
    %c0_78 = arith.constant 0 : index
    %c0_79 = arith.constant 0 : index
    %82 = vector.load %arg2[%c2_77, %c0_78, %c0_79] : memref<5x16x16xf32, #tpu.memory_space<vmem>>, vector<1x16x16xf32>
    %83 = vector.shape_cast %82 : vector<1x16x16xf32> to vector<16x16xf32>
    %cst_80 = arith.constant dense<0.000000e+00> : vector<16x128xf32>
    %84 = tpu.matmul %83, %69, %cst_80 {dimension_numbers = #tpu.dot_dimension_numbers<[1], [0], [0], [1], [0, 0, 1, 1], [], []>} : vector<16x16xf32>, vector<16x128xf32>, vector<16x128xf32> -> vector<16x128xf32>
    %c3_81 = arith.constant 3 : index
    %c0_82 = arith.constant 0 : index
    %c0_83 = arith.constant 0 : index
    %85 = vector.load %arg2[%c3_81, %c0_82, %c0_83] : memref<5x16x16xf32, #tpu.memory_space<vmem>>, vector<1x16x16xf32>
    %86 = vector.shape_cast %85 : vector<1x16x16xf32> to vector<16x16xf32>
    %cst_84 = arith.constant dense<0.000000e+00> : vector<16x128xf32>
    %87 = tpu.matmul %86, %69, %cst_84 {dimension_numbers = #tpu.dot_dimension_numbers<[1], [0], [0], [1], [0, 0, 1, 1], [], []>} : vector<16x16xf32>, vector<16x128xf32>, vector<16x128xf32> -> vector<16x128xf32>
    %c0_85 = arith.constant 0 : index
    %c0_86 = arith.constant 0 : index
    %c0_87 = arith.constant 0 : index
    %88 = vector.load %arg7[%c0_85, %c0_86, %c0_87] : memref<3x128x128xf32, #tpu.memory_space<vmem>>, vector<1x128x128xf32>
    %89 = vector.shape_cast %88 : vector<1x128x128xf32> to vector<128x128xf32>
    %cst_88 = arith.constant dense<0.000000e+00> : vector<16x128xf32>
    %90 = tpu.matmul %72, %89, %cst_88 {dimension_numbers = #tpu.dot_dimension_numbers<[1], [0], [0], [1], [0, 0, 1, 1], [], []>} : vector<16x128xf32>, vector<128x128xf32>, vector<16x128xf32> -> vector<16x128xf32>
    %cst_89 = arith.constant 0.000000e+00 : f32
    %91 = vector.broadcast %cst_89 : f32 to vector<16x128xf32>
    %92 = arith.addf %91, %90 : vector<16x128xf32>
    %c1_90 = arith.constant 1 : index
    %c0_91 = arith.constant 0 : index
    %c0_92 = arith.constant 0 : index
    %93 = vector.load %arg7[%c1_90, %c0_91, %c0_92] : memref<3x128x128xf32, #tpu.memory_space<vmem>>, vector<1x128x128xf32>
    %94 = vector.shape_cast %93 : vector<1x128x128xf32> to vector<128x128xf32>
    %cst_93 = arith.constant dense<0.000000e+00> : vector<16x128xf32>
    %95 = tpu.matmul %75, %94, %cst_93 {dimension_numbers = #tpu.dot_dimension_numbers<[1], [0], [0], [1], [0, 0, 1, 1], [], []>} : vector<16x128xf32>, vector<128x128xf32>, vector<16x128xf32> -> vector<16x128xf32>
    %96 = arith.addf %92, %95 : vector<16x128xf32>
    %c2_94 = arith.constant 2 : index
    %c0_95 = arith.constant 0 : index
    %c0_96 = arith.constant 0 : index
    %97 = vector.load %arg7[%c2_94, %c0_95, %c0_96] : memref<3x128x128xf32, #tpu.memory_space<vmem>>, vector<1x128x128xf32>
    %98 = vector.shape_cast %97 : vector<1x128x128xf32> to vector<128x128xf32>
    %cst_97 = arith.constant dense<0.000000e+00> : vector<16x128xf32>
    %99 = tpu.matmul %78, %98, %cst_97 {dimension_numbers = #tpu.dot_dimension_numbers<[1], [0], [0], [1], [0, 0, 1, 1], [], []>} : vector<16x128xf32>, vector<128x128xf32>, vector<16x128xf32> -> vector<16x128xf32>
    %100 = arith.addf %96, %99 : vector<16x128xf32>
    %101 = vector.extract_strided_slice %2 {offsets = [2, 0], sizes = [1, 128], strides = [1, 1]} : vector<8x128xf32> to vector<1x128xf32>
    %102 = vector.broadcast %101 : vector<1x128xf32> to vector<16x128xf32>
    %103 = arith.addf %100, %102 : vector<16x128xf32>
    %cst_98 = arith.constant 0.000000e+00 : f32
    %104 = vector.broadcast %cst_98 : f32 to vector<16x128xf32>
    %105 = arith.cmpf oge, %103, %104 : vector<16x128xf32>
    %cst_99 = arith.constant 2.000000e-01 : f32
    %106 = vector.broadcast %cst_99 : f32 to vector<16x128xf32>
    %107 = arith.mulf %106, %103 : vector<16x128xf32>
    %108 = arith.select %105, %103, %107 : vector<16x128xi1>, vector<16x128xf32>
    %c0_100 = arith.constant 0 : index
    %c0_101 = arith.constant 0 : index
    %c0_102 = arith.constant 0 : index
    %109 = vector.load %arg8[%c0_100, %c0_101, %c0_102] : memref<3x128x128xf32, #tpu.memory_space<vmem>>, vector<1x128x128xf32>
    %110 = vector.shape_cast %109 : vector<1x128x128xf32> to vector<128x128xf32>
    %cst_103 = arith.constant dense<0.000000e+00> : vector<16x128xf32>
    %111 = tpu.matmul %81, %110, %cst_103 {dimension_numbers = #tpu.dot_dimension_numbers<[1], [0], [0], [1], [0, 0, 1, 1], [], []>} : vector<16x128xf32>, vector<128x128xf32>, vector<16x128xf32> -> vector<16x128xf32>
    %cst_104 = arith.constant 0.000000e+00 : f32
    %112 = vector.broadcast %cst_104 : f32 to vector<16x128xf32>
    %113 = arith.addf %112, %111 : vector<16x128xf32>
    %c1_105 = arith.constant 1 : index
    %c0_106 = arith.constant 0 : index
    %c0_107 = arith.constant 0 : index
    %114 = vector.load %arg8[%c1_105, %c0_106, %c0_107] : memref<3x128x128xf32, #tpu.memory_space<vmem>>, vector<1x128x128xf32>
    %115 = vector.shape_cast %114 : vector<1x128x128xf32> to vector<128x128xf32>
    %cst_108 = arith.constant dense<0.000000e+00> : vector<16x128xf32>
    %116 = tpu.matmul %84, %115, %cst_108 {dimension_numbers = #tpu.dot_dimension_numbers<[1], [0], [0], [1], [0, 0, 1, 1], [], []>} : vector<16x128xf32>, vector<128x128xf32>, vector<16x128xf32> -> vector<16x128xf32>
    %117 = arith.addf %113, %116 : vector<16x128xf32>
    %c2_109 = arith.constant 2 : index
    %c0_110 = arith.constant 0 : index
    %c0_111 = arith.constant 0 : index
    %118 = vector.load %arg8[%c2_109, %c0_110, %c0_111] : memref<3x128x128xf32, #tpu.memory_space<vmem>>, vector<1x128x128xf32>
    %119 = vector.shape_cast %118 : vector<1x128x128xf32> to vector<128x128xf32>
    %cst_112 = arith.constant dense<0.000000e+00> : vector<16x128xf32>
    %120 = tpu.matmul %87, %119, %cst_112 {dimension_numbers = #tpu.dot_dimension_numbers<[1], [0], [0], [1], [0, 0, 1, 1], [], []>} : vector<16x128xf32>, vector<128x128xf32>, vector<16x128xf32> -> vector<16x128xf32>
    %121 = arith.addf %117, %120 : vector<16x128xf32>
    %122 = vector.extract_strided_slice %2 {offsets = [3, 0], sizes = [1, 128], strides = [1, 1]} : vector<8x128xf32> to vector<1x128xf32>
    %123 = vector.broadcast %122 : vector<1x128xf32> to vector<16x128xf32>
    %124 = arith.addf %121, %123 : vector<16x128xf32>
    %cst_113 = arith.constant 0.000000e+00 : f32
    %125 = vector.broadcast %cst_113 : f32 to vector<16x128xf32>
    %126 = arith.cmpf oge, %124, %125 : vector<16x128xf32>
    %cst_114 = arith.constant 2.000000e-01 : f32
    %127 = vector.broadcast %cst_114 : f32 to vector<16x128xf32>
    %128 = arith.mulf %127, %124 : vector<16x128xf32>
    %129 = arith.select %126, %124, %128 : vector<16x128xi1>, vector<16x128xf32>
    %cst_115 = arith.constant dense<0.000000e+00> : vector<128xf32>
    %130 = vector.multi_reduction <add>, %108, %cst_115 [0] : vector<16x128xf32> to vector<128xf32>
    %131 = vector.shape_cast %130 : vector<128xf32> to vector<1x128xf32>
    %cst_116 = arith.constant dense<0.000000e+00> : vector<1x8xf32>
    %132 = tpu.matmul %131, %3, %cst_116 {dimension_numbers = #tpu.dot_dimension_numbers<[1], [0], [0], [1], [0, 0, 1, 1], [], []>} : vector<1x128xf32>, vector<128x8xf32>, vector<1x8xf32> -> vector<1x8xf32>
    %cst_117 = arith.constant 0.000000e+00 : f32
    %133 = vector.broadcast %cst_117 : f32 to vector<1x8xf32>
    %134 = arith.subf %133, %132 : vector<1x8xf32>
    %135 = math.exp %134 : vector<1x8xf32>
    %cst_118 = arith.constant 1.000000e+00 : f32
    %136 = vector.broadcast %cst_118 : f32 to vector<1x8xf32>
    %137 = arith.addf %136, %135 : vector<1x8xf32>
    %cst_119 = arith.constant 1.000000e+00 : f32
    %138 = vector.broadcast %cst_119 : f32 to vector<1x8xf32>
    %139 = arith.divf %138, %137 : vector<1x8xf32>
    %cst_120 = arith.constant dense<0.000000e+00> : vector<1x128xf32>
    %140 = tpu.matmul %139, %4, %cst_120 {dimension_numbers = #tpu.dot_dimension_numbers<[1], [0], [0], [1], [0, 0, 1, 1], [], []>} : vector<1x8xf32>, vector<8x128xf32>, vector<1x128xf32> -> vector<1x128xf32>
    %cst_121 = arith.constant dense<0.000000e+00> : vector<128xf32>
    %141 = vector.multi_reduction <add>, %129, %cst_121 [0] : vector<16x128xf32> to vector<128xf32>
    %142 = vector.shape_cast %141 : vector<128xf32> to vector<1x128xf32>
    %cst_122 = arith.constant dense<0.000000e+00> : vector<1x8xf32>
    %143 = tpu.matmul %142, %3, %cst_122 {dimension_numbers = #tpu.dot_dimension_numbers<[1], [0], [0], [1], [0, 0, 1, 1], [], []>} : vector<1x128xf32>, vector<128x8xf32>, vector<1x8xf32> -> vector<1x8xf32>
    %cst_123 = arith.constant 0.000000e+00 : f32
    %144 = vector.broadcast %cst_123 : f32 to vector<1x8xf32>
    %145 = arith.subf %144, %143 : vector<1x8xf32>
    %146 = math.exp %145 : vector<1x8xf32>
    %cst_124 = arith.constant 1.000000e+00 : f32
    %147 = vector.broadcast %cst_124 : f32 to vector<1x8xf32>
    %148 = arith.addf %147, %146 : vector<1x8xf32>
    %cst_125 = arith.constant 1.000000e+00 : f32
    %149 = vector.broadcast %cst_125 : f32 to vector<1x8xf32>
    %150 = arith.divf %149, %148 : vector<1x8xf32>
    %cst_126 = arith.constant dense<0.000000e+00> : vector<1x128xf32>
    %151 = tpu.matmul %150, %4, %cst_126 {dimension_numbers = #tpu.dot_dimension_numbers<[1], [0], [0], [1], [0, 0, 1, 1], [], []>} : vector<1x8xf32>, vector<8x128xf32>, vector<1x128xf32> -> vector<1x128xf32>
    %c0_127 = arith.constant 0 : index
    %c0_128 = arith.constant 0 : index
    %c0_129 = arith.constant 0 : index
    %152 = vector.load %arg18[%c0_127, %c0_128, %c0_129] : memref<2x8x16xf32, #tpu.memory_space<vmem>>, vector<1x8x16xf32>
    %153 = vector.shape_cast %152 : vector<1x8x16xf32> to vector<8x16xf32>
    %cst_130 = arith.constant dense<0.000000e+00> : vector<8x128xf32>
    %154 = tpu.matmul %153, %40, %cst_130 {dimension_numbers = #tpu.dot_dimension_numbers<[1], [0], [0], [1], [0, 0, 1, 1], [], []>} : vector<8x16xf32>, vector<16x128xf32>, vector<8x128xf32> -> vector<8x128xf32>
    %c1_131 = arith.constant 1 : index
    %c0_132 = arith.constant 0 : index
    %c0_133 = arith.constant 0 : index
    %155 = vector.load %arg18[%c1_131, %c0_132, %c0_133] : memref<2x8x16xf32, #tpu.memory_space<vmem>>, vector<1x8x16xf32>
    %156 = vector.shape_cast %155 : vector<1x8x16xf32> to vector<8x16xf32>
    %cst_134 = arith.constant dense<0.000000e+00> : vector<8x128xf32>
    %157 = tpu.matmul %156, %40, %cst_134 {dimension_numbers = #tpu.dot_dimension_numbers<[1], [0], [0], [1], [0, 0, 1, 1], [], []>} : vector<8x16xf32>, vector<16x128xf32>, vector<8x128xf32> -> vector<8x128xf32>
    %158 = arith.maximumf %154, %157 : vector<8x128xf32>
    %c0_135 = arith.constant 0 : index
    %c0_136 = arith.constant 0 : index
    %c0_137 = arith.constant 0 : index
    %159 = vector.load %arg19[%c0_135, %c0_136, %c0_137] : memref<2x128x64xf32, #tpu.memory_space<vmem>>, vector<1x128x64xf32>
    %160 = vector.shape_cast %159 : vector<1x128x64xf32> to vector<128x64xf32>
    %cst_138 = arith.constant dense<0.000000e+00> : vector<8x64xf32>
    %161 = tpu.matmul %158, %160, %cst_138 {dimension_numbers = #tpu.dot_dimension_numbers<[1], [0], [0], [1], [0, 0, 1, 1], [], []>} : vector<8x128xf32>, vector<128x64xf32>, vector<8x64xf32> -> vector<8x64xf32>
    %c1_139 = arith.constant 1 : index
    %c0_140 = arith.constant 0 : index
    %c0_141 = arith.constant 0 : index
    %162 = vector.load %arg19[%c1_139, %c0_140, %c0_141] : memref<2x128x64xf32, #tpu.memory_space<vmem>>, vector<1x128x64xf32>
    %163 = vector.shape_cast %162 : vector<1x128x64xf32> to vector<128x64xf32>
    %cst_142 = arith.constant dense<0.000000e+00> : vector<8x64xf32>
    %164 = tpu.matmul %158, %163, %cst_142 {dimension_numbers = #tpu.dot_dimension_numbers<[1], [0], [0], [1], [0, 0, 1, 1], [], []>} : vector<8x128xf32>, vector<128x64xf32>, vector<8x64xf32> -> vector<8x64xf32>
    %165 = arith.maximumf %161, %164 : vector<8x64xf32>
    %c0_143 = arith.constant 0 : index
    %c0_144 = arith.constant 0 : index
    %c0_145 = arith.constant 0 : index
    %166 = vector.load %arg20[%c0_143, %c0_144, %c0_145] : memref<2x4x8xf32, #tpu.memory_space<vmem>>, vector<1x4x8xf32>
    %167 = vector.shape_cast %166 : vector<1x4x8xf32> to vector<4x8xf32>
    %cst_146 = arith.constant dense<0.000000e+00> : vector<4x64xf32>
    %168 = tpu.matmul %167, %165, %cst_146 {dimension_numbers = #tpu.dot_dimension_numbers<[1], [0], [0], [1], [0, 0, 1, 1], [], []>} : vector<4x8xf32>, vector<8x64xf32>, vector<4x64xf32> -> vector<4x64xf32>
    %c1_147 = arith.constant 1 : index
    %c0_148 = arith.constant 0 : index
    %c0_149 = arith.constant 0 : index
    %169 = vector.load %arg20[%c1_147, %c0_148, %c0_149] : memref<2x4x8xf32, #tpu.memory_space<vmem>>, vector<1x4x8xf32>
    %170 = vector.shape_cast %169 : vector<1x4x8xf32> to vector<4x8xf32>
    %cst_150 = arith.constant dense<0.000000e+00> : vector<4x64xf32>
    %171 = tpu.matmul %170, %165, %cst_150 {dimension_numbers = #tpu.dot_dimension_numbers<[1], [0], [0], [1], [0, 0, 1, 1], [], []>} : vector<4x8xf32>, vector<8x64xf32>, vector<4x64xf32> -> vector<4x64xf32>
    %172 = arith.maximumf %168, %171 : vector<4x64xf32>
    %c0_151 = arith.constant 0 : index
    %c0_152 = arith.constant 0 : index
    %c0_153 = arith.constant 0 : index
    %173 = vector.load %arg21[%c0_151, %c0_152, %c0_153] : memref<2x64x32xf32, #tpu.memory_space<vmem>>, vector<1x64x32xf32>
    %174 = vector.shape_cast %173 : vector<1x64x32xf32> to vector<64x32xf32>
    %cst_154 = arith.constant dense<0.000000e+00> : vector<4x32xf32>
    %175 = tpu.matmul %172, %174, %cst_154 {dimension_numbers = #tpu.dot_dimension_numbers<[1], [0], [0], [1], [0, 0, 1, 1], [], []>} : vector<4x64xf32>, vector<64x32xf32>, vector<4x32xf32> -> vector<4x32xf32>
    %c1_155 = arith.constant 1 : index
    %c0_156 = arith.constant 0 : index
    %c0_157 = arith.constant 0 : index
    %176 = vector.load %arg21[%c1_155, %c0_156, %c0_157] : memref<2x64x32xf32, #tpu.memory_space<vmem>>, vector<1x64x32xf32>
    %177 = vector.shape_cast %176 : vector<1x64x32xf32> to vector<64x32xf32>
    %cst_158 = arith.constant dense<0.000000e+00> : vector<4x32xf32>
    %178 = tpu.matmul %172, %177, %cst_158 {dimension_numbers = #tpu.dot_dimension_numbers<[1], [0], [0], [1], [0, 0, 1, 1], [], []>} : vector<4x64xf32>, vector<64x32xf32>, vector<4x32xf32> -> vector<4x32xf32>
    %179 = arith.maximumf %175, %178 : vector<4x32xf32>
    %c0_159 = arith.constant 0 : index
    %c0_160 = arith.constant 0 : index
    %c0_161 = arith.constant 0 : index
    %180 = vector.load %arg18[%c0_159, %c0_160, %c0_161] : memref<2x8x16xf32, #tpu.memory_space<vmem>>, vector<1x8x16xf32>
    %181 = vector.shape_cast %180 : vector<1x8x16xf32> to vector<8x16xf32>
    %cst_162 = arith.constant dense<0.000000e+00> : vector<8x128xf32>
    %182 = tpu.matmul %181, %69, %cst_162 {dimension_numbers = #tpu.dot_dimension_numbers<[1], [0], [0], [1], [0, 0, 1, 1], [], []>} : vector<8x16xf32>, vector<16x128xf32>, vector<8x128xf32> -> vector<8x128xf32>
    %c1_163 = arith.constant 1 : index
    %c0_164 = arith.constant 0 : index
    %c0_165 = arith.constant 0 : index
    %183 = vector.load %arg18[%c1_163, %c0_164, %c0_165] : memref<2x8x16xf32, #tpu.memory_space<vmem>>, vector<1x8x16xf32>
    %184 = vector.shape_cast %183 : vector<1x8x16xf32> to vector<8x16xf32>
    %cst_166 = arith.constant dense<0.000000e+00> : vector<8x128xf32>
    %185 = tpu.matmul %184, %69, %cst_166 {dimension_numbers = #tpu.dot_dimension_numbers<[1], [0], [0], [1], [0, 0, 1, 1], [], []>} : vector<8x16xf32>, vector<16x128xf32>, vector<8x128xf32> -> vector<8x128xf32>
    %186 = arith.maximumf %182, %185 : vector<8x128xf32>
    %c0_167 = arith.constant 0 : index
    %c0_168 = arith.constant 0 : index
    %c0_169 = arith.constant 0 : index
    %187 = vector.load %arg19[%c0_167, %c0_168, %c0_169] : memref<2x128x64xf32, #tpu.memory_space<vmem>>, vector<1x128x64xf32>
    %188 = vector.shape_cast %187 : vector<1x128x64xf32> to vector<128x64xf32>
    %cst_170 = arith.constant dense<0.000000e+00> : vector<8x64xf32>
    %189 = tpu.matmul %186, %188, %cst_170 {dimension_numbers = #tpu.dot_dimension_numbers<[1], [0], [0], [1], [0, 0, 1, 1], [], []>} : vector<8x128xf32>, vector<128x64xf32>, vector<8x64xf32> -> vector<8x64xf32>
    %c1_171 = arith.constant 1 : index
    %c0_172 = arith.constant 0 : index
    %c0_173 = arith.constant 0 : index
    %190 = vector.load %arg19[%c1_171, %c0_172, %c0_173] : memref<2x128x64xf32, #tpu.memory_space<vmem>>, vector<1x128x64xf32>
    %191 = vector.shape_cast %190 : vector<1x128x64xf32> to vector<128x64xf32>
    %cst_174 = arith.constant dense<0.000000e+00> : vector<8x64xf32>
    %192 = tpu.matmul %186, %191, %cst_174 {dimension_numbers = #tpu.dot_dimension_numbers<[1], [0], [0], [1], [0, 0, 1, 1], [], []>} : vector<8x128xf32>, vector<128x64xf32>, vector<8x64xf32> -> vector<8x64xf32>
    %193 = arith.maximumf %189, %192 : vector<8x64xf32>
    %c0_175 = arith.constant 0 : index
    %c0_176 = arith.constant 0 : index
    %c0_177 = arith.constant 0 : index
    %194 = vector.load %arg20[%c0_175, %c0_176, %c0_177] : memref<2x4x8xf32, #tpu.memory_space<vmem>>, vector<1x4x8xf32>
    %195 = vector.shape_cast %194 : vector<1x4x8xf32> to vector<4x8xf32>
    %cst_178 = arith.constant dense<0.000000e+00> : vector<4x64xf32>
    %196 = tpu.matmul %195, %193, %cst_178 {dimension_numbers = #tpu.dot_dimension_numbers<[1], [0], [0], [1], [0, 0, 1, 1], [], []>} : vector<4x8xf32>, vector<8x64xf32>, vector<4x64xf32> -> vector<4x64xf32>
    %c1_179 = arith.constant 1 : index
    %c0_180 = arith.constant 0 : index
    %c0_181 = arith.constant 0 : index
    %197 = vector.load %arg20[%c1_179, %c0_180, %c0_181] : memref<2x4x8xf32, #tpu.memory_space<vmem>>, vector<1x4x8xf32>
    %198 = vector.shape_cast %197 : vector<1x4x8xf32> to vector<4x8xf32>
    %cst_182 = arith.constant dense<0.000000e+00> : vector<4x64xf32>
    %199 = tpu.matmul %198, %193, %cst_182 {dimension_numbers = #tpu.dot_dimension_numbers<[1], [0], [0], [1], [0, 0, 1, 1], [], []>} : vector<4x8xf32>, vector<8x64xf32>, vector<4x64xf32> -> vector<4x64xf32>
    %200 = arith.maximumf %196, %199 : vector<4x64xf32>
    %c0_183 = arith.constant 0 : index
    %c0_184 = arith.constant 0 : index
    %c0_185 = arith.constant 0 : index
    %201 = vector.load %arg21[%c0_183, %c0_184, %c0_185] : memref<2x64x32xf32, #tpu.memory_space<vmem>>, vector<1x64x32xf32>
    %202 = vector.shape_cast %201 : vector<1x64x32xf32> to vector<64x32xf32>
    %cst_186 = arith.constant dense<0.000000e+00> : vector<4x32xf32>
    %203 = tpu.matmul %200, %202, %cst_186 {dimension_numbers = #tpu.dot_dimension_numbers<[1], [0], [0], [1], [0, 0, 1, 1], [], []>} : vector<4x64xf32>, vector<64x32xf32>, vector<4x32xf32> -> vector<4x32xf32>
    %c1_187 = arith.constant 1 : index
    %c0_188 = arith.constant 0 : index
    %c0_189 = arith.constant 0 : index
    %204 = vector.load %arg21[%c1_187, %c0_188, %c0_189] : memref<2x64x32xf32, #tpu.memory_space<vmem>>, vector<1x64x32xf32>
    %205 = vector.shape_cast %204 : vector<1x64x32xf32> to vector<64x32xf32>
    %cst_190 = arith.constant dense<0.000000e+00> : vector<4x32xf32>
    %206 = tpu.matmul %200, %205, %cst_190 {dimension_numbers = #tpu.dot_dimension_numbers<[1], [0], [0], [1], [0, 0, 1, 1], [], []>} : vector<4x64xf32>, vector<64x32xf32>, vector<4x32xf32> -> vector<4x32xf32>
    %207 = arith.maximumf %203, %206 : vector<4x32xf32>
    %208 = vector.extract_strided_slice %140 {offsets = [0, 0], sizes = [1, 64], strides = [1, 1]} : vector<1x128xf32> to vector<1x64xf32>
    %209 = vector.broadcast %208 : vector<1x64xf32> to vector<8x64xf32>
    %210 = arith.mulf %165, %209 : vector<8x64xf32>
    %211 = vector.extract_strided_slice %140 {offsets = [0, 0], sizes = [1, 32], strides = [1, 1]} : vector<1x128xf32> to vector<1x32xf32>
    %212 = vector.broadcast %211 : vector<1x32xf32> to vector<4x32xf32>
    %213 = arith.mulf %179, %212 : vector<4x32xf32>
    %214 = vector.extract_strided_slice %151 {offsets = [0, 0], sizes = [1, 64], strides = [1, 1]} : vector<1x128xf32> to vector<1x64xf32>
    %215 = vector.broadcast %214 : vector<1x64xf32> to vector<8x64xf32>
    %216 = arith.mulf %193, %215 : vector<8x64xf32>
    %217 = vector.extract_strided_slice %151 {offsets = [0, 0], sizes = [1, 32], strides = [1, 1]} : vector<1x128xf32> to vector<1x32xf32>
    %218 = vector.broadcast %217 : vector<1x32xf32> to vector<4x32xf32>
    %219 = arith.mulf %207, %218 : vector<4x32xf32>
    %220 = vector.broadcast %140 : vector<1x128xf32> to vector<16x128xf32>
    %221 = arith.mulf %72, %220 : vector<16x128xf32>
    %222 = vector.broadcast %140 : vector<1x128xf32> to vector<16x128xf32>
    %223 = arith.mulf %75, %222 : vector<16x128xf32>
    %224 = vector.broadcast %140 : vector<1x128xf32> to vector<16x128xf32>
    %225 = arith.mulf %78, %224 : vector<16x128xf32>
    %226 = vector.broadcast %151 : vector<1x128xf32> to vector<16x128xf32>
    %227 = arith.mulf %81, %226 : vector<16x128xf32>
    %228 = vector.broadcast %151 : vector<1x128xf32> to vector<16x128xf32>
    %229 = arith.mulf %84, %228 : vector<16x128xf32>
    %230 = vector.broadcast %151 : vector<1x128xf32> to vector<16x128xf32>
    %231 = arith.mulf %87, %230 : vector<16x128xf32>
    %c0_191 = arith.constant 0 : index
    %c0_192 = arith.constant 0 : index
    %c0_193 = arith.constant 0 : index
    %232 = vector.load %arg9[%c0_191, %c0_192, %c0_193] : memref<3x128x128xf32, #tpu.memory_space<vmem>>, vector<1x128x128xf32>
    %233 = vector.shape_cast %232 : vector<1x128x128xf32> to vector<128x128xf32>
    %cst_194 = arith.constant dense<0.000000e+00> : vector<16x128xf32>
    %234 = tpu.matmul %221, %233, %cst_194 {dimension_numbers = #tpu.dot_dimension_numbers<[1], [0], [0], [1], [0, 0, 1, 1], [], []>} : vector<16x128xf32>, vector<128x128xf32>, vector<16x128xf32> -> vector<16x128xf32>
    %c0_195 = arith.constant 0 : index
    %c0_196 = arith.constant 0 : index
    %c0_197 = arith.constant 0 : index
    %235 = vector.load %arg10[%c0_195, %c0_196, %c0_197] : memref<3x128x128xf32, #tpu.memory_space<vmem>>, vector<1x128x128xf32>
    %236 = vector.shape_cast %235 : vector<1x128x128xf32> to vector<128x128xf32>
    %cst_198 = arith.constant dense<0.000000e+00> : vector<16x128xf32>
    %237 = tpu.matmul %227, %236, %cst_198 {dimension_numbers = #tpu.dot_dimension_numbers<[1], [0], [0], [1], [0, 0, 1, 1], [], []>} : vector<16x128xf32>, vector<128x128xf32>, vector<16x128xf32> -> vector<16x128xf32>
    %238 = arith.addf %234, %237 : vector<16x128xf32>
    %cst_199 = arith.constant 0.000000e+00 : f32
    %239 = vector.broadcast %cst_199 : f32 to vector<16x128xf32>
    %240 = arith.addf %239, %238 : vector<16x128xf32>
    %c1_200 = arith.constant 1 : index
    %c0_201 = arith.constant 0 : index
    %c0_202 = arith.constant 0 : index
    %241 = vector.load %arg9[%c1_200, %c0_201, %c0_202] : memref<3x128x128xf32, #tpu.memory_space<vmem>>, vector<1x128x128xf32>
    %242 = vector.shape_cast %241 : vector<1x128x128xf32> to vector<128x128xf32>
    %cst_203 = arith.constant dense<0.000000e+00> : vector<16x128xf32>
    %243 = tpu.matmul %223, %242, %cst_203 {dimension_numbers = #tpu.dot_dimension_numbers<[1], [0], [0], [1], [0, 0, 1, 1], [], []>} : vector<16x128xf32>, vector<128x128xf32>, vector<16x128xf32> -> vector<16x128xf32>
    %c1_204 = arith.constant 1 : index
    %c0_205 = arith.constant 0 : index
    %c0_206 = arith.constant 0 : index
    %244 = vector.load %arg10[%c1_204, %c0_205, %c0_206] : memref<3x128x128xf32, #tpu.memory_space<vmem>>, vector<1x128x128xf32>
    %245 = vector.shape_cast %244 : vector<1x128x128xf32> to vector<128x128xf32>
    %cst_207 = arith.constant dense<0.000000e+00> : vector<16x128xf32>
    %246 = tpu.matmul %229, %245, %cst_207 {dimension_numbers = #tpu.dot_dimension_numbers<[1], [0], [0], [1], [0, 0, 1, 1], [], []>} : vector<16x128xf32>, vector<128x128xf32>, vector<16x128xf32> -> vector<16x128xf32>
    %247 = arith.addf %243, %246 : vector<16x128xf32>
    %248 = arith.addf %240, %247 : vector<16x128xf32>
    %c2_208 = arith.constant 2 : index
    %c0_209 = arith.constant 0 : index
    %c0_210 = arith.constant 0 : index
    %249 = vector.load %arg9[%c2_208, %c0_209, %c0_210] : memref<3x128x128xf32, #tpu.memory_space<vmem>>, vector<1x128x128xf32>
    %250 = vector.shape_cast %249 : vector<1x128x128xf32> to vector<128x128xf32>
    %cst_211 = arith.constant dense<0.000000e+00> : vector<16x128xf32>
    %251 = tpu.matmul %225, %250, %cst_211 {dimension_numbers = #tpu.dot_dimension_numbers<[1], [0], [0], [1], [0, 0, 1, 1], [], []>} : vector<16x128xf32>, vector<128x128xf32>, vector<16x128xf32> -> vector<16x128xf32>
    %c2_212 = arith.constant 2 : index
    %c0_213 = arith.constant 0 : index
    %c0_214 = arith.constant 0 : index
    %252 = vector.load %arg10[%c2_212, %c0_213, %c0_214] : memref<3x128x128xf32, #tpu.memory_space<vmem>>, vector<1x128x128xf32>
    %253 = vector.shape_cast %252 : vector<1x128x128xf32> to vector<128x128xf32>
    %cst_215 = arith.constant dense<0.000000e+00> : vector<16x128xf32>
    %254 = tpu.matmul %231, %253, %cst_215 {dimension_numbers = #tpu.dot_dimension_numbers<[1], [0], [0], [1], [0, 0, 1, 1], [], []>} : vector<16x128xf32>, vector<128x128xf32>, vector<16x128xf32> -> vector<16x128xf32>
    %255 = arith.addf %251, %254 : vector<16x128xf32>
    %256 = arith.addf %248, %255 : vector<16x128xf32>
    %257 = vector.extract_strided_slice %2 {offsets = [4, 0], sizes = [1, 128], strides = [1, 1]} : vector<8x128xf32> to vector<1x128xf32>
    %258 = vector.broadcast %257 : vector<1x128xf32> to vector<16x128xf32>
    %259 = arith.addf %256, %258 : vector<16x128xf32>
    %cst_216 = arith.constant 0.000000e+00 : f32
    %260 = vector.broadcast %cst_216 : f32 to vector<16x128xf32>
    %261 = arith.cmpf oge, %259, %260 : vector<16x128xf32>
    %cst_217 = arith.constant 2.000000e-01 : f32
    %262 = vector.broadcast %cst_217 : f32 to vector<16x128xf32>
    %263 = arith.mulf %262, %259 : vector<16x128xf32>
    %264 = arith.select %261, %259, %263 : vector<16x128xi1>, vector<16x128xf32>
    %c0_218 = arith.constant 0 : index
    %c0_219 = arith.constant 0 : index
    %c0_220 = arith.constant 0 : index
    %265 = vector.load %arg3[%c0_218, %c0_219, %c0_220] : memref<3x8x8xf32, #tpu.memory_space<vmem>>, vector<1x8x8xf32>
    %266 = vector.shape_cast %265 : vector<1x8x8xf32> to vector<8x8xf32>
    %cst_221 = arith.constant dense<0.000000e+00> : vector<8x64xf32>
    %267 = tpu.matmul %266, %210, %cst_221 {dimension_numbers = #tpu.dot_dimension_numbers<[1], [0], [0], [1], [0, 0, 1, 1], [], []>} : vector<8x8xf32>, vector<8x64xf32>, vector<8x64xf32> -> vector<8x64xf32>
    %c1_222 = arith.constant 1 : index
    %c0_223 = arith.constant 0 : index
    %c0_224 = arith.constant 0 : index
    %268 = vector.load %arg3[%c1_222, %c0_223, %c0_224] : memref<3x8x8xf32, #tpu.memory_space<vmem>>, vector<1x8x8xf32>
    %269 = vector.shape_cast %268 : vector<1x8x8xf32> to vector<8x8xf32>
    %cst_225 = arith.constant dense<0.000000e+00> : vector<8x64xf32>
    %270 = tpu.matmul %269, %210, %cst_225 {dimension_numbers = #tpu.dot_dimension_numbers<[1], [0], [0], [1], [0, 0, 1, 1], [], []>} : vector<8x8xf32>, vector<8x64xf32>, vector<8x64xf32> -> vector<8x64xf32>
    %c2_226 = arith.constant 2 : index
    %c0_227 = arith.constant 0 : index
    %c0_228 = arith.constant 0 : index
    %271 = vector.load %arg3[%c2_226, %c0_227, %c0_228] : memref<3x8x8xf32, #tpu.memory_space<vmem>>, vector<1x8x8xf32>
    %272 = vector.shape_cast %271 : vector<1x8x8xf32> to vector<8x8xf32>
    %cst_229 = arith.constant dense<0.000000e+00> : vector<8x64xf32>
    %273 = tpu.matmul %272, %210, %cst_229 {dimension_numbers = #tpu.dot_dimension_numbers<[1], [0], [0], [1], [0, 0, 1, 1], [], []>} : vector<8x8xf32>, vector<8x64xf32>, vector<8x64xf32> -> vector<8x64xf32>
    %c0_230 = arith.constant 0 : index
    %c0_231 = arith.constant 0 : index
    %c0_232 = arith.constant 0 : index
    %274 = vector.load %arg3[%c0_230, %c0_231, %c0_232] : memref<3x8x8xf32, #tpu.memory_space<vmem>>, vector<1x8x8xf32>
    %275 = vector.shape_cast %274 : vector<1x8x8xf32> to vector<8x8xf32>
    %cst_233 = arith.constant dense<0.000000e+00> : vector<8x64xf32>
    %276 = tpu.matmul %275, %216, %cst_233 {dimension_numbers = #tpu.dot_dimension_numbers<[1], [0], [0], [1], [0, 0, 1, 1], [], []>} : vector<8x8xf32>, vector<8x64xf32>, vector<8x64xf32> -> vector<8x64xf32>
    %c1_234 = arith.constant 1 : index
    %c0_235 = arith.constant 0 : index
    %c0_236 = arith.constant 0 : index
    %277 = vector.load %arg3[%c1_234, %c0_235, %c0_236] : memref<3x8x8xf32, #tpu.memory_space<vmem>>, vector<1x8x8xf32>
    %278 = vector.shape_cast %277 : vector<1x8x8xf32> to vector<8x8xf32>
    %cst_237 = arith.constant dense<0.000000e+00> : vector<8x64xf32>
    %279 = tpu.matmul %278, %216, %cst_237 {dimension_numbers = #tpu.dot_dimension_numbers<[1], [0], [0], [1], [0, 0, 1, 1], [], []>} : vector<8x8xf32>, vector<8x64xf32>, vector<8x64xf32> -> vector<8x64xf32>
    %c2_238 = arith.constant 2 : index
    %c0_239 = arith.constant 0 : index
    %c0_240 = arith.constant 0 : index
    %280 = vector.load %arg3[%c2_238, %c0_239, %c0_240] : memref<3x8x8xf32, #tpu.memory_space<vmem>>, vector<1x8x8xf32>
    %281 = vector.shape_cast %280 : vector<1x8x8xf32> to vector<8x8xf32>
    %cst_241 = arith.constant dense<0.000000e+00> : vector<8x64xf32>
    %282 = tpu.matmul %281, %216, %cst_241 {dimension_numbers = #tpu.dot_dimension_numbers<[1], [0], [0], [1], [0, 0, 1, 1], [], []>} : vector<8x8xf32>, vector<8x64xf32>, vector<8x64xf32> -> vector<8x64xf32>
    %c0_242 = arith.constant 0 : index
    %c0_243 = arith.constant 0 : index
    %c0_244 = arith.constant 0 : index
    %283 = vector.load %arg11[%c0_242, %c0_243, %c0_244] : memref<3x64x64xf32, #tpu.memory_space<vmem>>, vector<1x64x64xf32>
    %284 = vector.shape_cast %283 : vector<1x64x64xf32> to vector<64x64xf32>
    %cst_245 = arith.constant dense<0.000000e+00> : vector<8x64xf32>
    %285 = tpu.matmul %267, %284, %cst_245 {dimension_numbers = #tpu.dot_dimension_numbers<[1], [0], [0], [1], [0, 0, 1, 1], [], []>} : vector<8x64xf32>, vector<64x64xf32>, vector<8x64xf32> -> vector<8x64xf32>
    %c0_246 = arith.constant 0 : index
    %c0_247 = arith.constant 0 : index
    %c0_248 = arith.constant 0 : index
    %286 = vector.load %arg12[%c0_246, %c0_247, %c0_248] : memref<3x64x64xf32, #tpu.memory_space<vmem>>, vector<1x64x64xf32>
    %287 = vector.shape_cast %286 : vector<1x64x64xf32> to vector<64x64xf32>
    %cst_249 = arith.constant dense<0.000000e+00> : vector<8x64xf32>
    %288 = tpu.matmul %276, %287, %cst_249 {dimension_numbers = #tpu.dot_dimension_numbers<[1], [0], [0], [1], [0, 0, 1, 1], [], []>} : vector<8x64xf32>, vector<64x64xf32>, vector<8x64xf32> -> vector<8x64xf32>
    %289 = arith.addf %285, %288 : vector<8x64xf32>
    %cst_250 = arith.constant 0.000000e+00 : f32
    %290 = vector.broadcast %cst_250 : f32 to vector<8x64xf32>
    %291 = arith.addf %290, %289 : vector<8x64xf32>
    %c1_251 = arith.constant 1 : index
    %c0_252 = arith.constant 0 : index
    %c0_253 = arith.constant 0 : index
    %292 = vector.load %arg11[%c1_251, %c0_252, %c0_253] : memref<3x64x64xf32, #tpu.memory_space<vmem>>, vector<1x64x64xf32>
    %293 = vector.shape_cast %292 : vector<1x64x64xf32> to vector<64x64xf32>
    %cst_254 = arith.constant dense<0.000000e+00> : vector<8x64xf32>
    %294 = tpu.matmul %270, %293, %cst_254 {dimension_numbers = #tpu.dot_dimension_numbers<[1], [0], [0], [1], [0, 0, 1, 1], [], []>} : vector<8x64xf32>, vector<64x64xf32>, vector<8x64xf32> -> vector<8x64xf32>
    %c1_255 = arith.constant 1 : index
    %c0_256 = arith.constant 0 : index
    %c0_257 = arith.constant 0 : index
    %295 = vector.load %arg12[%c1_255, %c0_256, %c0_257] : memref<3x64x64xf32, #tpu.memory_space<vmem>>, vector<1x64x64xf32>
    %296 = vector.shape_cast %295 : vector<1x64x64xf32> to vector<64x64xf32>
    %cst_258 = arith.constant dense<0.000000e+00> : vector<8x64xf32>
    %297 = tpu.matmul %279, %296, %cst_258 {dimension_numbers = #tpu.dot_dimension_numbers<[1], [0], [0], [1], [0, 0, 1, 1], [], []>} : vector<8x64xf32>, vector<64x64xf32>, vector<8x64xf32> -> vector<8x64xf32>
    %298 = arith.addf %294, %297 : vector<8x64xf32>
    %299 = arith.addf %291, %298 : vector<8x64xf32>
    %c2_259 = arith.constant 2 : index
    %c0_260 = arith.constant 0 : index
    %c0_261 = arith.constant 0 : index
    %300 = vector.load %arg11[%c2_259, %c0_260, %c0_261] : memref<3x64x64xf32, #tpu.memory_space<vmem>>, vector<1x64x64xf32>
    %301 = vector.shape_cast %300 : vector<1x64x64xf32> to vector<64x64xf32>
    %cst_262 = arith.constant dense<0.000000e+00> : vector<8x64xf32>
    %302 = tpu.matmul %273, %301, %cst_262 {dimension_numbers = #tpu.dot_dimension_numbers<[1], [0], [0], [1], [0, 0, 1, 1], [], []>} : vector<8x64xf32>, vector<64x64xf32>, vector<8x64xf32> -> vector<8x64xf32>
    %c2_263 = arith.constant 2 : index
    %c0_264 = arith.constant 0 : index
    %c0_265 = arith.constant 0 : index
    %303 = vector.load %arg12[%c2_263, %c0_264, %c0_265] : memref<3x64x64xf32, #tpu.memory_space<vmem>>, vector<1x64x64xf32>
    %304 = vector.shape_cast %303 : vector<1x64x64xf32> to vector<64x64xf32>
    %cst_266 = arith.constant dense<0.000000e+00> : vector<8x64xf32>
    %305 = tpu.matmul %282, %304, %cst_266 {dimension_numbers = #tpu.dot_dimension_numbers<[1], [0], [0], [1], [0, 0, 1, 1], [], []>} : vector<8x64xf32>, vector<64x64xf32>, vector<8x64xf32> -> vector<8x64xf32>
    %306 = arith.addf %302, %305 : vector<8x64xf32>
    %307 = arith.addf %299, %306 : vector<8x64xf32>
    %308 = vector.extract_strided_slice %2 {offsets = [5, 0], sizes = [1, 64], strides = [1, 1]} : vector<8x128xf32> to vector<1x64xf32>
    %309 = vector.broadcast %308 : vector<1x64xf32> to vector<8x64xf32>
    %310 = arith.addf %307, %309 : vector<8x64xf32>
    %cst_267 = arith.constant 0.000000e+00 : f32
    %311 = vector.broadcast %cst_267 : f32 to vector<8x64xf32>
    %312 = arith.cmpf oge, %310, %311 : vector<8x64xf32>
    %cst_268 = arith.constant 2.000000e-01 : f32
    %313 = vector.broadcast %cst_268 : f32 to vector<8x64xf32>
    %314 = arith.mulf %313, %310 : vector<8x64xf32>
    %315 = arith.select %312, %310, %314 : vector<8x64xi1>, vector<8x64xf32>
    %c0_269 = arith.constant 0 : index
    %c0_270 = arith.constant 0 : index
    %c0_271 = arith.constant 0 : index
    %316 = vector.load %arg4[%c0_269, %c0_270, %c0_271] : memref<3x4x4xf32, #tpu.memory_space<vmem>>, vector<1x4x4xf32>
    %317 = vector.shape_cast %316 : vector<1x4x4xf32> to vector<4x4xf32>
    %cst_272 = arith.constant dense<0.000000e+00> : vector<4x32xf32>
    %318 = tpu.matmul %317, %213, %cst_272 {dimension_numbers = #tpu.dot_dimension_numbers<[1], [0], [0], [1], [0, 0, 1, 1], [], []>} : vector<4x4xf32>, vector<4x32xf32>, vector<4x32xf32> -> vector<4x32xf32>
    %c1_273 = arith.constant 1 : index
    %c0_274 = arith.constant 0 : index
    %c0_275 = arith.constant 0 : index
    %319 = vector.load %arg4[%c1_273, %c0_274, %c0_275] : memref<3x4x4xf32, #tpu.memory_space<vmem>>, vector<1x4x4xf32>
    %320 = vector.shape_cast %319 : vector<1x4x4xf32> to vector<4x4xf32>
    %cst_276 = arith.constant dense<0.000000e+00> : vector<4x32xf32>
    %321 = tpu.matmul %320, %213, %cst_276 {dimension_numbers = #tpu.dot_dimension_numbers<[1], [0], [0], [1], [0, 0, 1, 1], [], []>} : vector<4x4xf32>, vector<4x32xf32>, vector<4x32xf32> -> vector<4x32xf32>
    %c2_277 = arith.constant 2 : index
    %c0_278 = arith.constant 0 : index
    %c0_279 = arith.constant 0 : index
    %322 = vector.load %arg4[%c2_277, %c0_278, %c0_279] : memref<3x4x4xf32, #tpu.memory_space<vmem>>, vector<1x4x4xf32>
    %323 = vector.shape_cast %322 : vector<1x4x4xf32> to vector<4x4xf32>
    %cst_280 = arith.constant dense<0.000000e+00> : vector<4x32xf32>
    %324 = tpu.matmul %323, %213, %cst_280 {dimension_numbers = #tpu.dot_dimension_numbers<[1], [0], [0], [1], [0, 0, 1, 1], [], []>} : vector<4x4xf32>, vector<4x32xf32>, vector<4x32xf32> -> vector<4x32xf32>
    %c0_281 = arith.constant 0 : index
    %c0_282 = arith.constant 0 : index
    %c0_283 = arith.constant 0 : index
    %325 = vector.load %arg4[%c0_281, %c0_282, %c0_283] : memref<3x4x4xf32, #tpu.memory_space<vmem>>, vector<1x4x4xf32>
    %326 = vector.shape_cast %325 : vector<1x4x4xf32> to vector<4x4xf32>
    %cst_284 = arith.constant dense<0.000000e+00> : vector<4x32xf32>
    %327 = tpu.matmul %326, %219, %cst_284 {dimension_numbers = #tpu.dot_dimension_numbers<[1], [0], [0], [1], [0, 0, 1, 1], [], []>} : vector<4x4xf32>, vector<4x32xf32>, vector<4x32xf32> -> vector<4x32xf32>
    %c1_285 = arith.constant 1 : index
    %c0_286 = arith.constant 0 : index
    %c0_287 = arith.constant 0 : index
    %328 = vector.load %arg4[%c1_285, %c0_286, %c0_287] : memref<3x4x4xf32, #tpu.memory_space<vmem>>, vector<1x4x4xf32>
    %329 = vector.shape_cast %328 : vector<1x4x4xf32> to vector<4x4xf32>
    %cst_288 = arith.constant dense<0.000000e+00> : vector<4x32xf32>
    %330 = tpu.matmul %329, %219, %cst_288 {dimension_numbers = #tpu.dot_dimension_numbers<[1], [0], [0], [1], [0, 0, 1, 1], [], []>} : vector<4x4xf32>, vector<4x32xf32>, vector<4x32xf32> -> vector<4x32xf32>
    %c2_289 = arith.constant 2 : index
    %c0_290 = arith.constant 0 : index
    %c0_291 = arith.constant 0 : index
    %331 = vector.load %arg4[%c2_289, %c0_290, %c0_291] : memref<3x4x4xf32, #tpu.memory_space<vmem>>, vector<1x4x4xf32>
    %332 = vector.shape_cast %331 : vector<1x4x4xf32> to vector<4x4xf32>
    %cst_292 = arith.constant dense<0.000000e+00> : vector<4x32xf32>
    %333 = tpu.matmul %332, %219, %cst_292 {dimension_numbers = #tpu.dot_dimension_numbers<[1], [0], [0], [1], [0, 0, 1, 1], [], []>} : vector<4x4xf32>, vector<4x32xf32>, vector<4x32xf32> -> vector<4x32xf32>
    %c0_293 = arith.constant 0 : index
    %c0_294 = arith.constant 0 : index
    %c0_295 = arith.constant 0 : index
    %334 = vector.load %arg13[%c0_293, %c0_294, %c0_295] : memref<3x32x32xf32, #tpu.memory_space<vmem>>, vector<1x32x32xf32>
    %335 = vector.shape_cast %334 : vector<1x32x32xf32> to vector<32x32xf32>
    %cst_296 = arith.constant dense<0.000000e+00> : vector<4x32xf32>
    %336 = tpu.matmul %318, %335, %cst_296 {dimension_numbers = #tpu.dot_dimension_numbers<[1], [0], [0], [1], [0, 0, 1, 1], [], []>} : vector<4x32xf32>, vector<32x32xf32>, vector<4x32xf32> -> vector<4x32xf32>
    %c0_297 = arith.constant 0 : index
    %c0_298 = arith.constant 0 : index
    %c0_299 = arith.constant 0 : index
    %337 = vector.load %arg14[%c0_297, %c0_298, %c0_299] : memref<3x32x32xf32, #tpu.memory_space<vmem>>, vector<1x32x32xf32>
    %338 = vector.shape_cast %337 : vector<1x32x32xf32> to vector<32x32xf32>
    %cst_300 = arith.constant dense<0.000000e+00> : vector<4x32xf32>
    %339 = tpu.matmul %327, %338, %cst_300 {dimension_numbers = #tpu.dot_dimension_numbers<[1], [0], [0], [1], [0, 0, 1, 1], [], []>} : vector<4x32xf32>, vector<32x32xf32>, vector<4x32xf32> -> vector<4x32xf32>
    %340 = arith.addf %336, %339 : vector<4x32xf32>
    %cst_301 = arith.constant 0.000000e+00 : f32
    %341 = vector.broadcast %cst_301 : f32 to vector<4x32xf32>
    %342 = arith.addf %341, %340 : vector<4x32xf32>
    %c1_302 = arith.constant 1 : index
    %c0_303 = arith.constant 0 : index
    %c0_304 = arith.constant 0 : index
    %343 = vector.load %arg13[%c1_302, %c0_303, %c0_304] : memref<3x32x32xf32, #tpu.memory_space<vmem>>, vector<1x32x32xf32>
    %344 = vector.shape_cast %343 : vector<1x32x32xf32> to vector<32x32xf32>
    %cst_305 = arith.constant dense<0.000000e+00> : vector<4x32xf32>
    %345 = tpu.matmul %321, %344, %cst_305 {dimension_numbers = #tpu.dot_dimension_numbers<[1], [0], [0], [1], [0, 0, 1, 1], [], []>} : vector<4x32xf32>, vector<32x32xf32>, vector<4x32xf32> -> vector<4x32xf32>
    %c1_306 = arith.constant 1 : index
    %c0_307 = arith.constant 0 : index
    %c0_308 = arith.constant 0 : index
    %346 = vector.load %arg14[%c1_306, %c0_307, %c0_308] : memref<3x32x32xf32, #tpu.memory_space<vmem>>, vector<1x32x32xf32>
    %347 = vector.shape_cast %346 : vector<1x32x32xf32> to vector<32x32xf32>
    %cst_309 = arith.constant dense<0.000000e+00> : vector<4x32xf32>
    %348 = tpu.matmul %330, %347, %cst_309 {dimension_numbers = #tpu.dot_dimension_numbers<[1], [0], [0], [1], [0, 0, 1, 1], [], []>} : vector<4x32xf32>, vector<32x32xf32>, vector<4x32xf32> -> vector<4x32xf32>
    %349 = arith.addf %345, %348 : vector<4x32xf32>
    %350 = arith.addf %342, %349 : vector<4x32xf32>
    %c2_310 = arith.constant 2 : index
    %c0_311 = arith.constant 0 : index
    %c0_312 = arith.constant 0 : index
    %351 = vector.load %arg13[%c2_310, %c0_311, %c0_312] : memref<3x32x32xf32, #tpu.memory_space<vmem>>, vector<1x32x32xf32>
    %352 = vector.shape_cast %351 : vector<1x32x32xf32> to vector<32x32xf32>
    %cst_313 = arith.constant dense<0.000000e+00> : vector<4x32xf32>
    %353 = tpu.matmul %324, %352, %cst_313 {dimension_numbers = #tpu.dot_dimension_numbers<[1], [0], [0], [1], [0, 0, 1, 1], [], []>} : vector<4x32xf32>, vector<32x32xf32>, vector<4x32xf32> -> vector<4x32xf32>
    %c2_314 = arith.constant 2 : index
    %c0_315 = arith.constant 0 : index
    %c0_316 = arith.constant 0 : index
    %354 = vector.load %arg14[%c2_314, %c0_315, %c0_316] : memref<3x32x32xf32, #tpu.memory_space<vmem>>, vector<1x32x32xf32>
    %355 = vector.shape_cast %354 : vector<1x32x32xf32> to vector<32x32xf32>
    %cst_317 = arith.constant dense<0.000000e+00> : vector<4x32xf32>
    %356 = tpu.matmul %333, %355, %cst_317 {dimension_numbers = #tpu.dot_dimension_numbers<[1], [0], [0], [1], [0, 0, 1, 1], [], []>} : vector<4x32xf32>, vector<32x32xf32>, vector<4x32xf32> -> vector<4x32xf32>
    %357 = arith.addf %353, %356 : vector<4x32xf32>
    %358 = arith.addf %350, %357 : vector<4x32xf32>
    %359 = vector.extract_strided_slice %2 {offsets = [6, 0], sizes = [1, 32], strides = [1, 1]} : vector<8x128xf32> to vector<1x32xf32>
    %360 = vector.broadcast %359 : vector<1x32xf32> to vector<4x32xf32>
    %361 = arith.addf %358, %360 : vector<4x32xf32>
    %cst_318 = arith.constant 0.000000e+00 : f32
    %362 = vector.broadcast %cst_318 : f32 to vector<4x32xf32>
    %363 = arith.cmpf oge, %361, %362 : vector<4x32xf32>
    %cst_319 = arith.constant 2.000000e-01 : f32
    %364 = vector.broadcast %cst_319 : f32 to vector<4x32xf32>
    %365 = arith.mulf %364, %361 : vector<4x32xf32>
    %366 = arith.select %363, %361, %365 : vector<4x32xi1>, vector<4x32xf32>
    %c1_320 = arith.constant 1 : index
    %c0_321 = arith.constant 0 : index
    %c0_322 = arith.constant 0 : index
    %367 = vector.load %arg2[%c1_320, %c0_321, %c0_322] : memref<5x16x16xf32, #tpu.memory_space<vmem>>, vector<1x16x16xf32>
    %368 = vector.shape_cast %367 : vector<1x16x16xf32> to vector<16x16xf32>
    %cst_323 = arith.constant dense<0.000000e+00> : vector<16x128xf32>
    %369 = tpu.matmul %368, %264, %cst_323 {dimension_numbers = #tpu.dot_dimension_numbers<[1], [0], [0], [1], [0, 0, 1, 1], [], []>} : vector<16x16xf32>, vector<16x128xf32>, vector<16x128xf32> -> vector<16x128xf32>
    %c2_324 = arith.constant 2 : index
    %c0_325 = arith.constant 0 : index
    %c0_326 = arith.constant 0 : index
    %370 = vector.load %arg2[%c2_324, %c0_325, %c0_326] : memref<5x16x16xf32, #tpu.memory_space<vmem>>, vector<1x16x16xf32>
    %371 = vector.shape_cast %370 : vector<1x16x16xf32> to vector<16x16xf32>
    %cst_327 = arith.constant dense<0.000000e+00> : vector<16x128xf32>
    %372 = tpu.matmul %371, %264, %cst_327 {dimension_numbers = #tpu.dot_dimension_numbers<[1], [0], [0], [1], [0, 0, 1, 1], [], []>} : vector<16x16xf32>, vector<16x128xf32>, vector<16x128xf32> -> vector<16x128xf32>
    %c3_328 = arith.constant 3 : index
    %c0_329 = arith.constant 0 : index
    %c0_330 = arith.constant 0 : index
    %373 = vector.load %arg2[%c3_328, %c0_329, %c0_330] : memref<5x16x16xf32, #tpu.memory_space<vmem>>, vector<1x16x16xf32>
    %374 = vector.shape_cast %373 : vector<1x16x16xf32> to vector<16x16xf32>
    %cst_331 = arith.constant dense<0.000000e+00> : vector<16x128xf32>
    %375 = tpu.matmul %374, %264, %cst_331 {dimension_numbers = #tpu.dot_dimension_numbers<[1], [0], [0], [1], [0, 0, 1, 1], [], []>} : vector<16x16xf32>, vector<16x128xf32>, vector<16x128xf32> -> vector<16x128xf32>
    %c0_332 = arith.constant 0 : index
    %c0_333 = arith.constant 0 : index
    %c0_334 = arith.constant 0 : index
    %376 = vector.load %arg22[%c0_332, %c0_333, %c0_334] : memref<3x16x8xf32, #tpu.memory_space<vmem>>, vector<1x16x8xf32>
    %377 = vector.shape_cast %376 : vector<1x16x8xf32> to vector<16x8xf32>
    %cst_335 = arith.constant dense<0.000000e+00> : vector<16x64xf32>
    %378 = tpu.matmul %377, %315, %cst_335 {dimension_numbers = #tpu.dot_dimension_numbers<[1], [0], [0], [1], [0, 0, 1, 1], [], []>} : vector<16x8xf32>, vector<8x64xf32>, vector<16x64xf32> -> vector<16x64xf32>
    %c1_336 = arith.constant 1 : index
    %c0_337 = arith.constant 0 : index
    %c0_338 = arith.constant 0 : index
    %379 = vector.load %arg22[%c1_336, %c0_337, %c0_338] : memref<3x16x8xf32, #tpu.memory_space<vmem>>, vector<1x16x8xf32>
    %380 = vector.shape_cast %379 : vector<1x16x8xf32> to vector<16x8xf32>
    %cst_339 = arith.constant dense<0.000000e+00> : vector<16x64xf32>
    %381 = tpu.matmul %380, %315, %cst_339 {dimension_numbers = #tpu.dot_dimension_numbers<[1], [0], [0], [1], [0, 0, 1, 1], [], []>} : vector<16x8xf32>, vector<8x64xf32>, vector<16x64xf32> -> vector<16x64xf32>
    %c2_340 = arith.constant 2 : index
    %c0_341 = arith.constant 0 : index
    %c0_342 = arith.constant 0 : index
    %382 = vector.load %arg22[%c2_340, %c0_341, %c0_342] : memref<3x16x8xf32, #tpu.memory_space<vmem>>, vector<1x16x8xf32>
    %383 = vector.shape_cast %382 : vector<1x16x8xf32> to vector<16x8xf32>
    %cst_343 = arith.constant dense<0.000000e+00> : vector<16x64xf32>
    %384 = tpu.matmul %383, %315, %cst_343 {dimension_numbers = #tpu.dot_dimension_numbers<[1], [0], [0], [1], [0, 0, 1, 1], [], []>} : vector<16x8xf32>, vector<8x64xf32>, vector<16x64xf32> -> vector<16x64xf32>
    %c0_344 = arith.constant 0 : index
    %c0_345 = arith.constant 0 : index
    %c0_346 = arith.constant 0 : index
    %385 = vector.load %arg23[%c0_344, %c0_345, %c0_346] : memref<3x16x4xf32, #tpu.memory_space<vmem>>, vector<1x16x4xf32>
    %386 = vector.shape_cast %385 : vector<1x16x4xf32> to vector<16x4xf32>
    %cst_347 = arith.constant dense<0.000000e+00> : vector<16x32xf32>
    %387 = tpu.matmul %386, %366, %cst_347 {dimension_numbers = #tpu.dot_dimension_numbers<[1], [0], [0], [1], [0, 0, 1, 1], [], []>} : vector<16x4xf32>, vector<4x32xf32>, vector<16x32xf32> -> vector<16x32xf32>
    %c1_348 = arith.constant 1 : index
    %c0_349 = arith.constant 0 : index
    %c0_350 = arith.constant 0 : index
    %388 = vector.load %arg23[%c1_348, %c0_349, %c0_350] : memref<3x16x4xf32, #tpu.memory_space<vmem>>, vector<1x16x4xf32>
    %389 = vector.shape_cast %388 : vector<1x16x4xf32> to vector<16x4xf32>
    %cst_351 = arith.constant dense<0.000000e+00> : vector<16x32xf32>
    %390 = tpu.matmul %389, %366, %cst_351 {dimension_numbers = #tpu.dot_dimension_numbers<[1], [0], [0], [1], [0, 0, 1, 1], [], []>} : vector<16x4xf32>, vector<4x32xf32>, vector<16x32xf32> -> vector<16x32xf32>
    %c2_352 = arith.constant 2 : index
    %c0_353 = arith.constant 0 : index
    %c0_354 = arith.constant 0 : index
    %391 = vector.load %arg23[%c2_352, %c0_353, %c0_354] : memref<3x16x4xf32, #tpu.memory_space<vmem>>, vector<1x16x4xf32>
    %392 = vector.shape_cast %391 : vector<1x16x4xf32> to vector<16x4xf32>
    %cst_355 = arith.constant dense<0.000000e+00> : vector<16x32xf32>
    %393 = tpu.matmul %392, %366, %cst_355 {dimension_numbers = #tpu.dot_dimension_numbers<[1], [0], [0], [1], [0, 0, 1, 1], [], []>} : vector<16x4xf32>, vector<4x32xf32>, vector<16x32xf32> -> vector<16x32xf32>
    %c0_356 = arith.constant 0 : index
    %c0_357 = arith.constant 0 : index
    %c0_358 = arith.constant 0 : index
    %394 = vector.load %arg15[%c0_356, %c0_357, %c0_358] : memref<3x128x128xf32, #tpu.memory_space<vmem>>, vector<1x128x128xf32>
    %395 = vector.shape_cast %394 : vector<1x128x128xf32> to vector<128x128xf32>
    %cst_359 = arith.constant dense<0.000000e+00> : vector<16x128xf32>
    %396 = tpu.matmul %369, %395, %cst_359 {dimension_numbers = #tpu.dot_dimension_numbers<[1], [0], [0], [1], [0, 0, 1, 1], [], []>} : vector<16x128xf32>, vector<128x128xf32>, vector<16x128xf32> -> vector<16x128xf32>
    %c0_360 = arith.constant 0 : index
    %c0_361 = arith.constant 0 : index
    %c0_362 = arith.constant 0 : index
    %397 = vector.load %arg16[%c0_360, %c0_361, %c0_362] : memref<3x64x128xf32, #tpu.memory_space<vmem>>, vector<1x64x128xf32>
    %398 = vector.shape_cast %397 : vector<1x64x128xf32> to vector<64x128xf32>
    %cst_363 = arith.constant dense<0.000000e+00> : vector<16x128xf32>
    %399 = tpu.matmul %378, %398, %cst_363 {dimension_numbers = #tpu.dot_dimension_numbers<[1], [0], [0], [1], [0, 0, 1, 1], [], []>} : vector<16x64xf32>, vector<64x128xf32>, vector<16x128xf32> -> vector<16x128xf32>
    %400 = arith.addf %396, %399 : vector<16x128xf32>
    %c0_364 = arith.constant 0 : index
    %c0_365 = arith.constant 0 : index
    %c0_366 = arith.constant 0 : index
    %401 = vector.load %arg17[%c0_364, %c0_365, %c0_366] : memref<3x32x128xf32, #tpu.memory_space<vmem>>, vector<1x32x128xf32>
    %402 = vector.shape_cast %401 : vector<1x32x128xf32> to vector<32x128xf32>
    %cst_367 = arith.constant dense<0.000000e+00> : vector<16x128xf32>
    %403 = tpu.matmul %387, %402, %cst_367 {dimension_numbers = #tpu.dot_dimension_numbers<[1], [0], [0], [1], [0, 0, 1, 1], [], []>} : vector<16x32xf32>, vector<32x128xf32>, vector<16x128xf32> -> vector<16x128xf32>
    %404 = arith.addf %400, %403 : vector<16x128xf32>
    %cst_368 = arith.constant 0.000000e+00 : f32
    %405 = vector.broadcast %cst_368 : f32 to vector<16x128xf32>
    %406 = arith.addf %405, %404 : vector<16x128xf32>
    %c1_369 = arith.constant 1 : index
    %c0_370 = arith.constant 0 : index
    %c0_371 = arith.constant 0 : index
    %407 = vector.load %arg15[%c1_369, %c0_370, %c0_371] : memref<3x128x128xf32, #tpu.memory_space<vmem>>, vector<1x128x128xf32>
    %408 = vector.shape_cast %407 : vector<1x128x128xf32> to vector<128x128xf32>
    %cst_372 = arith.constant dense<0.000000e+00> : vector<16x128xf32>
    %409 = tpu.matmul %372, %408, %cst_372 {dimension_numbers = #tpu.dot_dimension_numbers<[1], [0], [0], [1], [0, 0, 1, 1], [], []>} : vector<16x128xf32>, vector<128x128xf32>, vector<16x128xf32> -> vector<16x128xf32>
    %c1_373 = arith.constant 1 : index
    %c0_374 = arith.constant 0 : index
    %c0_375 = arith.constant 0 : index
    %410 = vector.load %arg16[%c1_373, %c0_374, %c0_375] : memref<3x64x128xf32, #tpu.memory_space<vmem>>, vector<1x64x128xf32>
    %411 = vector.shape_cast %410 : vector<1x64x128xf32> to vector<64x128xf32>
    %cst_376 = arith.constant dense<0.000000e+00> : vector<16x128xf32>
    %412 = tpu.matmul %381, %411, %cst_376 {dimension_numbers = #tpu.dot_dimension_numbers<[1], [0], [0], [1], [0, 0, 1, 1], [], []>} : vector<16x64xf32>, vector<64x128xf32>, vector<16x128xf32> -> vector<16x128xf32>
    %413 = arith.addf %409, %412 : vector<16x128xf32>
    %c1_377 = arith.constant 1 : index
    %c0_378 = arith.constant 0 : index
    %c0_379 = arith.constant 0 : index
    %414 = vector.load %arg17[%c1_377, %c0_378, %c0_379] : memref<3x32x128xf32, #tpu.memory_space<vmem>>, vector<1x32x128xf32>
    %415 = vector.shape_cast %414 : vector<1x32x128xf32> to vector<32x128xf32>
    %cst_380 = arith.constant dense<0.000000e+00> : vector<16x128xf32>
    %416 = tpu.matmul %390, %415, %cst_380 {dimension_numbers = #tpu.dot_dimension_numbers<[1], [0], [0], [1], [0, 0, 1, 1], [], []>} : vector<16x32xf32>, vector<32x128xf32>, vector<16x128xf32> -> vector<16x128xf32>
    %417 = arith.addf %413, %416 : vector<16x128xf32>
    %418 = arith.addf %406, %417 : vector<16x128xf32>
    %c2_381 = arith.constant 2 : index
    %c0_382 = arith.constant 0 : index
    %c0_383 = arith.constant 0 : index
    %419 = vector.load %arg15[%c2_381, %c0_382, %c0_383] : memref<3x128x128xf32, #tpu.memory_space<vmem>>, vector<1x128x128xf32>
    %420 = vector.shape_cast %419 : vector<1x128x128xf32> to vector<128x128xf32>
    %cst_384 = arith.constant dense<0.000000e+00> : vector<16x128xf32>
    %421 = tpu.matmul %375, %420, %cst_384 {dimension_numbers = #tpu.dot_dimension_numbers<[1], [0], [0], [1], [0, 0, 1, 1], [], []>} : vector<16x128xf32>, vector<128x128xf32>, vector<16x128xf32> -> vector<16x128xf32>
    %c2_385 = arith.constant 2 : index
    %c0_386 = arith.constant 0 : index
    %c0_387 = arith.constant 0 : index
    %422 = vector.load %arg16[%c2_385, %c0_386, %c0_387] : memref<3x64x128xf32, #tpu.memory_space<vmem>>, vector<1x64x128xf32>
    %423 = vector.shape_cast %422 : vector<1x64x128xf32> to vector<64x128xf32>
    %cst_388 = arith.constant dense<0.000000e+00> : vector<16x128xf32>
    %424 = tpu.matmul %384, %423, %cst_388 {dimension_numbers = #tpu.dot_dimension_numbers<[1], [0], [0], [1], [0, 0, 1, 1], [], []>} : vector<16x64xf32>, vector<64x128xf32>, vector<16x128xf32> -> vector<16x128xf32>
    %425 = arith.addf %421, %424 : vector<16x128xf32>
    %c2_389 = arith.constant 2 : index
    %c0_390 = arith.constant 0 : index
    %c0_391 = arith.constant 0 : index
    %426 = vector.load %arg17[%c2_389, %c0_390, %c0_391] : memref<3x32x128xf32, #tpu.memory_space<vmem>>, vector<1x32x128xf32>
    %427 = vector.shape_cast %426 : vector<1x32x128xf32> to vector<32x128xf32>
    %cst_392 = arith.constant dense<0.000000e+00> : vector<16x128xf32>
    %428 = tpu.matmul %393, %427, %cst_392 {dimension_numbers = #tpu.dot_dimension_numbers<[1], [0], [0], [1], [0, 0, 1, 1], [], []>} : vector<16x32xf32>, vector<32x128xf32>, vector<16x128xf32> -> vector<16x128xf32>
    %429 = arith.addf %425, %428 : vector<16x128xf32>
    %430 = arith.addf %418, %429 : vector<16x128xf32>
    %431 = vector.extract_strided_slice %2 {offsets = [7, 0], sizes = [1, 128], strides = [1, 1]} : vector<8x128xf32> to vector<1x128xf32>
    %432 = vector.broadcast %431 : vector<1x128xf32> to vector<16x128xf32>
    %433 = arith.addf %430, %432 : vector<16x128xf32>
    %cst_393 = arith.constant 0.000000e+00 : f32
    %434 = vector.broadcast %cst_393 : f32 to vector<16x128xf32>
    %435 = arith.cmpf oge, %433, %434 : vector<16x128xf32>
    %cst_394 = arith.constant 2.000000e-01 : f32
    %436 = vector.broadcast %cst_394 : f32 to vector<16x128xf32>
    %437 = arith.mulf %436, %433 : vector<16x128xf32>
    %438 = arith.select %435, %433, %437 : vector<16x128xi1>, vector<16x128xf32>
    %439 = arith.addf %438, %1 : vector<16x128xf32>
    %c0_395 = arith.constant 0 : index
    %c0_396 = arith.constant 0 : index
    %c0_397 = arith.constant 0 : index
    %440 = vector.load %arg27[%c0_395, %c0_396, %c0_397] : memref<1x16x128xf32, #tpu.memory_space<vmem>>, vector<1x16x128xf32>
    %441 = vector.shape_cast %440 : vector<1x16x128xf32> to vector<16x128xf32>
    %442 = vector.shape_cast %439 : vector<16x128xf32> to vector<1x16x128xf32>
    tpu.vector_store %arg27[%c0_395, %c0_396, %c0_397], %442 {strides = array<i32>} : memref<1x16x128xf32, #tpu.memory_space<vmem>>, vector<1x16x128xf32>,
    return
  }
  func.func @transform_0(%arg0: i32) -> (i32, i32, i32) {
    %c0_i32 = arith.constant 0 : i32
    %c0_i32_0 = arith.constant 0 : i32
    %c0_i32_1 = arith.constant 0 : i32
    return %arg0, %c0_i32, %c0_i32_0 : i32, i32, i32
  }
  func.func @transform_1(%arg0: i32) -> (i32, i32, i32) {
    %c0_i32 = arith.constant 0 : i32
    %c0_i32_0 = arith.constant 0 : i32
    %c0_i32_1 = arith.constant 0 : i32
    %c0_i32_2 = arith.constant 0 : i32
    return %c0_i32, %c0_i32_0, %c0_i32_1 : i32, i32, i32
  }
  func.func @transform_2(%arg0: i32) -> (i32, i32, i32) {
    %c0_i32 = arith.constant 0 : i32
    %c0_i32_0 = arith.constant 0 : i32
    %c0_i32_1 = arith.constant 0 : i32
    %c0_i32_2 = arith.constant 0 : i32
    return %c0_i32, %c0_i32_0, %c0_i32_1 : i32, i32, i32
  }
  func.func @transform_3(%arg0: i32) -> (i32, i32, i32) {
    %c0_i32 = arith.constant 0 : i32
    %c0_i32_0 = arith.constant 0 : i32
    %c0_i32_1 = arith.constant 0 : i32
    %c0_i32_2 = arith.constant 0 : i32
    return %c0_i32, %c0_i32_0, %c0_i32_1 : i32, i32, i32
  }
  func.func @transform_4(%arg0: i32) -> (i32, i32, i32) {
    %c0_i32 = arith.constant 0 : i32
    %c0_i32_0 = arith.constant 0 : i32
    %c0_i32_1 = arith.constant 0 : i32
    %c0_i32_2 = arith.constant 0 : i32
    return %c0_i32, %c0_i32_0, %c0_i32_1 : i32, i32, i32
  }
  func.func @transform_5(%arg0: i32) -> (i32, i32, i32) {
    %c0_i32 = arith.constant 0 : i32
    %c0_i32_0 = arith.constant 0 : i32
    %c0_i32_1 = arith.constant 0 : i32
    %c0_i32_2 = arith.constant 0 : i32
    return %c0_i32, %c0_i32_0, %c0_i32_1 : i32, i32, i32
  }
  func.func @transform_6(%arg0: i32) -> (i32, i32, i32) {
    %c0_i32 = arith.constant 0 : i32
    %c0_i32_0 = arith.constant 0 : i32
    %c0_i32_1 = arith.constant 0 : i32
    %c0_i32_2 = arith.constant 0 : i32
    return %c0_i32, %c0_i32_0, %c0_i32_1 : i32, i32, i32
  }
  func.func @transform_7(%arg0: i32) -> (i32, i32, i32) {
    %c0_i32 = arith.constant 0 : i32
    %c0_i32_0 = arith.constant 0 : i32
    %c0_i32_1 = arith.constant 0 : i32
    %c0_i32_2 = arith.constant 0 : i32
    return %c0_i32, %c0_i32_0, %c0_i32_1 : i32, i32, i32
  }
  func.func @transform_8(%arg0: i32) -> (i32, i32, i32) {
    %c0_i32 = arith.constant 0 : i32
    %c0_i32_0 = arith.constant 0 : i32
    %c0_i32_1 = arith.constant 0 : i32
    %c0_i32_2 = arith.constant 0 : i32
    return %c0_i32, %c0_i32_0, %c0_i32_1 : i32, i32, i32
  }
  func.func @transform_9(%arg0: i32) -> (i32, i32, i32) {
    %c0_i32 = arith.constant 0 : i32
    %c0_i32_0 = arith.constant 0 : i32
    %c0_i32_1 = arith.constant 0 : i32
    %c0_i32_2 = arith.constant 0 : i32
    return %c0_i32, %c0_i32_0, %c0_i32_1 : i32, i32, i32
  }
  func.func @transform_10(%arg0: i32) -> (i32, i32, i32) {
    %c0_i32 = arith.constant 0 : i32
    %c0_i32_0 = arith.constant 0 : i32
    %c0_i32_1 = arith.constant 0 : i32
    %c0_i32_2 = arith.constant 0 : i32
    return %c0_i32, %c0_i32_0, %c0_i32_1 : i32, i32, i32
  }
  func.func @transform_11(%arg0: i32) -> (i32, i32, i32) {
    %c0_i32 = arith.constant 0 : i32
    %c0_i32_0 = arith.constant 0 : i32
    %c0_i32_1 = arith.constant 0 : i32
    %c0_i32_2 = arith.constant 0 : i32
    return %c0_i32, %c0_i32_0, %c0_i32_1 : i32, i32, i32
  }
  func.func @transform_12(%arg0: i32) -> (i32, i32, i32) {
    %c0_i32 = arith.constant 0 : i32
    %c0_i32_0 = arith.constant 0 : i32
    %c0_i32_1 = arith.constant 0 : i32
    %c0_i32_2 = arith.constant 0 : i32
    return %c0_i32, %c0_i32_0, %c0_i32_1 : i32, i32, i32
  }
  func.func @transform_13(%arg0: i32) -> (i32, i32, i32) {
    %c0_i32 = arith.constant 0 : i32
    %c0_i32_0 = arith.constant 0 : i32
    %c0_i32_1 = arith.constant 0 : i32
    %c0_i32_2 = arith.constant 0 : i32
    return %c0_i32, %c0_i32_0, %c0_i32_1 : i32, i32, i32
  }
  func.func @transform_14(%arg0: i32) -> (i32, i32, i32) {
    %c0_i32 = arith.constant 0 : i32
    %c0_i32_0 = arith.constant 0 : i32
    %c0_i32_1 = arith.constant 0 : i32
    %c0_i32_2 = arith.constant 0 : i32
    return %c0_i32, %c0_i32_0, %c0_i32_1 : i32, i32, i32
  }
  func.func @transform_15(%arg0: i32) -> (i32, i32, i32) {
    %c0_i32 = arith.constant 0 : i32
    %c0_i32_0 = arith.constant 0 : i32
    %c0_i32_1 = arith.constant 0 : i32
    %c0_i32_2 = arith.constant 0 : i32
    return %c0_i32, %c0_i32_0, %c0_i32_1 : i32, i32, i32
  }
  func.func @transform_16(%arg0: i32) -> (i32, i32, i32) {
    %c0_i32 = arith.constant 0 : i32
    %c0_i32_0 = arith.constant 0 : i32
    %c0_i32_1 = arith.constant 0 : i32
    %c0_i32_2 = arith.constant 0 : i32
    return %c0_i32, %c0_i32_0, %c0_i32_1 : i32, i32, i32
  }
  func.func @transform_17(%arg0: i32) -> (i32, i32, i32) {
    %c0_i32 = arith.constant 0 : i32
    %c0_i32_0 = arith.constant 0 : i32
    %c0_i32_1 = arith.constant 0 : i32
    %c0_i32_2 = arith.constant 0 : i32
    return %c0_i32, %c0_i32_0, %c0_i32_1 : i32, i32, i32
  }
  func.func @transform_18(%arg0: i32) -> (i32, i32, i32) {
    %c0_i32 = arith.constant 0 : i32
    %c0_i32_0 = arith.constant 0 : i32
    %c0_i32_1 = arith.constant 0 : i32
    %c0_i32_2 = arith.constant 0 : i32
    return %c0_i32, %c0_i32_0, %c0_i32_1 : i32, i32, i32
  }
  func.func @transform_19(%arg0: i32) -> (i32, i32, i32) {
    %c0_i32 = arith.constant 0 : i32
    %c0_i32_0 = arith.constant 0 : i32
    %c0_i32_1 = arith.constant 0 : i32
    %c0_i32_2 = arith.constant 0 : i32
    return %c0_i32, %c0_i32_0, %c0_i32_1 : i32, i32, i32
  }
  func.func @transform_20(%arg0: i32) -> (i32, i32, i32) {
    %c0_i32 = arith.constant 0 : i32
    %c0_i32_0 = arith.constant 0 : i32
    %c0_i32_1 = arith.constant 0 : i32
    %c0_i32_2 = arith.constant 0 : i32
    return %c0_i32, %c0_i32_0, %c0_i32_1 : i32, i32, i32
  }
  func.func @transform_21(%arg0: i32) -> (i32, i32, i32) {
    %c0_i32 = arith.constant 0 : i32
    %c0_i32_0 = arith.constant 0 : i32
    %c0_i32_1 = arith.constant 0 : i32
    %c0_i32_2 = arith.constant 0 : i32
    return %c0_i32, %c0_i32_0, %c0_i32_1 : i32, i32, i32
  }
  func.func @transform_22(%arg0: i32) -> (i32, i32, i32) {
    %c0_i32 = arith.constant 0 : i32
    %c0_i32_0 = arith.constant 0 : i32
    %c0_i32_1 = arith.constant 0 : i32
    %c0_i32_2 = arith.constant 0 : i32
    return %c0_i32, %c0_i32_0, %c0_i32_1 : i32, i32, i32
  }
  func.func @transform_23(%arg0: i32) -> (i32, i32) {
    %c0_i32 = arith.constant 0 : i32
    %c0_i32_0 = arith.constant 0 : i32
    %c0_i32_1 = arith.constant 0 : i32
    return %c0_i32, %c0_i32_0 : i32, i32
  }
  func.func @transform_24(%arg0: i32) -> (i32, i32) {
    %c0_i32 = arith.constant 0 : i32
    %c0_i32_0 = arith.constant 0 : i32
    %c0_i32_1 = arith.constant 0 : i32
    return %c0_i32, %c0_i32_0 : i32, i32
  }
  func.func @transform_25(%arg0: i32) -> (i32, i32) {
    %c0_i32 = arith.constant 0 : i32
    %c0_i32_0 = arith.constant 0 : i32
    %c0_i32_1 = arith.constant 0 : i32
    return %c0_i32, %c0_i32_0 : i32, i32
  }
  func.func @transform_26(%arg0: i32) -> (i32, i32, i32) {
    %c0_i32 = arith.constant 0 : i32
    %c0_i32_0 = arith.constant 0 : i32
    %c0_i32_1 = arith.constant 0 : i32
    return %arg0, %c0_i32, %c0_i32_0 : i32, i32, i32
  }
}

</mosaic_0001>

<bundles_post_ra>
// kernel: tile.43
= control target key start
LH: loop header
LB: loop body
LE: loop exit
PB: predicated region body
PF: predicated region fallthrough
CT: control target
= control target key end

     0   :  { %s28_s0 = inlined_call_operand.vmem [shape: f32[8], index: 0, kind: input, shape index: {}]   ;;  %s29_s1 = inlined_call_operand.vmem [shape: f32[16,8], index: 1, kind: output, shape index: {}]  }
   0x1   :  { %v4_v0 = vld [vmem:[%s28_s0] ss:$0 sm:$0xff] }
   0x2   :  { %5 = vst [vmem:[%s29_s1] sm:$0xff] %v4_v0  ;;  %8 = vst [vmem:[%s29_s1 + $0x8] sm:$0xff] %v4_v0 }

// kernel: tile.73
= control target key start
LH: loop header
LB: loop body
LE: loop exit
PB: predicated region body
PF: predicated region fallthrough
CT: control target
= control target key end

     0   :  { %s22_s0 = inlined_call_operand.vmem [shape: f32[8], index: 0, kind: input, shape index: {}]   ;;  %s23_s1 = inlined_call_operand.vmem [shape: f32[4,8], index: 1, kind: output, shape index: {}]  }
   0x1   :  { %v4_v0 = vld [vmem:[%s22_s0] ss:$0 sm:$0xff] }
   0x2   :  { %5 = vst [vmem:[%s23_s1] sm:$0xf] %v4_v0 }

// kernel: tile.74
= control target key start
LH: loop header
LB: loop body
LE: loop exit
PB: predicated region body
PF: predicated region fallthrough
CT: control target
= control target key end

     0   :  { %vm8_vm0 = vcmask 64512   ;;  %s40_s8 = smov 8   ;;  %s41_s9 = smov 16   ;;  %vm14_vm1 = vcmask 261312   ;;  %vm20_vm2 = vcmask 195712   ;;  %vm26_vm3 = vcmask 130112   ;;  %s58_s0 = inlined_call_operand.vmem [shape: f32[4,8], index: 0, kind: input, shape index: {}]   ;;  %s59_s1 = inlined_call_operand.vmem [shape: f32[32], index: 1, kind: output, shape index: {}]  }
   0x1   :  { %v5_v0 = vld [vmem:[%s58_s0] sm:$0xf]  ;;  %s39_s0 = smov 24  }
   0x2   :  { %6 = vst [vmem:[#allocation1] sm:$0xf] %v5_v0 }
   0x9   :  { %v11_v1 = vld [vmem:[#allocation1 + $0x3] sm:$0x1]   ;;  %v23_v2 = vld [vmem:[#allocation1 + $0x1] sm:$0x1]   ;;  %v7_v3 = vld [vmem:[#allocation1] sm:$0x1]  }
   0xa   :  { %12 = vrot.lane.b32.xlu0 %v11_v1, %s39_s0  ;;  %24 = vrot.lane.b32.xlu1 %v23_v2, %s40_s8  ;;  %v17_v4 = vld [vmem:[#allocation1 + $0x2] sm:$0x1]   ;;  %9 = vst.msk [vmem:[#allocation0] sm:$0x1] %vm8_vm0, %v7_v3  }
   0xe   :  { %18 = vrot.lane.b32.xlu0 %v17_v4, %s41_s9 }
  0x7c   :  { %v13_v5 = vpop.permute.xlu0 %12   ;;  %v25_v6 = vpop.permute.xlu1 %24  }
  0x7d   :  { %15 = vst.msk [vmem:[#allocation0] sm:$0x1] %vm14_vm1, %v13_v5  }
  0x80   :  { %v19_v7 = vpop.permute.xlu0 %18  }
  0x81   :  { %21 = vst.msk [vmem:[#allocation0] sm:$0x1] %vm20_vm2, %v19_v7  }
  0x82   :  { %27 = vst.msk [vmem:[#allocation0] sm:$0x1] %vm26_vm3, %v25_v6  }
  0x89   :  { %v32_v8 = vld [vmem:[#allocation0] sm:$0x1] }
  0x8a   :  { %35 = vst [vmem:[%s59_s1] sm:$0x1] %v32_v8 }

// kernel: tile.68
= control target key start
LH: loop header
LB: loop body
LE: loop exit
PB: predicated region body
PF: predicated region fallthrough
CT: control target
= control target key end

     0   :  { %s22_s0 = inlined_call_operand.vmem [shape: f32[8], index: 0, kind: input, shape index: {}]   ;;  %s23_s1 = inlined_call_operand.vmem [shape: f32[8,8], index: 1, kind: output, shape index: {}]  }
   0x1   :  { %v4_v0 = vld [vmem:[%s22_s0] ss:$0 sm:$0xff] }
   0x2   :  { %5 = vst [vmem:[%s23_s1] sm:$0xff] %v4_v0 }

// kernel: tile.69
= control target key start
LH: loop header
LB: loop body
LE: loop exit
PB: predicated region body
PF: predicated region fallthrough
CT: control target
= control target key end

     0   :  { %s69_s10 = smov 56   ;;  %s70_s11 = smov 40   ;;  %vm3_vm0 = vcmask 64512   ;;  %vm9_vm1 = vcmask 523712   ;;  %vm15_vm2 = vcmask 458112   ;;  %vm21_vm3 = vcmask 392512   ;;  %s113_s0 = inlined_call_operand.vmem [shape: f32[8,8], index: 0, kind: input, shape index: {}]   ;;  %s114_s1 = inlined_call_operand.vmem [shape: f32[64], index: 1, kind: output, shape index: {}]  }
   0x1   :  { %v55_v0 = vld [vmem:[%s113_s0 + $0x7] sm:$0x1]   ;;  %v57_v1 = vld [vmem:[%s113_s0 + $0x5] sm:$0x1]   ;;  %v56_v2 = vld [vmem:[%s113_s0 + $0x6] sm:$0x1]  }
   0x2   :  { %7 = vrot.lane.b32.xlu0 %v55_v0, %s69_s10  ;;  %19 = vrot.lane.b32.xlu1 %v57_v1, %s70_s11  ;;  %v58_v3 = vld [vmem:[%s113_s0 + $0x4] sm:$0x1]   ;;  %v2_v4 = vld [vmem:[%s113_s0] sm:$0x1]   ;;  %s71_s18 = smov 48   ;;  %s72_s19 = smov 32  }
   0x3   :  { %4 = vst.msk [vmem:[#allocation0] sm:$0x1] %vm3_vm0, %v2_v4   ;;  %v59_v5 = vld [vmem:[%s113_s0 + $0x3] sm:$0x1]   ;;  %v60_v6 = vld [vmem:[%s113_s0 + $0x2] sm:$0x1]  }
   0x4   :  { %s73_s24 = smov 24   ;;  %s74_s25 = smov 16   ;;  %v61_v7 = vld [vmem:[%s113_s0 + $0x1] sm:$0x1]   ;;  %vm27_vm4 = vcmask 326912   ;;  %vm33_vm5 = vcmask 261312  }
   0x5   :  { %s75_s0 = smov 8   ;;  %vm39_vm6 = vcmask 195712   ;;  %vm45_vm7 = vcmask 130112  }
   0x6   :  { %13 = vrot.lane.b32.xlu0 %v56_v2, %s71_s18  ;;  %25 = vrot.lane.b32.xlu1 %v58_v3, %s72_s19 }
   0xa   :  { %31 = vrot.lane.b32.xlu0 %v59_v5, %s73_s24  ;;  %37 = vrot.lane.b32.xlu1 %v60_v6, %s74_s25 }
   0xe   :  { %43 = vrot.lane.b32.xlu0 %v61_v7, %s75_s0 }
  0x74   :  { %v8_v8 = vpop.permute.xlu0 %7   ;;  %v20_v9 = vpop.permute.xlu1 %19  }
  0x75   :  { %10 = vst.msk [vmem:[#allocation0] sm:$0x1] %vm9_vm1, %v8_v8  }
  0x78   :  { %v14_v10 = vpop.permute.xlu0 %13   ;;  %v26_v11 = vpop.permute.xlu1 %25  }
  0x79   :  { %16 = vst.msk [vmem:[#allocation0] sm:$0x1] %vm15_vm2, %v14_v10  }
  0x7a   :  { %22 = vst.msk [vmem:[#allocation0] sm:$0x1] %vm21_vm3, %v20_v9  }
  0x7b   :  { %28 = vst.msk [vmem:[#allocation0] sm:$0x1] %vm27_vm4, %v26_v11  }
  0x7c   :  { %v32_v12 = vpop.permute.xlu0 %31   ;;  %v38_v13 = vpop.permute.xlu1 %37  }
  0x7d   :  { %34 = vst.msk [vmem:[#allocation0] sm:$0x1] %vm33_vm5, %v32_v12  }
  0x7e   :  { %40 = vst.msk [vmem:[#allocation0] sm:$0x1] %vm39_vm6, %v38_v13  }
  0x80   :  { %v44_v14 = vpop.permute.xlu0 %43  }
  0x81   :  { %46 = vst.msk [vmem:[#allocation0] sm:$0x1] %vm45_vm7, %v44_v14  }
  0x88   :  { %v51_v15 = vld [vmem:[#allocation0] sm:$0x1] }
  0x89   :  { %54 = vst [vmem:[%s114_s1] sm:$0x1] %v51_v15 }

// kernel: multi_view_aggregation.1
= control target key start
LH: loop header
LB: loop body
LE: loop exit
PB: predicated region body
PF: predicated region fallthrough
CT: control target
= control target key end

     0   :  { %s11676_s27 = smov 0   ;;  %s14402_s0 = inlined_call_operand.vmem [shape: f32[2,16,128], index: 0, kind: input, shape index: {}]   ;;  %s14403_s1 = inlined_call_operand.vmem [shape: f32[5,16,16], index: 1, kind: input, shape index: {}]   ;;  %s14404_s2 = inlined_call_operand.vmem [shape: f32[3,8,8], index: 2, kind: input, shape index: {}]   ;;  %s14405_s3 = inlined_call_operand.vmem [shape: f32[3,4,4], index: 3, kind: input, shape index: {}]   ;;  %s14406_s4 = inlined_call_operand.vmem [shape: f32[3,128,128], index: 4, kind: input, shape index: {}]   ;;  %s14407_s5 = inlined_call_operand.vmem [shape: f32[5,128,128], index: 5, kind: input, shape index: {}]   ;;  %s14408_s6 = inlined_call_operand.vmem [shape: f32[3,128,128], index: 6, kind: input, shape index: {}]   ;;  %s14409_s7 = inlined_call_operand.vmem [shape: f32[3,128,128], index: 7, kind: input, shape index: {}]   ;;  %s14410_s8 = inlined_call_operand.vmem [shape: f32[3,128,128], index: 8, kind: input, shape index: {}]   ;;  %s14411_s9 = inlined_call_operand.vmem [shape: f32[3,128,128], index: 9, kind: input, shape index: {}]   ;;  %s14412_s10 = inlined_call_operand.vmem [shape: f32[3,64,64], index: 10, kind: input, shape index: {}]   ;;  %s14413_s11 = inlined_call_operand.vmem [shape: f32[3,64,64], index: 11, kind: input, shape index: {}]   ;;  %s14414_s12 = inlined_call_operand.vmem [shape: f32[3,32,32], index: 12, kind: input, shape index: {}]   ;;  %s14415_s13 = inlined_call_operand.vmem [shape: f32[3,32,32], index: 13, kind: input, shape index: {}]   ;;  %s14416_s14 = inlined_call_operand.vmem [shape: f32[3,128,128], index: 14, kind: input, shape index: {}]   ;;  %s14417_s15 = inlined_call_operand.vmem [shape: f32[3,64,128], index: 15, kind: input, shape index: {}]   ;;  %s14418_s16 = inlined_call_operand.vmem [shape: f32[3,32,128], index: 16, kind: input, shape index: {}]   ;;  %s14419_s17 = inlined_call_operand.vmem [shape: f32[2,8,16], index: 17, kind: input, shape index: {}]   ;;  %s14420_s18 = inlined_call_operand.vmem [shape: f32[2,128,64], index: 18, kind: input, shape index: {}]   ;;  %s14421_s19 = inlined_call_operand.vmem [shape: f32[2,4,8], index: 19, kind: input, shape index: {}]   ;;  %s14422_s20 = inlined_call_operand.vmem [shape: f32[2,64,32], index: 20, kind: input, shape index: {}]   ;;  %s14423_s21 = inlined_call_operand.vmem [shape: f32[3,16,8], index: 21, kind: input, shape index: {}]   ;;  %s14424_s22 = inlined_call_operand.vmem [shape: f32[3,16,4], index: 22, kind: input, shape index: {}]   ;;  %s14425_s23 = inlined_call_operand.vmem [shape: f32[128,8], index: 23, kind: input, shape index: {}]   ;;  %s14426_s24 = inlined_call_operand.vmem [shape: f32[8,128], index: 24, kind: input, shape index: {}]   ;;  %s14427_s25 = inlined_call_operand.vmem [shape: f32[8,128], index: 25, kind: input, shape index: {}]   ;;  %s14428_s26 = inlined_call_operand.vmem [shape: f32[2,16,128], index: 26, kind: output, shape index: {}]  }
   0x1   :  { %14445 = sst [smem:[#allocation2_spill]] %s14402_s0 }
   0x2   :  { %14446 = sst [smem:[#allocation3_spill]] %s14403_s1 }
   0x3   :  { %14447 = sst [smem:[#allocation4_spill]] %s14404_s2 }
   0x4   :  { %14448 = sst [smem:[#allocation5_spill]] %s14405_s3 }
   0x5   :  { %14449 = sst [smem:[#allocation6_spill]] %s14406_s4 }
   0x6   :  { %14450 = sst [smem:[#allocation7_spill]] %s14407_s5 }
   0x7   :  { %14451 = sst [smem:[#allocation8_spill]] %s14408_s6 }
   0x8   :  { %14452 = sst [smem:[#allocation9_spill]] %s14409_s7 }
   0x9   :  { %14453 = sst [smem:[#allocation10_spill]] %s14410_s8 }
   0xa   :  { %14454 = sst [smem:[#allocation11_spill]] %s14411_s9 }
   0xb   :  { %14455 = sst [smem:[#allocation12_spill]] %s14412_s10 }
   0xc   :  { %14456 = sst [smem:[#allocation13_spill]] %s14419_s17 }
   0xd   :  { %14457 = sst [smem:[#allocation14_spill]] %s14420_s18 }
   0xe LB: > { %s8603_s3 = sadd.s32 4294967295, %s11537_s27   ;;  %p8607_p0 = scmp.ge.s32.totalorder %s11537_s27, 1  ;;  %s11537_s27 = sphi %s11676_s27, %s36_s27  }
   0xf   : > { %p712_p1 = scmp.lt.s32.totalorder %s11537_s27, 3 }
  0x11   : > { %p713_p2 = pnand %p8607_p0, %p712_p1 }
  0x12   : > { %p782_p3 = scmp.lt.s32.totalorder (!%p713_p2), %s8603_s3, 1  ;;  %s14458_s8 = sld [smem:[#allocation3_spill]] (!%p713_p2) }
  0x13   : > { %716 = sbr.rel (%p713_p2) target bundleno = 3835 (0xefb), region = 124  ;;  %s14459_s2 = sld [smem:[#allocation2_spill]] (!%p713_p2) }
  0x14   : > { %s14460_s30 = sld [smem:[#allocation6_spill]] (!%p713_p2) }
  0x15   : > { %s14462_s28 = sld [smem:[#allocation8_spill]] (!%p713_p2) }
  0x16   : > { %s14464_s17 = sld [smem:[#allocation13_spill]] (!%p713_p2) }
  0x17   : > { %s14465_s18 = sld [smem:[#allocation14_spill]] (!%p713_p2) }
  0x18   : > { %v812_v0 = vld [vmem:[%s14458_s8] sm:$0xff]  ;;  %vm814_vm0 = vcmask 130048   ;;  %s14473_s3 = smov (!%p782_p3, %s8603_s3), 1  ;;  %v11693_v1 = vld [vmem:[%s14458_s8 + $0x30] sm:$0xff]  ;;  %v813_v4 = vld [vmem:[%s14458_s8 + $0x8] sm:$0xff]  ;;  %vm11540_vm5 = vmmov 0  }
  0x19   : > { %9899 = vmatprep.mubr.msk.f32.mxu0 %vm814_vm0, %v812_v0  ;;  %9920 = vmatprep.mubr.msk.f32.mxu1 %vm814_vm0, %v11693_v1  ;;  %s14439_s0 = sshll.u32 %s14473_s3, 4  ;;  %v11713_v5 = vld [vmem:[%s14458_s8 + $0x10] sm:$0xff]  ;;  %v11718_v6 = vld [vmem:[%s14458_s8 + $0x38] sm:$0xff]  ;;  %v11734_v9 = vld [vmem:[%s14458_s8 + $0x20] sm:$0xff]  ;;  %vm3109_vm8 = vcmask 64512   ;;  %vm3821_vm11 = vcmask 523264  }
  0x1a   : > { %s11703_s5 = scalar_lea.vmem %s14459_s2, %s14439_s0  ;;  %v8645_v7 = vld [vmem:[%s14460_s30 + $0xf8] sm:$0xff]  ;;  %v8644_v10 = vld [vmem:[%s14460_s30 + $0xf0] sm:$0xff]  ;;  %v11748_v11 = vld [vmem:[%s14458_s8 + $0x28] sm:$0xff]  ;;  %s14461_s2 = sld [smem:[#allocation7_spill]]  ;;  %vm6074_vm12 = vcmask 1043456   ;;  %vm6070_vm13 = vcmask 31744  }
  0x1b   : > { %v793_v2 = vld [vmem:[%s11703_s5 + $0x8] sm:$0xff]  ;;  %v792_v3 = vld [vmem:[%s11703_s5] sm:$0xff]  ;;  %v11729_v8 = vld [vmem:[%s14458_s8 + $0x18] sm:$0xff]  ;;  %s14463_s0 = sld [smem:[#allocation9_spill]]  ;;  %vm6519_vm14 = vcmask 261120  }
  0x1c   : > { %9895 = vmatprep.subr.mxu0 %v793_v2  ;;  %9916 = vmatprep.subr.mxu1 %v793_v2  ;;  %v8626_v12 = vld [vmem:[%s14458_s8 + $0x40] sm:$0xff]  ;;  %v8643_v13 = vld [vmem:[%s14460_s30 + $0xe8] sm:$0xff]  ;;  %v1247_v15 = vld [vmem:[%s14460_s30 + $0x78] sm:$0xff]  ;;  %s14466_s4 = sld [smem:[#allocation11_spill]] }
  0x1d   : > { %9896 = vmatpush3.msra.mxu0 %v793_v2  ;;  %9917 = vmatpush3.msra.mxu1 %v793_v2  ;;  %v8627_v14 = vld [vmem:[%s14458_s8 + $0x48] sm:$0xff]  ;;  %v1246_v16 = vld [vmem:[%s14460_s30 + $0x70] sm:$0xff]  ;;  %v8642_v17 = vld [vmem:[%s14460_s30 + $0xe0] sm:$0xff]  ;;  %s14467_s10 = sld [smem:[#allocation10_spill]] }
  0x1e   : > { %9897 = vmatprep.subr.mxu0 %v792_v3  ;;  %9918 = vmatprep.subr.mxu1 %v792_v3  ;;  %v1245_v18 = vld [vmem:[%s14460_s30 + $0x68] sm:$0xff]  ;;  %v8641_v19 = vld [vmem:[%s14460_s30 + $0xd8] sm:$0xff]  ;;  %v1244_v20 = vld [vmem:[%s14460_s30 + $0x60] sm:$0xff]  ;;  %s14469_s9 = sld [smem:[#allocation12_spill]] }
  0x1f   : > { %9898 = vmatpush3.msra.mxu0 %v792_v3  ;;  %9919 = vmatpush3.msra.mxu1 %v792_v3  ;;  %v8640_v21 = vld [vmem:[%s14460_s30 + $0xd0] sm:$0xff]  ;;  %v1243_v22 = vld [vmem:[%s14460_s30 + $0x58] sm:$0xff]  ;;  %v8639_v23 = vld [vmem:[%s14460_s30 + $0xc8] sm:$0xff]  ;;  %s14470_s7 = sld [smem:[#allocation5_spill]] }
  0x20   : > { %9900 = vmatmul.mubr.msk.f32.vlgmr.msra.gmra.mxu0 %vm814_vm0, %v813_v4  ;;  %9902 = vmatprep.subr.mxu0 %v793_v2  ;;  %v1242_v24 = vld [vmem:[%s14460_s30 + $0x50] sm:$0xff]  ;;  %v8638_v25 = vld [vmem:[%s14460_s30 + $0xc0] sm:$0xff]  ;;  %v1241_v26 = vld [vmem:[%s14460_s30 + $0x48] sm:$0xff] }
  0x21   : > { %9903 = vmatpush3.msra.mxu0 %v793_v2  ;;  %9906 = vmatprep.mubr.msk.f32.mxu0 %vm814_vm0, %v11713_v5  ;;  %v8637_v27 = vld [vmem:[%s14460_s30 + $0xb8] sm:$0xff]  ;;  %v1240_v28 = vld [vmem:[%s14460_s30 + $0x40] sm:$0xff]  ;;  %v8636_v29 = vld [vmem:[%s14460_s30 + $0xb0] sm:$0xff] }
  0x22   : > { %9904 = vmatprep.subr.mxu0 %v792_v3  ;;  %9921 = vmatmul.mubr.msk.f32.vlgmr.msra.gmra.mxu1 %vm814_vm0, %v11718_v6  ;;  %v1239_v30 = vld [vmem:[%s14460_s30 + $0x38] sm:$0xff]  ;;  %v8635_v31 = vld [vmem:[%s14460_s30 + $0xa8] sm:$0xff]  ;;  %v1238_v32 = vld [vmem:[%s14460_s30 + $0x30] sm:$0xff] }
  0x23   : > { %9905 = vmatpush3.msra.mxu0 %v792_v3  ;;  %9930 = vmatprep.subr.mxu1 %v8645_v7  ;;  %v1237_v33 = vld [vmem:[%s14460_s30 + $0x28] sm:$0xff]  ;;  %v1236_v34 = vld [vmem:[%s14460_s30 + $0x20] sm:$0xff]  ;;  %v1235_v35 = vld [vmem:[%s14460_s30 + $0x18] sm:$0xff] }
  0x24   : > { %9907 = vmatmul.mubr.msk.f32.vlgmr.msra.gmra.mxu0 %vm814_vm0, %v11729_v8  ;;  %9909 = vmatprep.subr.mxu0 %v793_v2  ;;  %v8634_v36 = vld [vmem:[%s14460_s30 + $0xa0] sm:$0xff]  ;;  %v1234_v37 = vld [vmem:[%s14460_s30 + $0x10] sm:$0xff]  ;;  %v8633_v38 = vld [vmem:[%s14460_s30 + $0x98] sm:$0xff] }
  0x25   : > { %9910 = vmatpush3.msra.mxu0 %v793_v2  ;;  %9913 = vmatprep.mubr.msk.f32.mxu0 %vm814_vm0, %v11734_v9  ;;  %v1233_v39 = vld [vmem:[%s14460_s30 + $0x8] sm:$0xff]  ;;  %v8632_v40 = vld [vmem:[%s14460_s30 + $0x90] sm:$0xff]  ;;  %v1232_v41 = vld [vmem:[%s14460_s30] sm:$0xff] }
  0x26   : > { %9911 = vmatprep.subr.mxu0 %v792_v3  ;;  %9931 = vmatpush3.msra.mxu1 %v8645_v7  ;;  %v8631_v42 = vld [vmem:[%s14460_s30 + $0x88] sm:$0xff]  ;;  %v8677_v43 = vld [vmem:[%s14461_s2 + $0xf8] sm:$0xff]  ;;  %v8630_v44 = vld [vmem:[%s14460_s30 + $0x80] sm:$0xff] }
  0x27   : > { %9912 = vmatpush3.msra.mxu0 %v792_v3  ;;  %9932 = vmatprep.subr.mxu1 %v8644_v10  ;;  %v8661_v45 = vld [vmem:[%s14460_s30 + $0x178] sm:$0xff]  ;;  %v8676_v50 = vld [vmem:[%s14461_s2 + $0xf0] sm:$0xff]  ;;  %v8675_v52 = vld [vmem:[%s14461_s2 + $0xe8] sm:$0xff] }
  0x28   : > { %9914 = vmatmul.mubr.msk.f32.vlgmr.msra.gmra.mxu0 %vm814_vm0, %v11748_v11  ;;  %9923 = vmatprep.subr.mxu0 %v793_v2  ;;  %v8660_v54 = vld [vmem:[%s14460_s30 + $0x170] sm:$0xff]  ;;  %v8674_v55 = vld [vmem:[%s14461_s2 + $0xe0] sm:$0xff]  ;;  %v8659_v56 = vld [vmem:[%s14460_s30 + $0x168] sm:$0xff] }
  0x29   : > { %9924 = vmatpush3.msra.mxu0 %v793_v2  ;;  %9927 = vmatprep.mubr.msk.f32.mxu0 %vm814_vm0, %v8626_v12  ;;  %v8673_v57 = vld [vmem:[%s14461_s2 + $0xd8] sm:$0xff]  ;;  %v8658_v58 = vld [vmem:[%s14460_s30 + $0x160] sm:$0xff]  ;;  %v8672_v59 = vld [vmem:[%s14461_s2 + $0xd0] sm:$0xff] }
  0x2a   : > { %9925 = vmatprep.subr.mxu0 %v792_v3  ;;  %9933 = vmatpush3.msra.mxu1 %v8644_v10  ;;  %v8657_v60 = vld [vmem:[%s14460_s30 + $0x158] sm:$0xff]  ;;  %v8671_v61 = vld [vmem:[%s14461_s2 + $0xc8] sm:$0xff]  ;;  %v8656_v62 = vld [vmem:[%s14460_s30 + $0x150] sm:$0xff] }
  0x2b   : > { %9926 = vmatpush3.msra.mxu0 %v792_v3  ;;  %9934 = vmatprep.subr.mxu1 %v8643_v13  ;;  %v8670_v63 = vld [vmem:[%s14461_s2 + $0xc0] sm:$0xff]  ;;  %v8655_v0 = vld [vmem:[%s14460_s30 + $0x148] sm:$0xff]  ;;  %v8669_v2 = vld [vmem:[%s14461_s2 + $0xb8] sm:$0xff] }
  0x2c   : > { %9928 = vmatmul.mubr.msk.f32.vlgmr.msra.gmra.mxu0 %vm814_vm0, %v8627_v14  ;;  %9965 = vmatprep.subr.mxu0 %v1247_v15  ;;  %v8654_v3 = vld [vmem:[%s14460_s30 + $0x140] sm:$0xff]  ;;  %v8668_v4 = vld [vmem:[%s14461_s2 + $0xb0] sm:$0xff]  ;;  %v8653_v7 = vld [vmem:[%s14460_s30 + $0x138] sm:$0xff] }
  0x2d   : > { %9966 = vmatpush3.msra.mxu0 %v1247_v15  ;;  %9935 = vmatpush3.msra.mxu1 %v8643_v13  ;;  %v8667_v10 = vld [vmem:[%s14461_s2 + $0xa8] sm:$0xff]  ;;  %v8652_v12 = vld [vmem:[%s14460_s30 + $0x130] sm:$0xff]  ;;  %v8666_v13 = vld [vmem:[%s14461_s2 + $0xa0] sm:$0xff] }
  0x2e   : > { %9967 = vmatprep.subr.mxu0 %v1246_v16  ;;  %9936 = vmatprep.subr.mxu1 %v8642_v17  ;;  %v8651_v14 = vld [vmem:[%s14460_s30 + $0x128] sm:$0xff]  ;;  %v8665_v15 = vld [vmem:[%s14461_s2 + $0x98] sm:$0xff] }
  0x2f   : > { %9968 = vmatpush3.msra.mxu0 %v1246_v16  ;;  %9937 = vmatpush3.msra.mxu1 %v8642_v17  ;;  %v8650_v16 = vld [vmem:[%s14460_s30 + $0x120] sm:$0xff]  ;;  %v8664_v17 = vld [vmem:[%s14461_s2 + $0x90] sm:$0xff] }
  0x30   : > { %9969 = vmatprep.subr.mxu0 %v1245_v18  ;;  %9938 = vmatprep.subr.mxu1 %v8641_v19 }
  0x31   : > { %9970 = vmatpush3.msra.mxu0 %v1245_v18  ;;  %9939 = vmatpush3.msra.mxu1 %v8641_v19  ;;  %v8649_v18 = vld [vmem:[%s14460_s30 + $0x118] sm:$0xff]  ;;  %v8663_v19 = vld [vmem:[%s14461_s2 + $0x88] sm:$0xff] }
  0x32   : > { %9971 = vmatprep.subr.mxu0 %v1244_v20  ;;  %9940 = vmatprep.subr.mxu1 %v8640_v21 }
  0x33   : > { %9972 = vmatpush3.msra.mxu0 %v1244_v20  ;;  %9941 = vmatpush3.msra.mxu1 %v8640_v21  ;;  %v8648_v21 = vld [vmem:[%s14460_s30 + $0x110] sm:$0xff] }
  0x34   : > { %9973 = vmatprep.subr.mxu0 %v1243_v22  ;;  %9942 = vmatprep.subr.mxu1 %v8639_v23 }
  0x35   : > { %9974 = vmatpush3.msra.mxu0 %v1243_v22  ;;  %9943 = vmatpush3.msra.mxu1 %v8639_v23  ;;  %v8662_v22 = vld [vmem:[%s14461_s2 + $0x80] sm:$0xff]  ;;  %v8647_v23 = vld [vmem:[%s14460_s30 + $0x108] sm:$0xff] }
  0x36   : > { %9975 = vmatprep.subr.mxu0 %v1242_v24  ;;  %9944 = vmatprep.subr.mxu1 %v8638_v25 }
  0x37   : > { %9976 = vmatpush3.msra.mxu0 %v1242_v24  ;;  %9945 = vmatpush3.msra.mxu1 %v8638_v25  ;;  %v8693_v24 = vld [vmem:[%s14461_s2 + $0x178] sm:$0xff] }
  0x38   : > { %9977 = vmatprep.subr.mxu0 %v1241_v26  ;;  %9946 = vmatprep.subr.mxu1 %v8637_v27 }
  0x39   : > { %9978 = vmatpush3.msra.mxu0 %v1241_v26  ;;  %9947 = vmatpush3.msra.mxu1 %v8637_v27  ;;  %v8646_v26 = vld [vmem:[%s14460_s30 + $0x100] sm:$0xff]  ;;  %v8692_v27 = vld [vmem:[%s14461_s2 + $0x170] sm:$0xff] }
  0x3a   : > { %9979 = vmatprep.subr.mxu0 %v1240_v28  ;;  %9948 = vmatprep.subr.mxu1 %v8636_v29 }
  0x3b   : > { %9980 = vmatpush3.msra.mxu0 %v1240_v28  ;;  %9949 = vmatpush3.msra.mxu1 %v8636_v29  ;;  %v1536_v28 = vld [vmem:[%s14461_s2 + $0x78] sm:$0xff]  ;;  %v8691_v29 = vld [vmem:[%s14461_s2 + $0x168] sm:$0xff] }
  0x3c   : > { %9981 = vmatprep.subr.mxu0 %v1239_v30  ;;  %9950 = vmatprep.subr.mxu1 %v8635_v31 }
  0x3d   : > { %9982 = vmatpush3.msra.mxu0 %v1239_v30  ;;  %9951 = vmatpush3.msra.mxu1 %v8635_v31  ;;  %v1535_v30 = vld [vmem:[%s14461_s2 + $0x70] sm:$0xff]  ;;  %v8690_v31 = vld [vmem:[%s14461_s2 + $0x160] sm:$0xff] }
  0x3e   : > { %9983 = vmatprep.subr.mxu0 %v1238_v32  ;;  %9952 = vmatprep.subr.mxu1 %v8634_v36 }
  0x3f   : > { %9984 = vmatpush3.msra.mxu0 %v1238_v32  ;;  %9953 = vmatpush3.msra.mxu1 %v8634_v36  ;;  %v1534_v32 = vld [vmem:[%s14461_s2 + $0x68] sm:$0xff]  ;;  %v1532_v36 = vld [vmem:[%s14461_s2 + $0x58] sm:$0xff] }
  0x40   : > { %9985 = vmatprep.subr.mxu0 %v1237_v33  ;;  %9954 = vmatprep.subr.mxu1 %v8633_v38 }
  0x41   : > { %9986 = vmatpush3.msra.mxu0 %v1237_v33  ;;  %9955 = vmatpush3.msra.mxu1 %v8633_v38  ;;  %v8689_v33 = vld [vmem:[%s14461_s2 + $0x158] sm:$0xff]  ;;  %v1531_v38 = vld [vmem:[%s14461_s2 + $0x50] sm:$0xff] }
  0x42   : > { %9987 = vmatprep.subr.mxu0 %v1236_v34  ;;  %9956 = vmatprep.subr.mxu1 %v8632_v40 }
  0x43   : > { %9988 = vmatpush3.msra.mxu0 %v1236_v34  ;;  %9957 = vmatpush3.msra.mxu1 %v8632_v40  ;;  %v1533_v34 = vld [vmem:[%s14461_s2 + $0x60] sm:$0xff]  ;;  %v1530_v40 = vld [vmem:[%s14461_s2 + $0x48] sm:$0xff] }
  0x44   : > { %9989 = vmatprep.subr.mxu0 %v1235_v35  ;;  %9958 = vmatprep.subr.mxu1 %v8631_v42 }
  0x45   : > { %9990 = vmatpush3.msra.mxu0 %v1235_v35  ;;  %9959 = vmatpush3.msra.mxu1 %v8631_v42  ;;  %v8688_v35 = vld [vmem:[%s14461_s2 + $0x150] sm:$0xff]  ;;  %v1529_v42 = vld [vmem:[%s14461_s2 + $0x40] sm:$0xff] }
  0x46   : > { %9991 = vmatprep.subr.mxu0 %v1234_v37  ;;  %9960 = vmatprep.subr.mxu1 %v8630_v44 }
  0x47   : > { %9992 = vmatpush3.msra.mxu0 %v1234_v37  ;;  %9961 = vmatpush3.msra.mxu1 %v8630_v44  ;;  %v8687_v37 = vld [vmem:[%s14461_s2 + $0x148] sm:$0xff]  ;;  %v1528_v44 = vld [vmem:[%s14461_s2 + $0x38] sm:$0xff] }
  0x48   : > { %9993 = vmatprep.subr.mxu0 %v1233_v39  ;;  %10000 = vmatprep.subr.mxu1 %v8661_v45 }
  0x49   : > { %9994 = vmatpush3.msra.mxu0 %v1233_v39  ;;  %v8686_v39 = vld [vmem:[%s14461_s2 + $0x140] sm:$0xff] }
  0x4a   : > { %9995 = vmatprep.subr.mxu0 %v1232_v41 }
  0x4b   : > { %9996 = vmatpush3.msra.mxu0 %v1232_v41  ;;  %v8685_v41 = vld [vmem:[%s14461_s2 + $0x138] sm:$0xff] }
  0x4c   : > { %10035 = vmatprep.subr.mxu0 %v8677_v43 }
  0xe0   : > { %v11856_v46 = vpop.f32.mrf.mxu0 }
  0xe2   : > { %v11858_v47 = vpop.f32.mrf.mxu0  ;;  %v11947_v20 = vpop.f32.mrf.mxu1 }
  0xe4   : > { %v11860_v48 = vpop.f32.mrf.mxu0  ;;  %v11961_v25 = vpop.f32.mrf.mxu1 }
  0xe6   : > { %v971_v49 = vpop.f32.mrf.mxu0 }
  0xe7   : > { %9997 = vmatprep.mubr.f32.mxu0 %v971_v49 }
  0xe8   : > { %v11865_v51 = vpop.f32.mrf.mxu0  ;;  %9998 = vmatmul.mubr.f32.vlgmr.msra.gmra.mxu0 %v11860_v48 }
  0xe9   : > { %10036 = vmatpush3.msra.mxu0 %v8677_v43  ;;  %10067 = vmatprep.mubr.f32.mxu0 %v971_v49  ;;  %v8684_v43 = vld [vmem:[%s14461_s2 + $0x130] sm:$0xff]  ;;  %v1526_v49 = vld [vmem:[%s14461_s2 + $0x28] sm:$0xff] }
  0xea   : > { %10037 = vmatprep.subr.mxu0 %v8676_v50  ;;  %v11871_v53 = vpop.f32.mrf.mxu0 }
  0xeb   : > { %10038 = vmatpush3.msra.mxu0 %v8676_v50  ;;  %9962 = vmatprep.mubr.f32.mxu1 %v11871_v53  ;;  %v8681_v50 = vld [vmem:[%s14461_s2 + $0x118] sm:$0xff] }
  0xec   : > { %10039 = vmatprep.subr.mxu0 %v8675_v52  ;;  %9963 = vmatmul.mubr.f32.vlgmr.msra.gmra.mxu1 %v11865_v51 }
  0xed   : > { %10001 = vmatpush3.msra.mxu1 %v8661_v45  ;;  %10040 = vmatpush3.msra.mxu0 %v8675_v52  ;;  %v8683_v45 = vld [vmem:[%s14461_s2 + $0x128] sm:$0xff]  ;;  %v1525_v52 = vld [vmem:[%s14461_s2 + $0x20] sm:$0xff] }
  0xee   : > { %10002 = vmatprep.subr.mxu1 %v8660_v54  ;;  %10041 = vmatprep.subr.mxu0 %v8674_v55 }
  0xef   : > { %10003 = vmatpush3.msra.mxu1 %v8660_v54  ;;  %10042 = vmatpush3.msra.mxu0 %v8674_v55  ;;  %v1524_v54 = vld [vmem:[%s14461_s2 + $0x18] sm:$0xff]  ;;  %v8679_v55 = vld [vmem:[%s14461_s2 + $0x108] sm:$0xff] }
  0xf0   : > { %10004 = vmatprep.subr.mxu1 %v8659_v56  ;;  %10043 = vmatprep.subr.mxu0 %v8673_v57 }
  0xf1   : > { %10005 = vmatpush3.msra.mxu1 %v8659_v56  ;;  %10044 = vmatpush3.msra.mxu0 %v8673_v57  ;;  %v1523_v56 = vld [vmem:[%s14461_s2 + $0x10] sm:$0xff]  ;;  %v8678_v57 = vld [vmem:[%s14461_s2 + $0x100] sm:$0xff] }
  0xf2   : > { %10006 = vmatprep.subr.mxu1 %v8658_v58  ;;  %10045 = vmatprep.subr.mxu0 %v8672_v59 }
  0xf3   : > { %10007 = vmatpush3.msra.mxu1 %v8658_v58  ;;  %10046 = vmatpush3.msra.mxu0 %v8672_v59  ;;  %v1522_v58 = vld [vmem:[%s14461_s2 + $0x8] sm:$0xff]  ;;  %v1521_v59 = vld [vmem:[%s14461_s2] sm:$0xff] }
  0xf4   : > { %10008 = vmatprep.subr.mxu1 %v8657_v60  ;;  %10047 = vmatprep.subr.mxu0 %v8671_v61 }
  0xf5   : > { %10009 = vmatpush3.msra.mxu1 %v8657_v60  ;;  %10048 = vmatpush3.msra.mxu0 %v8671_v61  ;;  %v8725_v60 = vld [vmem:[%s14461_s2 + $0x278] sm:$0xff] }
  0xf6   : > { %10010 = vmatprep.subr.mxu1 %v8656_v62  ;;  %10049 = vmatprep.subr.mxu0 %v8670_v63  ;;  %v8709_v61 = vld [vmem:[%s14461_s2 + $0x1f8] sm:$0xff] }
  0xf7   : > { %10011 = vmatpush3.msra.mxu1 %v8656_v62  ;;  %10050 = vmatpush3.msra.mxu0 %v8670_v63  ;;  %v8708_v62 = vld [vmem:[%s14461_s2 + $0x1f0] sm:$0xff] }
  0xf8   : > { %10012 = vmatprep.subr.mxu1 %v8655_v0  ;;  %10051 = vmatprep.subr.mxu0 %v8669_v2  ;;  %v8724_v63 = vld [vmem:[%s14461_s2 + $0x270] sm:$0xff] }
  0xf9   : > { %10013 = vmatpush3.msra.mxu1 %v8655_v0  ;;  %10052 = vmatpush3.msra.mxu0 %v8669_v2  ;;  %v8723_v0 = vld [vmem:[%s14461_s2 + $0x268] sm:$0xff]  ;;  %v8722_v2 = vld [vmem:[%s14461_s2 + $0x260] sm:$0xff] }
  0xfa   : > { %10014 = vmatprep.subr.mxu1 %v8654_v3  ;;  %10053 = vmatprep.subr.mxu0 %v8668_v4 }
  0xfb   : > { %10015 = vmatpush3.msra.mxu1 %v8654_v3  ;;  %10054 = vmatpush3.msra.mxu0 %v8668_v4  ;;  %v8705_v3 = vld [vmem:[%s14461_s2 + $0x1d8] sm:$0xff] }
  0xfc   : > { %10016 = vmatprep.subr.mxu1 %v8653_v7  ;;  %10055 = vmatprep.subr.mxu0 %v8667_v10  ;;  %v8721_v4 = vld [vmem:[%s14461_s2 + $0x258] sm:$0xff] }
  0xfd   : > { %10017 = vmatpush3.msra.mxu1 %v8653_v7  ;;  %10056 = vmatpush3.msra.mxu0 %v8667_v10  ;;  %v8704_v7 = vld [vmem:[%s14461_s2 + $0x1d0] sm:$0xff] }
  0xfe   : > { %10018 = vmatprep.subr.mxu1 %v8652_v12  ;;  %10057 = vmatprep.subr.mxu0 %v8666_v13  ;;  %v8720_v10 = vld [vmem:[%s14461_s2 + $0x250] sm:$0xff] }
  0xff   : > { %10019 = vmatpush3.msra.mxu1 %v8652_v12  ;;  %10058 = vmatpush3.msra.mxu0 %v8666_v13  ;;  %v8703_v12 = vld [vmem:[%s14461_s2 + $0x1c8] sm:$0xff] }
 0x100   : > { %10020 = vmatprep.subr.mxu1 %v8651_v14  ;;  %10059 = vmatprep.subr.mxu0 %v8665_v15  ;;  %v8719_v13 = vld [vmem:[%s14461_s2 + $0x248] sm:$0xff] }
 0x101   : > { %10021 = vmatpush3.msra.mxu1 %v8651_v14  ;;  %10060 = vmatpush3.msra.mxu0 %v8665_v15  ;;  %v8702_v14 = vld [vmem:[%s14461_s2 + $0x1c0] sm:$0xff] }
 0x102   : > { %10022 = vmatprep.subr.mxu1 %v8650_v16  ;;  %10061 = vmatprep.subr.mxu0 %v8664_v17  ;;  %v8718_v15 = vld [vmem:[%s14461_s2 + $0x240] sm:$0xff] }
 0x103   : > { %10023 = vmatpush3.msra.mxu1 %v8650_v16  ;;  %10062 = vmatpush3.msra.mxu0 %v8664_v17  ;;  %v8701_v16 = vld [vmem:[%s14461_s2 + $0x1b8] sm:$0xff] }
 0x104   : > { %10024 = vmatprep.subr.mxu1 %v8649_v18  ;;  %10063 = vmatprep.subr.mxu0 %v8663_v19  ;;  %v8717_v17 = vld [vmem:[%s14461_s2 + $0x238] sm:$0xff] }
 0x105   : > { %10025 = vmatpush3.msra.mxu1 %v8649_v18  ;;  %10064 = vmatpush3.msra.mxu0 %v8663_v19  ;;  %v8700_v18 = vld [vmem:[%s14461_s2 + $0x1b0] sm:$0xff] }
 0x106   : > { %10026 = vmatprep.subr.mxu1 %v8648_v21  ;;  %10065 = vmatprep.subr.mxu0 %v8662_v22  ;;  %v8716_v19 = vld [vmem:[%s14461_s2 + $0x230] sm:$0xff] }
 0x107   : > { %10027 = vmatpush3.msra.mxu1 %v8648_v21  ;;  %10066 = vmatpush3.msra.mxu0 %v8662_v22  ;;  %v8699_v21 = vld [vmem:[%s14461_s2 + $0x1a8] sm:$0xff] }
 0x108   : > { %10028 = vmatprep.subr.mxu1 %v8647_v23  ;;  %10068 = vmatmul.mubr.f32.vlgmr.msra.gmra.mxu0 %v11860_v48  ;;  %v8682_v48 = vld [vmem:[%s14461_s2 + $0x120] sm:$0xff]  ;;  %v8715_v22 = vld [vmem:[%s14461_s2 + $0x228] sm:$0xff] }
 0x109   : > { %10105 = vmatprep.subr.mxu0 %v8693_v24  ;;  %10029 = vmatpush3.msra.mxu1 %v8647_v23  ;;  %v8698_v23 = vld [vmem:[%s14461_s2 + $0x1a0] sm:$0xff] }
 0x10a   : > { %10032 = vmatprep.mubr.f32.mxu1 %v11961_v25  ;;  %10106 = vmatpush3.msra.mxu0 %v8693_v24  ;;  %v8714_v24 = vld [vmem:[%s14461_s2 + $0x220] sm:$0xff] }
 0x10b   : > { %10137 = vmatprep.mubr.f32.mxu0 %v11871_v53  ;;  %10030 = vmatprep.subr.mxu1 %v8646_v26  ;;  %v8680_v53 = vld [vmem:[%s14461_s2 + $0x110] sm:$0xff] }
 0x10c   : > { %10107 = vmatprep.subr.mxu0 %v8692_v27  ;;  %10031 = vmatpush3.msra.mxu1 %v8646_v26  ;;  %v8713_v26 = vld [vmem:[%s14461_s2 + $0x218] sm:$0xff] }
 0x10d   : > { %10108 = vmatpush3.msra.mxu0 %v8692_v27  ;;  %10033 = vmatmul.mubr.f32.vlgmr.msra.gmra.mxu1 %v11947_v20  ;;  %v8696_v27 = vld [vmem:[%s14461_s2 + $0x190] sm:$0xff] }
 0x10e   : > { %10070 = vmatprep.subr.mxu1 %v1536_v28  ;;  %10109 = vmatprep.subr.mxu0 %v8691_v29 }
 0x10f   : > { %10071 = vmatpush3.msra.mxu1 %v1536_v28  ;;  %10102 = vmatprep.mubr.f32.mxu1 %v11858_v47  ;;  %v1527_v47 = vld [vmem:[%s14461_s2 + $0x30] sm:$0xff] }
 0x110   : > { %10110 = vmatpush3.msra.mxu0 %v8691_v29  ;;  %10072 = vmatprep.subr.mxu1 %v1535_v30  ;;  %v8712_v28 = vld [vmem:[%s14461_s2 + $0x210] sm:$0xff]  ;;  %v8695_v29 = vld [vmem:[%s14461_s2 + $0x188] sm:$0xff] }
 0x111   : > { %10111 = vmatprep.subr.mxu0 %v8690_v31  ;;  %10073 = vmatpush3.msra.mxu1 %v1535_v30  ;;  %v9929_v30 = vpop.f32.mrf.mxu0 }
 0x112   : > { %10112 = vmatpush3.msra.mxu0 %v8690_v31  ;;  %10074 = vmatprep.subr.mxu1 %v1534_v32  ;;  %v8711_v31 = vld [vmem:[%s14461_s2 + $0x208] sm:$0xff] }
 0x113   : > { %10113 = vmatprep.subr.mxu0 %v8689_v33  ;;  %10075 = vmatpush3.msra.mxu1 %v1534_v32  ;;  %v8694_v32 = vld [vmem:[%s14461_s2 + $0x180] sm:$0xff] }
 0x114   : > { %10114 = vmatpush3.msra.mxu0 %v8689_v33  ;;  %10076 = vmatprep.subr.mxu1 %v1533_v34  ;;  %v8710_v33 = vld [vmem:[%s14461_s2 + $0x200] sm:$0xff] }
 0x115   : > { %10115 = vmatprep.subr.mxu0 %v8688_v35  ;;  %10077 = vmatpush3.msra.mxu1 %v1533_v34  ;;  %v1223_v34 = vpop.f32.mrf.mxu0 }
 0x116   : > { %10116 = vmatpush3.msra.mxu0 %v8688_v35  ;;  %10078 = vmatprep.subr.mxu1 %v1532_v36  ;;  %v1509_v35 = vlaneseq }
 0x117   : > { %10117 = vmatprep.subr.mxu0 %v8687_v37  ;;  %10079 = vmatpush3.msra.mxu1 %v1532_v36 }
 0x118   : > { %10118 = vmatpush3.msra.mxu0 %v8687_v37  ;;  %10080 = vmatprep.subr.mxu1 %v1531_v38  ;;  %v12168_v36 = vshrl.u32 %v1509_v35, 7  ;;  %v2456_v35 = vld [vmem:[%s14462_s28 + $0x40] sm:$0xff] }
 0x119   : > { %10119 = vmatprep.subr.mxu0 %v8686_v39  ;;  %10081 = vmatpush3.msra.mxu1 %v1531_v38 }
 0x11a   : > { %10120 = vmatpush3.msra.mxu0 %v8686_v39  ;;  %10082 = vmatprep.subr.mxu1 %v1530_v40  ;;  %v12171_v38 = vsub.s32 0, %v12168_v36 }
 0x11b   : > { %10121 = vmatprep.subr.mxu0 %v8685_v41  ;;  %10083 = vmatpush3.msra.mxu1 %v1530_v40 }
 0x11c   : > { %10122 = vmatpush3.msra.mxu0 %v8685_v41  ;;  %10084 = vmatprep.subr.mxu1 %v1529_v42 }
 0x11d   : > { %10123 = vmatprep.subr.mxu0 %v8684_v43  ;;  %10085 = vmatpush3.msra.mxu1 %v1529_v42 }
 0x11e   : > { %10124 = vmatpush3.msra.mxu0 %v8684_v43  ;;  %10086 = vmatprep.subr.mxu1 %v1528_v44 }
 0x11f   : > { %10125 = vmatprep.subr.mxu0 %v8683_v45  ;;  %10087 = vmatpush3.msra.mxu1 %v1528_v44 }
 0x120   : > { %10126 = vmatpush3.msra.mxu0 %v8683_v45  ;;  %10088 = vmatprep.subr.mxu1 %v1527_v47 }
 0x121   : > { %10127 = vmatprep.subr.mxu0 %v8682_v48  ;;  %10089 = vmatpush3.msra.mxu1 %v1527_v47 }
 0x122   : > { %10128 = vmatpush3.msra.mxu0 %v8682_v48  ;;  %10090 = vmatprep.subr.mxu1 %v1526_v49 }
 0x123   : > { %10129 = vmatprep.subr.mxu0 %v8681_v50  ;;  %10091 = vmatpush3.msra.mxu1 %v1526_v49 }
 0x124   : > { %10130 = vmatpush3.msra.mxu0 %v8681_v50  ;;  %10092 = vmatprep.subr.mxu1 %v1525_v52 }
 0x125   : > { %10131 = vmatprep.subr.mxu0 %v8680_v53  ;;  %10093 = vmatpush3.msra.mxu1 %v1525_v52 }
 0x126   : > { %10132 = vmatpush3.msra.mxu0 %v8680_v53  ;;  %10094 = vmatprep.subr.mxu1 %v1524_v54 }
 0x127   : > { %10133 = vmatprep.subr.mxu0 %v8679_v55  ;;  %10095 = vmatpush3.msra.mxu1 %v1524_v54 }
 0x128   : > { %10134 = vmatpush3.msra.mxu0 %v8679_v55  ;;  %10096 = vmatprep.subr.mxu1 %v1523_v56 }
 0x129   : > { %10135 = vmatprep.subr.mxu0 %v8678_v57  ;;  %10097 = vmatpush3.msra.mxu1 %v1523_v56 }
 0x12a   : > { %10136 = vmatpush3.msra.mxu0 %v8678_v57  ;;  %10098 = vmatprep.subr.mxu1 %v1522_v58 }
 0x12b   : > { %10138 = vmatmul.mubr.f32.vlgmr.msra.gmra.mxu0 %v11865_v51  ;;  %10099 = vmatpush3.msra.mxu1 %v1522_v58  ;;  %v8707_v51 = vld [vmem:[%s14461_s2 + $0x1e8] sm:$0xff] }
 0x12c   : > { %10100 = vmatprep.subr.mxu1 %v1521_v59  ;;  %10175 = vmatprep.subr.mxu0 %v8725_v60 }
 0x12d   : > { %10101 = vmatpush3.msra.mxu1 %v1521_v59  ;;  %10176 = vmatpush3.msra.mxu0 %v8725_v60 }
 0x12e   : > { %10103 = vmatmul.mubr.f32.vlgmr.msra.gmra.mxu1 %v11856_v46  ;;  %10140 = vmatprep.subr.mxu1 %v8709_v61  ;;  %v8706_v46 = vld [vmem:[%s14461_s2 + $0x1e0] sm:$0xff] }
 0x12f   : > { %10141 = vmatpush3.msra.mxu1 %v8709_v61  ;;  %10172 = vmatprep.mubr.f32.mxu1 %v11961_v25  ;;  %v8697_v25 = vld [vmem:[%s14461_s2 + $0x198] sm:$0xff]  ;;  %s14468_s2 = sld [smem:[#allocation4_spill]] }
 0x130   : > { %10142 = vmatprep.subr.mxu1 %v8708_v62  ;;  %10177 = vmatprep.subr.mxu0 %v8724_v63 }
 0x131   : > { %10143 = vmatpush3.msra.mxu1 %v8708_v62  ;;  %10178 = vmatpush3.msra.mxu0 %v8724_v63  ;;  %v1988_v63 = vsub.s32 1, %v12168_v36 }
 0x132   : > { %10144 = vmatprep.subr.mxu1 %v8707_v51  ;;  %10179 = vmatprep.subr.mxu0 %v8723_v0 }
 0x133   : > { %10145 = vmatpush3.msra.mxu1 %v8707_v51  ;;  %10180 = vmatpush3.msra.mxu0 %v8723_v0 }
 0x134   : > { %10146 = vmatprep.subr.mxu1 %v8706_v46  ;;  %10181 = vmatprep.subr.mxu0 %v8722_v2 }
 0x135   : > { %10147 = vmatpush3.msra.mxu1 %v8706_v46  ;;  %10182 = vmatpush3.msra.mxu0 %v8722_v2 }
 0x136   : > { %10148 = vmatprep.subr.mxu1 %v8705_v3  ;;  %10183 = vmatprep.subr.mxu0 %v8721_v4 }
 0x137   : > { %10149 = vmatpush3.msra.mxu1 %v8705_v3  ;;  %10184 = vmatpush3.msra.mxu0 %v8721_v4 }
 0x138   : > { %10150 = vmatprep.subr.mxu1 %v8704_v7  ;;  %10185 = vmatprep.subr.mxu0 %v8720_v10 }
 0x139   : > { %10151 = vmatpush3.msra.mxu1 %v8704_v7  ;;  %10186 = vmatpush3.msra.mxu0 %v8720_v10 }
 0x13a   : > { %10152 = vmatprep.subr.mxu1 %v8703_v12  ;;  %10187 = vmatprep.subr.mxu0 %v8719_v13 }
 0x13b   : > { %10153 = vmatpush3.msra.mxu1 %v8703_v12  ;;  %10188 = vmatpush3.msra.mxu0 %v8719_v13 }
 0x13c   : > { %10154 = vmatprep.subr.mxu1 %v8702_v14  ;;  %10189 = vmatprep.subr.mxu0 %v8718_v15 }
 0x13d   : > { %10155 = vmatpush3.msra.mxu1 %v8702_v14  ;;  %10190 = vmatpush3.msra.mxu0 %v8718_v15 }
 0x13e   : > { %10156 = vmatprep.subr.mxu1 %v8701_v16  ;;  %10191 = vmatprep.subr.mxu0 %v8717_v17 }
 0x13f   : > { %10157 = vmatpush3.msra.mxu1 %v8701_v16  ;;  %10192 = vmatpush3.msra.mxu0 %v8717_v17 }
 0x140   : > { %10158 = vmatprep.subr.mxu1 %v8700_v18  ;;  %10193 = vmatprep.subr.mxu0 %v8716_v19 }
 0x141   : > { %10159 = vmatpush3.msra.mxu1 %v8700_v18  ;;  %10194 = vmatpush3.msra.mxu0 %v8716_v19  ;;  %v8753_v19 = vld [vmem:[%s14462_s28 + $0xf8] sm:$0xff] }
 0x142   : > { %10160 = vmatprep.subr.mxu1 %v8699_v21  ;;  %10195 = vmatprep.subr.mxu0 %v8715_v22 }
 0x143   : > { %10161 = vmatpush3.msra.mxu1 %v8699_v21  ;;  %10196 = vmatpush3.msra.mxu0 %v8715_v22  ;;  %v11520_v21 = vld [vmem:[%s14458_s8 + $0x30] sm:$0xff] }
 0x144   : > { %10162 = vmatprep.subr.mxu1 %v8698_v23  ;;  %10197 = vmatprep.subr.mxu0 %v8714_v24  ;;  %v8752_v22 = vld [vmem:[%s14462_s28 + $0xf0] sm:$0xff] }
 0x145   : > { %10163 = vmatpush3.msra.mxu1 %v8698_v23  ;;  %10198 = vmatpush3.msra.mxu0 %v8714_v24  ;;  %v2462_v23 = vld [vmem:[%s14462_s28 + $0x70] sm:$0xff]  ;;  %v8751_v24 = vld [vmem:[%s14462_s28 + $0xe8] sm:$0xff] }
 0x146   : > { %10164 = vmatprep.subr.mxu1 %v8697_v25  ;;  %10199 = vmatprep.subr.mxu0 %v8713_v26 }
 0x147   : > { %10165 = vmatpush3.msra.mxu1 %v8697_v25  ;;  %10200 = vmatpush3.msra.mxu0 %v8713_v26  ;;  %v2461_v25 = vld [vmem:[%s14462_s28 + $0x68] sm:$0xff]  ;;  %v8750_v26 = vld [vmem:[%s14462_s28 + $0xe0] sm:$0xff] }
 0x148   : > { %10166 = vmatprep.subr.mxu1 %v8696_v27  ;;  %10201 = vmatprep.subr.mxu0 %v8712_v28 }
 0x149   : > { %10167 = vmatpush3.msra.mxu1 %v8696_v27  ;;  %10202 = vmatpush3.msra.mxu0 %v8712_v28  ;;  %v2460_v27 = vld [vmem:[%s14462_s28 + $0x60] sm:$0xff]  ;;  %v8749_v28 = vld [vmem:[%s14462_s28 + $0xd8] sm:$0xff] }
 0x14a   : > { %10168 = vmatprep.subr.mxu1 %v8695_v29  ;;  %10203 = vmatprep.subr.mxu0 %v8711_v31 }
 0x14b   : > { %10169 = vmatpush3.msra.mxu1 %v8695_v29  ;;  %10204 = vmatpush3.msra.mxu0 %v8711_v31  ;;  %v2459_v29 = vld [vmem:[%s14462_s28 + $0x58] sm:$0xff]  ;;  %v2458_v31 = vld [vmem:[%s14462_s28 + $0x50] sm:$0xff] }
 0x14c   : > { %10170 = vmatprep.subr.mxu1 %v8694_v32  ;;  %10205 = vmatprep.subr.mxu0 %v8710_v33 }
 0x14d   : > { %10171 = vmatpush3.msra.mxu1 %v8694_v32  ;;  %10206 = vmatpush3.msra.mxu0 %v8710_v33  ;;  %v8747_v32 = vld [vmem:[%s14462_s28 + $0xc8] sm:$0xff] }
 0x14e   : > { %10173 = vmatmul.mubr.f32.vlgmr.msra.gmra.mxu1 %v11947_v20  ;;  %10207 = vmatprep.mubr.f32.mxu0 %v1223_v34  ;;  %v12176_v20 = vld [vmem:[%s14427_s25] sm:$0xff]  ;;  %v2457_v33 = vld [vmem:[%s14462_s28 + $0x48] sm:$0xff] }
 0x14f   : > { %10208 = vmatmul.mubr.f32.vlgmr.msra.gmra.mxu0 %v9929_v30  ;;  %10214 = vmatprep.mubr.msk.f32.mxu1 %vm814_vm0, %v11713_v5  ;;  %v1512_v42 = vrot.slane %v12176_v20, %v12171_v38  ;;  %v8748_v30 = vld [vmem:[%s14462_s28 + $0xd0] sm:$0xff]  ;;  %v8746_v34 = vld [vmem:[%s14462_s28 + $0xc0] sm:$0xff] }
 0x150   : > { %10221 = vmatprep.mubr.msk.f32.mxu0 %vm814_vm0, %v11734_v9 }
 0x1a8   : > { %v9999_v39 = vpop.f32.mrf.mxu0 }
 0x1aa   : > { %v1406_v43 = vpop.f32.mrf.mxu0 }
 0x1ac   : > { %v9964_v37 = vpop.f32.mrf.mxu1 }
 0x1ad   : > { %v1412_v41 = vadd.f32 %v9999_v39, %v9964_v37  ;;  %v8745_v37 = vld [vmem:[%s14462_s28 + $0xb8] sm:$0xff] }
 0x1ae   : > { %v1331_v40 = vpop.f32.mrf.mxu1  ;;  %v2455_v39 = vld [vmem:[%s14462_s28 + $0x38] sm:$0xff] }
 0x1af   : > { %v1407_v45 = vadd.f32 %v1406_v43, %v1331_v40  ;;  %v8744_v40 = vld [vmem:[%s14462_s28 + $0xb0] sm:$0xff]  ;;  %v2453_v43 = vld [vmem:[%s14462_s28 + $0x28] sm:$0xff] }
 0x1c8   : > { %v10069_v57 = vpop.f32.mrf.mxu0 }
 0x1ca   : > { %v1620_v59 = vpop.f32.mrf.mxu0 }
 0x1cd   : > { %v10034_v44 = vpop.f32.mrf.mxu1 }
 0x1ce   : > { %v1508_v47 = vadd.f32 %v10034_v44, %v1412_v41  ;;  %v2454_v41 = vld [vmem:[%s14462_s28 + $0x30] sm:$0xff]  ;;  %v8742_v44 = vld [vmem:[%s14462_s28 + $0xa0] sm:$0xff] }
 0x1cf   : > { %v1498_v48 = vpop.f32.mrf.mxu1 }
 0x1d0   : > { %v1514_v49 = vadd.f32 %v1512_v42, %v1508_v47  ;;  %v1507_v50 = vadd.f32 %v1498_v48, %v1407_v45  ;;  %v2452_v45 = vld [vmem:[%s14462_s28 + $0x20] sm:$0xff]  ;;  %v8741_v47 = vld [vmem:[%s14462_s28 + $0x98] sm:$0xff] }
 0x1d1   : > { %v2451_v48 = vld [vmem:[%s14462_s28 + $0x18] sm:$0xff] }
 0x1d2   : > { %vm1516_vm1 = vcmp.ge.f32.partialorder %v1514_v49, 0.0  ;;  %v1518_v52 = vmul.f32 0.2, %v1514_v49  ;;  %v1513_v53 = vadd.f32 %v1512_v42, %v1507_v50  ;;  %v8743_v42 = vld [vmem:[%s14462_s28 + $0xa8] sm:$0xff]  ;;  %v2450_v50 = vld [vmem:[%s14462_s28 + $0x10] sm:$0xff] }
 0x1d4   : > { %v12180_v54 = vsel %vm1516_vm1, %v1514_v49, %v1518_v52  ;;  %vm1515_vm2 = vcmp.ge.f32.partialorder %v1513_v53, 0.0  ;;  %v1517_v55 = vmul.f32 0.2, %v1513_v53  ;;  %v8740_v49 = vld [vmem:[%s14462_s28 + $0x90] sm:$0xff]  ;;  %v8739_v52 = vld [vmem:[%s14462_s28 + $0x88] sm:$0xff] }
 0x1d5   : > { %10210 = vmatprep.subr.mxu1 %v12180_v54  ;;  %10217 = vmatprep.subr.mxu0 %v12180_v54 }
 0x1d6   : > { %v12184_v56 = vsel %vm1515_vm2, %v1513_v53, %v1517_v55  ;;  %10211 = vmatpush3.msra.mxu1 %v12180_v54  ;;  %10218 = vmatpush3.msra.mxu0 %v12180_v54  ;;  %v2449_v53 = vld [vmem:[%s14462_s28 + $0x8] sm:$0xff]  ;;  %v8738_v55 = vld [vmem:[%s14462_s28 + $0x80] sm:$0xff] }
 0x1d7   : > { %10212 = vmatprep.subr.mxu1 %v12184_v56  ;;  %10219 = vmatprep.subr.mxu0 %v12184_v56 }
 0x1d8   : > { %10213 = vmatpush3.msra.mxu1 %v12184_v56  ;;  %10220 = vmatpush3.msra.mxu0 %v12184_v56 }
 0x1d9   : > { %10215 = vmatmul.mubr.msk.f32.vlgmr.msra.gmra.mxu1 %vm814_vm0, %v11729_v8  ;;  %10222 = vmatmul.mubr.msk.f32.vlgmr.msra.gmra.mxu0 %vm814_vm0, %v11748_v11 }
 0x1da   : > { %10224 = vmatprep.subr.mxu1 %v12180_v54  ;;  %10228 = vmatprep.mubr.msk.f32.mxu1 %vm814_vm0, %v11693_v1 }
 0x1db   : > { %10225 = vmatpush3.msra.mxu1 %v12180_v54  ;;  %10235 = vmatprep.mubr.msk.f32.mxu0 %vm814_vm0, %v11713_v5 }
 0x1dc   : > { %10226 = vmatprep.subr.mxu1 %v12184_v56 }
 0x1dd   : > { %10227 = vmatpush3.msra.mxu1 %v12184_v56 }
 0x1de   : > { %10229 = vmatmul.mubr.msk.f32.vlgmr.msra.gmra.mxu1 %vm814_vm0, %v11718_v6  ;;  %v1989_v6 = vrot.slane %v12176_v20, %v1988_v63  ;;  %v8768_v63 = vld [vmem:[%s14462_s28 + $0x170] sm:$0xff] }
 0x1df   : > { %10242 = vmatprep.mubr.msk.f32.mxu1 %vm814_vm0, %v11734_v9 }
 0x1eb   : > { %v10139_v1 = vpop.f32.mrf.mxu0 }
 0x1ed   : > { %v1787_v5 = vpop.f32.mrf.mxu0 }
 0x1ee   : > { %v10104_v58 = vpop.f32.mrf.mxu1 }
 0x1ef   : > { %v1701_v61 = vadd.f32 %v10104_v58, %v10069_v57  ;;  %v2448_v57 = vld [vmem:[%s14462_s28] sm:$0xff]  ;;  %v8769_v58 = vld [vmem:[%s14462_s28 + $0x178] sm:$0xff] }
 0x1f0   : > { %v1695_v60 = vpop.f32.mrf.mxu1 }
 0x1f1   : > { %v1696_v62 = vadd.f32 %v1695_v60, %v1620_v59  ;;  %v1797_v51 = vadd.f32 %v10139_v1, %v1701_v61  ;;  %v8785_v59 = vld [vmem:[%s14463_s0 + $0xf8] sm:$0xff] }
 0x1f3   : > { %v1796_v2 = vadd.f32 %v1787_v5, %v1696_v62  ;;  %v8784_v5 = vld [vmem:[%s14463_s0 + $0xf0] sm:$0xff] }
 0x20e   : > { %v10174_v0 = vpop.f32.mrf.mxu1 }
 0x20f   : > { %v1891_v46 = vadd.f32 %v10174_v0, %v1797_v51  ;;  %v10209_v3 = vpop.f32.mrf.mxu0  ;;  %v8767_v51 = vld [vmem:[%s14462_s28 + $0x168] sm:$0xff] }
 0x210   : > { %v1881_v4 = vpop.f32.mrf.mxu1 }
 0x211   : > { %v1890_v7 = vadd.f32 %v1881_v4, %v1796_v2  ;;  %v1985_v9 = vadd.f32 %v10209_v3, %v1891_v46  ;;  %v1975_v10 = vpop.f32.mrf.mxu0  ;;  %v8783_v46 = vld [vmem:[%s14463_s0 + $0xe8] sm:$0xff]  ;;  %v8766_v2 = vld [vmem:[%s14462_s28 + $0x160] sm:$0xff]  ;;  %v8765_v4 = vld [vmem:[%s14462_s28 + $0x158] sm:$0xff] }
 0x213   : > { %v1991_v12 = vadd.f32 %v1989_v6, %v1985_v9  ;;  %v1984_v13 = vadd.f32 %v1975_v10, %v1890_v7  ;;  %v8781_v7 = vld [vmem:[%s14463_s0 + $0xd8] sm:$0xff]  ;;  %v8764_v9 = vld [vmem:[%s14462_s28 + $0x150] sm:$0xff] }
 0x214   : > { %v8780_v10 = vld [vmem:[%s14463_s0 + $0xd0] sm:$0xff] }
 0x215   : > { %vm1993_vm3 = vcmp.ge.f32.partialorder %v1991_v12, 0.0  ;;  %v1995_v14 = vmul.f32 0.2, %v1991_v12  ;;  %v1990_v15 = vadd.f32 %v1989_v6, %v1984_v13  ;;  %v8782_v6 = vld [vmem:[%s14463_s0 + $0xe0] sm:$0xff]  ;;  %v8779_v13 = vld [vmem:[%s14463_s0 + $0xc8] sm:$0xff] }
 0x217   : > { %v12210_v16 = vsel %vm1993_vm3, %v1991_v12, %v1995_v14  ;;  %vm1992_vm4 = vcmp.ge.f32.partialorder %v1990_v15, 0.0  ;;  %v1994_v17 = vmul.f32 0.2, %v1990_v15  ;;  %v8763_v12 = vld [vmem:[%s14462_s28 + $0x148] sm:$0xff]  ;;  %v8762_v14 = vld [vmem:[%s14462_s28 + $0x140] sm:$0xff] }
 0x218   : > { %10231 = vmatprep.subr.mxu0 %v12210_v16  ;;  %10238 = vmatprep.subr.mxu1 %v12210_v16 }
 0x219   : > { %v12214_v18 = vsel %vm1992_vm4, %v1990_v15, %v1994_v17  ;;  %10232 = vmatpush3.msra.mxu0 %v12210_v16  ;;  %10239 = vmatpush3.msra.mxu1 %v12210_v16  ;;  %v8778_v15 = vld [vmem:[%s14463_s0 + $0xc0] sm:$0xff]  ;;  %v8761_v17 = vld [vmem:[%s14462_s28 + $0x138] sm:$0xff] }
 0x21a   : > { %10233 = vmatprep.subr.mxu0 %v12214_v18  ;;  %10240 = vmatprep.subr.mxu1 %v12214_v18 }
 0x21b   : > { %10234 = vmatpush3.msra.mxu0 %v12214_v18  ;;  %10241 = vmatpush3.msra.mxu1 %v12214_v18 }
 0x21c   : > { %10245 = vmatprep.subr.mxu0 %v12210_v16  ;;  %10236 = vmatmul.mubr.msk.f32.vlgmr.msra.gmra.mxu0 %vm814_vm0, %v11729_v8  ;;  %v2463_v8 = vld [vmem:[%s14462_s28 + $0x78] sm:$0xff] }
 0x21d   : > { %10246 = vmatpush3.msra.mxu0 %v12210_v16  ;;  %10243 = vmatmul.mubr.msk.f32.vlgmr.msra.gmra.mxu1 %vm814_vm0, %v11748_v11  ;;  %v11521_v11 = vld [vmem:[%s14458_s8 + $0x38] sm:$0xff] }
 0x21e   : > { %10247 = vmatprep.subr.mxu0 %v12214_v18  ;;  %10249 = vmatprep.mubr.msk.f32.mxu0 %vm814_vm0, %v11520_v21  ;;  %v8760_v21 = vld [vmem:[%s14462_s28 + $0x130] sm:$0xff] }
 0x21f   : > { %10248 = vmatpush3.msra.mxu0 %v12214_v18  ;;  %10252 = vmatprep.subr.mxu1 %v8753_v19 }
 0x220   : > { %10250 = vmatmul.mubr.msk.f32.vlgmr.msra.gmra.mxu0 %vm814_vm0, %v11521_v11  ;;  %10253 = vmatpush3.msra.mxu1 %v8753_v19  ;;  %v8777_v19 = vld [vmem:[%s14463_s0 + $0xb8] sm:$0xff]  ;;  %v8775_v11 = vld [vmem:[%s14463_s0 + $0xa8] sm:$0xff] }
 0x221   : > { %10287 = vmatprep.subr.mxu0 %v2463_v8  ;;  %10254 = vmatprep.subr.mxu1 %v8752_v22 }
 0x222   : > { %10288 = vmatpush3.msra.mxu0 %v2463_v8  ;;  %10255 = vmatpush3.msra.mxu1 %v8752_v22  ;;  %v8776_v8 = vld [vmem:[%s14463_s0 + $0xb0] sm:$0xff]  ;;  %v8759_v22 = vld [vmem:[%s14462_s28 + $0x128] sm:$0xff] }
 0x223   : > { %10289 = vmatprep.subr.mxu0 %v2462_v23  ;;  %10256 = vmatprep.subr.mxu1 %v8751_v24 }
 0x224   : > { %10290 = vmatpush3.msra.mxu0 %v2462_v23  ;;  %10257 = vmatpush3.msra.mxu1 %v8751_v24  ;;  %v8758_v23 = vld [vmem:[%s14462_s28 + $0x120] sm:$0xff] }
 0x225   : > { %10291 = vmatprep.subr.mxu0 %v2461_v25  ;;  %10258 = vmatprep.subr.mxu1 %v8750_v26  ;;  %v8774_v24 = vld [vmem:[%s14463_s0 + $0xa0] sm:$0xff] }
 0x226   : > { %10292 = vmatpush3.msra.mxu0 %v2461_v25  ;;  %10259 = vmatpush3.msra.mxu1 %v8750_v26  ;;  %v8757_v25 = vld [vmem:[%s14462_s28 + $0x118] sm:$0xff] }
 0x227   : > { %10293 = vmatprep.subr.mxu0 %v2460_v27  ;;  %10260 = vmatprep.subr.mxu1 %v8749_v28  ;;  %v8773_v26 = vld [vmem:[%s14463_s0 + $0x98] sm:$0xff] }
 0x228   : > { %10294 = vmatpush3.msra.mxu0 %v2460_v27  ;;  %10261 = vmatpush3.msra.mxu1 %v8749_v28  ;;  %v8756_v27 = vld [vmem:[%s14462_s28 + $0x110] sm:$0xff] }
 0x229   : > { %10295 = vmatprep.subr.mxu0 %v2459_v29  ;;  %10262 = vmatprep.subr.mxu1 %v8748_v30  ;;  %v8772_v28 = vld [vmem:[%s14463_s0 + $0x90] sm:$0xff] }
 0x22a   : > { %10296 = vmatpush3.msra.mxu0 %v2459_v29  ;;  %10263 = vmatpush3.msra.mxu1 %v8748_v30  ;;  %v8755_v29 = vld [vmem:[%s14462_s28 + $0x108] sm:$0xff] }
 0x22b   : > { %10297 = vmatprep.subr.mxu0 %v2458_v31  ;;  %10264 = vmatprep.subr.mxu1 %v8747_v32  ;;  %v8771_v30 = vld [vmem:[%s14463_s0 + $0x88] sm:$0xff] }
 0x22c   : > { %10298 = vmatpush3.msra.mxu0 %v2458_v31  ;;  %10265 = vmatpush3.msra.mxu1 %v8747_v32  ;;  %v8754_v31 = vld [vmem:[%s14462_s28 + $0x100] sm:$0xff] }
 0x22d   : > { %10299 = vmatprep.subr.mxu0 %v2457_v33  ;;  %10266 = vmatprep.subr.mxu1 %v8746_v34  ;;  %v8770_v32 = vld [vmem:[%s14463_s0 + $0x80] sm:$0xff] }
 0x22e   : > { %10300 = vmatpush3.msra.mxu0 %v2457_v33  ;;  %10267 = vmatpush3.msra.mxu1 %v8746_v34  ;;  %v2752_v33 = vld [vmem:[%s14463_s0 + $0x78] sm:$0xff]  ;;  %v2751_v34 = vld [vmem:[%s14463_s0 + $0x70] sm:$0xff] }
 0x22f   : > { %10301 = vmatprep.subr.mxu0 %v2456_v35  ;;  %10268 = vmatprep.subr.mxu1 %v8745_v37 }
 0x230   : > { %10302 = vmatpush3.msra.mxu0 %v2456_v35  ;;  %10269 = vmatpush3.msra.mxu1 %v8745_v37  ;;  %v8801_v35 = vld [vmem:[%s14463_s0 + $0x178] sm:$0xff]  ;;  %v2750_v37 = vld [vmem:[%s14463_s0 + $0x68] sm:$0xff] }
 0x231   : > { %10303 = vmatprep.subr.mxu0 %v2455_v39  ;;  %10270 = vmatprep.subr.mxu1 %v8744_v40 }
 0x232   : > { %10304 = vmatpush3.msra.mxu0 %v2455_v39  ;;  %10271 = vmatpush3.msra.mxu1 %v8744_v40  ;;  %v2749_v39 = vld [vmem:[%s14463_s0 + $0x60] sm:$0xff]  ;;  %v2748_v40 = vld [vmem:[%s14463_s0 + $0x58] sm:$0xff] }
 0x233   : > { %10305 = vmatprep.subr.mxu0 %v2454_v41  ;;  %10272 = vmatprep.subr.mxu1 %v8743_v42 }
 0x234   : > { %10306 = vmatpush3.msra.mxu0 %v2454_v41  ;;  %10273 = vmatpush3.msra.mxu1 %v8743_v42  ;;  %v2747_v41 = vld [vmem:[%s14463_s0 + $0x50] sm:$0xff]  ;;  %v2746_v42 = vld [vmem:[%s14463_s0 + $0x48] sm:$0xff] }
 0x235   : > { %10307 = vmatprep.subr.mxu0 %v2453_v43  ;;  %10274 = vmatprep.subr.mxu1 %v8742_v44 }
 0x236   : > { %10308 = vmatpush3.msra.mxu0 %v2453_v43  ;;  %10275 = vmatpush3.msra.mxu1 %v8742_v44  ;;  %v2745_v43 = vld [vmem:[%s14463_s0 + $0x40] sm:$0xff]  ;;  %v2744_v44 = vld [vmem:[%s14463_s0 + $0x38] sm:$0xff] }
 0x237   : > { %10309 = vmatprep.subr.mxu0 %v2452_v45  ;;  %10276 = vmatprep.subr.mxu1 %v8741_v47 }
 0x238   : > { %10310 = vmatpush3.msra.mxu0 %v2452_v45  ;;  %10277 = vmatpush3.msra.mxu1 %v8741_v47  ;;  %v2743_v45 = vld [vmem:[%s14463_s0 + $0x30] sm:$0xff]  ;;  %v2742_v47 = vld [vmem:[%s14463_s0 + $0x28] sm:$0xff] }
 0x239   : > { %10311 = vmatprep.subr.mxu0 %v2451_v48  ;;  %10278 = vmatprep.subr.mxu1 %v8740_v49 }
 0x23a   : > { %10312 = vmatpush3.msra.mxu0 %v2451_v48  ;;  %10279 = vmatpush3.msra.mxu1 %v8740_v49  ;;  %v2741_v48 = vld [vmem:[%s14463_s0 + $0x20] sm:$0xff]  ;;  %v2740_v49 = vld [vmem:[%s14463_s0 + $0x18] sm:$0xff] }
 0x23b   : > { %10313 = vmatprep.subr.mxu0 %v2450_v50  ;;  %10280 = vmatprep.subr.mxu1 %v8739_v52 }
 0x23c   : > { %10314 = vmatpush3.msra.mxu0 %v2450_v50  ;;  %10281 = vmatpush3.msra.mxu1 %v8739_v52  ;;  %v2739_v50 = vld [vmem:[%s14463_s0 + $0x10] sm:$0xff]  ;;  %v2738_v52 = vld [vmem:[%s14463_s0 + $0x8] sm:$0xff] }
 0x23d   : > { %10315 = vmatprep.subr.mxu0 %v2449_v53  ;;  %10282 = vmatprep.subr.mxu1 %v8738_v55 }
 0x23e   : > { %10316 = vmatpush3.msra.mxu0 %v2449_v53  ;;  %10283 = vmatpush3.msra.mxu1 %v8738_v55  ;;  %v2737_v53 = vld [vmem:[%s14463_s0] sm:$0xff] }
 0x23f   : > { %10317 = vmatprep.subr.mxu0 %v2448_v57  ;;  %10322 = vmatprep.subr.mxu1 %v8769_v58 }
 0x240   : > { %10318 = vmatpush3.msra.mxu0 %v2448_v57 }
 0x241   : > { %10357 = vmatprep.subr.mxu0 %v8785_v59 }
 0x299   : > { %v12340_v60 = vpop.f32.mrf.mxu1  ;;  %v12342_v1 = vpop.f32.mrf.mxu0 }
 0x29b   : > { %v12344_v61 = vpop.f32.mrf.mxu1  ;;  %v12346_v62 = vpop.f32.mrf.mxu0 }
 0x29c   : > { %10284 = vmatprep.mubr.f32.mxu1 %v12346_v62  ;;  %10319 = vmatprep.mubr.f32.mxu0 %v12344_v61 }
 0x29d   : > { %10285 = vmatmul.mubr.f32.vlgmr.msra.gmra.mxu1 %v12342_v1  ;;  %10320 = vmatmul.mubr.f32.vlgmr.msra.gmra.mxu0 %v12340_v60 }
 0x29e   : > { %10323 = vmatpush3.msra.mxu1 %v8769_v58  ;;  %v12361_v0 = vpop.f32.mrf.mxu1  ;;  %10358 = vmatpush3.msra.mxu0 %v8785_v59 }
 0x29f   : > { %10324 = vmatprep.subr.mxu1 %v8768_v63  ;;  %10359 = vmatprep.subr.mxu0 %v8784_v5 }
 0x2a0   : > { %10325 = vmatpush3.msra.mxu1 %v8768_v63  ;;  %v12369_v3 = vpop.f32.mrf.mxu1  ;;  %10360 = vmatpush3.msra.mxu0 %v8784_v5  ;;  %v8800_v63 = vld [vmem:[%s14463_s0 + $0x170] sm:$0xff] }
 0x2a1   : > { %10326 = vmatprep.subr.mxu1 %v8767_v51  ;;  %10354 = vmatprep.mubr.f32.mxu1 %v12369_v3 }
 0x2a2   : > { %10327 = vmatpush3.msra.mxu1 %v8767_v51  ;;  %10361 = vmatprep.subr.mxu0 %v8783_v46  ;;  %v12518_v51 = vld [vmem:[%s14425_s23 + $0x78] sm:$0xff] }
 0x2a3   : > { %10328 = vmatprep.subr.mxu1 %v8766_v2  ;;  %10362 = vmatpush3.msra.mxu0 %v8783_v46  ;;  %v11539_v46 = vmov 0.0  }
 0x2a4   : > { %10329 = vmatpush3.msra.mxu1 %v8766_v2  ;;  %10363 = vmatprep.subr.mxu0 %v8782_v6  ;;  %v8799_v2 = vld [vmem:[%s14463_s0 + $0x168] sm:$0xff] }
 0x2a5   : > { %10330 = vmatprep.subr.mxu1 %v8765_v4  ;;  %10364 = vmatpush3.msra.mxu0 %v8782_v6 }
 0x2a6   : > { %10331 = vmatpush3.msra.mxu1 %v8765_v4  ;;  %10365 = vmatprep.subr.mxu0 %v8781_v7  ;;  %v12531_v4 = vld [vmem:[%s14425_s23 + $0x70] sm:$0xff] }
 0x2a7   : > { %10332 = vmatprep.subr.mxu1 %v8764_v9  ;;  %10366 = vmatpush3.msra.mxu0 %v8781_v7  ;;  %v8798_v7 = vld [vmem:[%s14463_s0 + $0x160] sm:$0xff] }
 0x2a8   : > { %10333 = vmatpush3.msra.mxu1 %v8764_v9  ;;  %10367 = vmatprep.subr.mxu0 %v8780_v10  ;;  %v12541_v9 = vld [vmem:[%s14425_s23 + $0x68] sm:$0xff] }
 0x2a9   : > { %10334 = vmatprep.subr.mxu1 %v8763_v12  ;;  %10368 = vmatpush3.msra.mxu0 %v8780_v10  ;;  %v8797_v10 = vld [vmem:[%s14463_s0 + $0x158] sm:$0xff] }
 0x2aa   : > { %10335 = vmatpush3.msra.mxu1 %v8763_v12  ;;  %10369 = vmatprep.subr.mxu0 %v8779_v13  ;;  %v12551_v12 = vld [vmem:[%s14425_s23 + $0x60] sm:$0xff] }
 0x2ab   : > { %10336 = vmatprep.subr.mxu1 %v8762_v14  ;;  %10370 = vmatpush3.msra.mxu0 %v8779_v13  ;;  %v8796_v13 = vld [vmem:[%s14463_s0 + $0x150] sm:$0xff] }
 0x2ac   : > { %10337 = vmatpush3.msra.mxu1 %v8762_v14  ;;  %10371 = vmatprep.subr.mxu0 %v8778_v15  ;;  %v8795_v14 = vld [vmem:[%s14463_s0 + $0x148] sm:$0xff] }
 0x2ad   : > { %10338 = vmatprep.subr.mxu1 %v8761_v17  ;;  %10372 = vmatpush3.msra.mxu0 %v8778_v15  ;;  %v8794_v15 = vld [vmem:[%s14463_s0 + $0x140] sm:$0xff] }
 0x2ae   : > { %10339 = vmatpush3.msra.mxu1 %v8761_v17  ;;  %10373 = vmatprep.subr.mxu0 %v8777_v19  ;;  %v8793_v17 = vld [vmem:[%s14463_s0 + $0x138] sm:$0xff] }
 0x2af   : > { %10340 = vmatprep.subr.mxu1 %v8760_v21  ;;  %10374 = vmatpush3.msra.mxu0 %v8777_v19  ;;  %v8792_v19 = vld [vmem:[%s14463_s0 + $0x130] sm:$0xff] }
 0x2b0   : > { %10341 = vmatpush3.msra.mxu1 %v8760_v21  ;;  %10375 = vmatprep.subr.mxu0 %v8776_v8  ;;  %v8791_v21 = vld [vmem:[%s14463_s0 + $0x128] sm:$0xff] }
 0x2b1   : > { %10342 = vmatprep.subr.mxu1 %v8759_v22  ;;  %10376 = vmatpush3.msra.mxu0 %v8776_v8  ;;  %v8790_v8 = vld [vmem:[%s14463_s0 + $0x120] sm:$0xff] }
 0x2b2   : > { %10343 = vmatpush3.msra.mxu1 %v8759_v22  ;;  %10377 = vmatprep.subr.mxu0 %v8775_v11  ;;  %v8789_v22 = vld [vmem:[%s14463_s0 + $0x118] sm:$0xff] }
 0x2b3   : > { %10344 = vmatprep.subr.mxu1 %v8758_v23  ;;  %10378 = vmatpush3.msra.mxu0 %v8775_v11  ;;  %v8788_v11 = vld [vmem:[%s14463_s0 + $0x110] sm:$0xff] }
 0x2b4   : > { %10345 = vmatpush3.msra.mxu1 %v8758_v23  ;;  %10379 = vmatprep.subr.mxu0 %v8774_v24  ;;  %v8787_v23 = vld [vmem:[%s14463_s0 + $0x108] sm:$0xff] }
 0x2b5   : > { %10346 = vmatprep.subr.mxu1 %v8757_v25  ;;  %10380 = vmatpush3.msra.mxu0 %v8774_v24  ;;  %v8786_v24 = vld [vmem:[%s14463_s0 + $0x100] sm:$0xff] }
 0x2b6   : > { %10347 = vmatpush3.msra.mxu1 %v8757_v25  ;;  %10381 = vmatprep.subr.mxu0 %v8773_v26  ;;  %v12593_v25 = vld [vmem:[%s14425_s23 + $0x58] sm:$0xff] }
 0x2b7   : > { %10348 = vmatprep.subr.mxu1 %v8756_v27  ;;  %10382 = vmatpush3.msra.mxu0 %v8773_v26  ;;  %v12600_v26 = vld [vmem:[%s14425_s23 + $0x50] sm:$0xff] }
 0x2b8   : > { %10349 = vmatpush3.msra.mxu1 %v8756_v27  ;;  %10383 = vmatprep.subr.mxu0 %v8772_v28  ;;  %v12608_v27 = vld [vmem:[%s14425_s23 + $0x48] sm:$0xff] }
 0x2b9   : > { %10350 = vmatprep.subr.mxu1 %v8755_v29  ;;  %10384 = vmatpush3.msra.mxu0 %v8772_v28  ;;  %v12616_v28 = vld [vmem:[%s14425_s23 + $0x40] sm:$0xff] }
 0x2ba   : > { %10351 = vmatpush3.msra.mxu1 %v8755_v29  ;;  %10385 = vmatprep.subr.mxu0 %v8771_v30  ;;  %v12623_v29 = vld [vmem:[%s14425_s23 + $0x38] sm:$0xff] }
 0x2bb   : > { %10352 = vmatprep.subr.mxu1 %v8754_v31  ;;  %10386 = vmatpush3.msra.mxu0 %v8771_v30  ;;  %v12630_v30 = vld [vmem:[%s14425_s23 + $0x30] sm:$0xff] }
 0x2bc   : > { %10353 = vmatpush3.msra.mxu1 %v8754_v31  ;;  %10387 = vmatprep.subr.mxu0 %v8770_v32  ;;  %v12637_v31 = vld [vmem:[%s14425_s23 + $0x28] sm:$0xff] }
 0x2bd   : > { %10355 = vmatmul.mubr.f32.vlgmr.msra.gmra.mxu1 %v12361_v0  ;;  %10392 = vmatprep.subr.mxu1 %v2752_v33 }
 0x2be   : > { %10388 = vmatpush3.msra.mxu0 %v8770_v32  ;;  %10393 = vmatpush3.msra.mxu1 %v2752_v33  ;;  %v12643_v32 = vld [vmem:[%s14425_s23 + $0x20] sm:$0xff]  ;;  %v12649_v33 = vld [vmem:[%s14425_s23 + $0x18] sm:$0xff] }
 0x2bf   : > { %10394 = vmatprep.subr.mxu1 %v2751_v34  ;;  %10427 = vmatprep.subr.mxu0 %v8801_v35 }
 0x2c0   : > { %10395 = vmatpush3.msra.mxu1 %v2751_v34  ;;  %v12660_v34 = vld [vmem:[%s14425_s23 + $0x10] sm:$0xff] }
 0x2c1   : > { %10396 = vmatprep.subr.mxu1 %v2750_v37 }
 0x2c2   : > { %10397 = vmatpush3.msra.mxu1 %v2750_v37  ;;  %v12674_v37 = vld [vmem:[%s14425_s23] sm:$0xff] }
 0x2c3   : > { %10398 = vmatprep.subr.mxu1 %v2749_v39 }
 0x2c4   : > { %10399 = vmatpush3.msra.mxu1 %v2749_v39 }
 0x2c5   : > { %10400 = vmatprep.subr.mxu1 %v2748_v40 }
 0x2c6   : > { %10401 = vmatpush3.msra.mxu1 %v2748_v40 }
 0x2c7   : > { %10402 = vmatprep.subr.mxu1 %v2747_v41 }
 0x2c8   : > { %10403 = vmatpush3.msra.mxu1 %v2747_v41  ;;  %v2727_v41 = vsub.s32 2, %v12168_v36 }
 0x2c9   : > { %10404 = vmatprep.subr.mxu1 %v2746_v42 }
 0x2ca   : > { %10405 = vmatpush3.msra.mxu1 %v2746_v42 }
 0x2cb   : > { %10406 = vmatprep.subr.mxu1 %v2745_v43 }
 0x2cc   : > { %10407 = vmatpush3.msra.mxu1 %v2745_v43 }
 0x2cd   : > { %10408 = vmatprep.subr.mxu1 %v2744_v44 }
 0x2ce   : > { %10409 = vmatpush3.msra.mxu1 %v2744_v44 }
 0x2cf   : > { %10410 = vmatprep.subr.mxu1 %v2743_v45 }
 0x2d0   : > { %10411 = vmatpush3.msra.mxu1 %v2743_v45  ;;  %v2728_v45 = vrot.slane %v12176_v20, %v2727_v41 }
 0x2d1   : > { %10412 = vmatprep.subr.mxu1 %v2742_v47 }
 0x2d2   : > { %10413 = vmatpush3.msra.mxu1 %v2742_v47 }
 0x2d3   : > { %10414 = vmatprep.subr.mxu1 %v2741_v48 }
 0x2d4   : > { %10415 = vmatpush3.msra.mxu1 %v2741_v48 }
 0x2d5   : > { %10416 = vmatprep.subr.mxu1 %v2740_v49 }
 0x2d6   : > { %10417 = vmatpush3.msra.mxu1 %v2740_v49 }
 0x2d7   : > { %10418 = vmatprep.subr.mxu1 %v2739_v50 }
 0x2d8   : > { %10419 = vmatpush3.msra.mxu1 %v2739_v50 }
 0x2d9   : > { %10420 = vmatprep.subr.mxu1 %v2738_v52 }
 0x2da   : > { %10421 = vmatpush3.msra.mxu1 %v2738_v52 }
 0x2db   : > { %10422 = vmatprep.subr.mxu1 %v2737_v53 }
 0x2dc   : > { %v12499_v55 = vpop.f32.mrf.mxu0  ;;  %10423 = vmatpush3.msra.mxu1 %v2737_v53 }
 0x2dd   : > { %v12501_v57 = vpop.f32.mrf.mxu1  ;;  %10462 = vmatprep.subr.mxu1 %v11539_v46 }
 0x2de   : > { %v12503_v58 = vpop.f32.mrf.mxu0 }
 0x2df   : > { %v12505_v59 = vpop.f32.mrf.mxu1  ;;  %10424 = vmatprep.mubr.f32.mxu1 %v12503_v58 }
 0x2e0   : > { %10389 = vmatprep.mubr.f32.mxu0 %v12505_v59  ;;  %v12512_v5 = vpop.f32.mrf.mxu0  ;;  %10425 = vmatmul.mubr.f32.vlgmr.msra.gmra.mxu1 %v12499_v55 }
 0x2e1   : > { %10390 = vmatmul.mubr.f32.vlgmr.msra.gmra.mxu0 %v12501_v57  ;;  %10463 = vmatpush3.msra.mxu1 %v12518_v51 }
 0x2e2   : > { %10428 = vmatpush3.msra.mxu0 %v8801_v35  ;;  %v12525_v6 = vpop.f32.mrf.mxu0  ;;  %10464 = vmatprep.subr.mxu1 %v11539_v46  ;;  %v12667_v35 = vld [vmem:[%s14425_s23 + $0x8] sm:$0xff] }
 0x2e3   : > { %10429 = vmatprep.subr.mxu0 %v8800_v63  ;;  %10459 = vmatprep.mubr.f32.mxu0 %v12525_v6 }
 0x2e4   : > { %10430 = vmatpush3.msra.mxu0 %v8800_v63  ;;  %10465 = vmatpush3.msra.mxu1 %v12531_v4 }
 0x2e5   : > { %10431 = vmatprep.subr.mxu0 %v8799_v2  ;;  %10466 = vmatprep.subr.mxu1 %v11539_v46 }
 0x2e6   : > { %10432 = vmatpush3.msra.mxu0 %v8799_v2  ;;  %10467 = vmatpush3.msra.mxu1 %v12541_v9 }
 0x2e7   : > { %10433 = vmatprep.subr.mxu0 %v8798_v7  ;;  %10468 = vmatprep.subr.mxu1 %v11539_v46 }
 0x2e8   : > { %10434 = vmatpush3.msra.mxu0 %v8798_v7  ;;  %10469 = vmatpush3.msra.mxu1 %v12551_v12 }
 0x2e9   : > { %10435 = vmatprep.subr.mxu0 %v8797_v10  ;;  %10470 = vmatprep.subr.mxu1 %v11539_v46 }
 0x2ea   : > { %10436 = vmatpush3.msra.mxu0 %v8797_v10  ;;  %10471 = vmatpush3.msra.mxu1 %v12593_v25 }
 0x2eb   : > { %10437 = vmatprep.subr.mxu0 %v8796_v13  ;;  %10472 = vmatprep.subr.mxu1 %v11539_v46 }
 0x2ec   : > { %10438 = vmatpush3.msra.mxu0 %v8796_v13  ;;  %10473 = vmatpush3.msra.mxu1 %v12600_v26 }
 0x2ed   : > { %10439 = vmatprep.subr.mxu0 %v8795_v14  ;;  %10474 = vmatprep.subr.mxu1 %v11539_v46 }
 0x2ee   : > { %10440 = vmatpush3.msra.mxu0 %v8795_v14  ;;  %10475 = vmatpush3.msra.mxu1 %v12608_v27 }
 0x2ef   : > { %10441 = vmatprep.subr.mxu0 %v8794_v15  ;;  %10476 = vmatprep.subr.mxu1 %v11539_v46 }
 0x2f0   : > { %10442 = vmatpush3.msra.mxu0 %v8794_v15  ;;  %10477 = vmatpush3.msra.mxu1 %v12616_v28 }
 0x2f1   : > { %10443 = vmatprep.subr.mxu0 %v8793_v17  ;;  %10478 = vmatprep.subr.mxu1 %v11539_v46 }
 0x2f2   : > { %10444 = vmatpush3.msra.mxu0 %v8793_v17  ;;  %10479 = vmatpush3.msra.mxu1 %v12623_v29 }
 0x2f3   : > { %10445 = vmatprep.subr.mxu0 %v8792_v19  ;;  %10480 = vmatprep.subr.mxu1 %v11539_v46 }
 0x2f4   : > { %10446 = vmatpush3.msra.mxu0 %v8792_v19  ;;  %10481 = vmatpush3.msra.mxu1 %v12630_v30 }
 0x2f5   : > { %10447 = vmatprep.subr.mxu0 %v8791_v21  ;;  %10482 = vmatprep.subr.mxu1 %v11539_v46 }
 0x2f6   : > { %10448 = vmatpush3.msra.mxu0 %v8791_v21  ;;  %10483 = vmatpush3.msra.mxu1 %v12637_v31 }
 0x2f7   : > { %10449 = vmatprep.subr.mxu0 %v8790_v8  ;;  %10484 = vmatprep.subr.mxu1 %v11539_v46 }
 0x2f8   : > { %10450 = vmatpush3.msra.mxu0 %v8790_v8  ;;  %10494 = vmatprep.mubr.msk.f32.mxu1 %vm11540_vm5, %v11539_v46 }
 0x2f9   : > { %10451 = vmatprep.subr.mxu0 %v8789_v22  ;;  %10485 = vmatpush3.msra.mxu1 %v12643_v32 }
 0x2fa   : > { %10452 = vmatpush3.msra.mxu0 %v8789_v22  ;;  %10486 = vmatprep.subr.mxu1 %v11539_v46 }
 0x2fb   : > { %10453 = vmatprep.subr.mxu0 %v8788_v11  ;;  %10487 = vmatpush3.msra.mxu1 %v12649_v33 }
 0x2fc   : > { %10454 = vmatpush3.msra.mxu0 %v8788_v11  ;;  %10488 = vmatprep.subr.mxu1 %v11539_v46  ;;  %v811_v11 = vld [vmem:[%s14426_s24] sm:$0xff] }
 0x2fd   : > { %10455 = vmatprep.subr.mxu0 %v8787_v23  ;;  %10489 = vmatpush3.msra.mxu1 %v12660_v34 }
 0x2fe   : > { %10456 = vmatpush3.msra.mxu0 %v8787_v23  ;;  %10490 = vmatprep.subr.mxu1 %v11539_v46 }
 0x2ff   : > { %10457 = vmatprep.subr.mxu0 %v8786_v24  ;;  %10491 = vmatpush3.msra.mxu1 %v12667_v35 }
 0x300   : > { %10458 = vmatpush3.msra.mxu0 %v8786_v24  ;;  %10492 = vmatprep.subr.mxu1 %v11539_v46 }
 0x301   : > { %10460 = vmatmul.mubr.f32.vlgmr.msra.gmra.mxu0 %v12512_v5  ;;  %10497 = vmatprep.subr.mxu0 %v11539_v46 }
 0x302   : > { %10499 = vmatprep.mubr.msk.f32.mxu0 %vm11540_vm5, %v11539_v46  ;;  %10493 = vmatpush3.msra.mxu1 %v12674_v37 }
 0x303   : > { %10537 = vmatprep.subr.mxu1 %v11539_v46  ;;  %10498 = vmatpush3.msra.mxu0 %v811_v11 }
 0x304   : > { %10502 = vmatprep.subr.mxu0 %v11539_v46 }
 0x35d   : > { %v10286_v39 = vpop.f32.mrf.mxu1  ;;  %v10321_v40 = vpop.f32.mrf.mxu0 }
 0x35e   : > { %v2628_v44 = vadd.f32 %v10321_v40, %v10286_v39 }
 0x35f   : > { %v2547_v42 = vpop.f32.mrf.mxu1  ;;  %v2622_v43 = vpop.f32.mrf.mxu0 }
 0x360   : > { %v2623_v48 = vadd.f32 %v2622_v43, %v2547_v42 }
 0x37d   : > { %v10356_v47 = vpop.f32.mrf.mxu1 }
 0x37e   : > { %v2724_v49 = vadd.f32 %v10356_v47, %v2628_v44 }
 0x37f   : > { %v2714_v50 = vpop.f32.mrf.mxu1 }
 0x380   : > { %v2730_v52 = vadd.f32 %v2728_v45, %v2724_v49  ;;  %v2723_v53 = vadd.f32 %v2714_v50, %v2623_v48 }
 0x382   : > { %v2734_v63 = vmul.f32 0.2, %v2730_v52  ;;  %v2729_v2 = vadd.f32 %v2728_v45, %v2723_v53  ;;  %vm2732_vm6 = vcmp.ge.f32.partialorder %v2730_v52, 0.0 }
 0x384   : > { %vm2731_vm7 = vcmp.ge.f32.partialorder %v2729_v2, 0.0  ;;  %v2733_v7 = vmul.f32 0.2, %v2729_v2  ;;  %v2736_v10 = vsel %vm2732_vm6, %v2730_v52, %v2734_v63  ;;  %v3016_v52 = vsub.s32 3, %v12168_v36 }
 0x386   : > { %v2735_v13 = vsel %vm2731_vm7, %v2729_v2, %v2733_v7  ;;  %v3017_v2 = vrot.slane %v12176_v20, %v3016_v52  ;;  %v12879_v52 = vld [vmem:[%s14465_s18 + $0x50] sm:$0xff] }
 0x387   : > { %v3026_v14 = vadd.f32 %v2736_v10, %v2735_v13 }
 0x389   : > { %v3027_v15 = vrot.slane %v3026_v14, 4 }
 0x38b   : > { %v3028_v17 = vadd.f32 %v3027_v15, %v3026_v14 }
 0x38d   : > { %v3029_v19 = vrot.slane %v3028_v17, 2 }
 0x38f   : > { %v3030_v21 = vadd.f32 %v3029_v19, %v3028_v17 }
 0x391   : > { %v3031_v8 = vrot.slane %v3030_v21, 1 }
 0x393   : > { %v3032_v22 = vadd.f32 %v3031_v8, %v3030_v21  ;;  %v12807_v8 = vld [vmem:[%s14465_s18 + $0xb0] sm:$0xff] }
 0x395   : > { %10495 = vmatmul.mubr.f32.vlgmr.msra.gmra.mxu1 %v3032_v22  ;;  %v12814_v22 = vld [vmem:[%s14465_s18 + $0xa8] sm:$0xff] }
 0x396   : > { %10539 = vmatprep.mubr.msk.f32.mxu1 %vm11540_vm5, %v11539_v46  ;;  %10538 = vmatpush3.msra.mxu1 %v811_v11  ;;  %v12821_v11 = vld [vmem:[%s14465_s18 + $0xa0] sm:$0xff] }
 0x397   : > { %10542 = vmatprep.subr.mxu1 %v11539_v46 }
 0x3a0   : > { %v10426_v23 = vpop.f32.mrf.mxu1 }
 0x3a1   : > { %v10391_v43 = vpop.f32.mrf.mxu0 }
 0x3a2   : > { %v2911_v24 = vpop.f32.mrf.mxu1  ;;  %v2917_v49 = vadd.f32 %v10426_v23, %v10391_v43 }
 0x3a3   : > { %v2836_v44 = vpop.f32.mrf.mxu0 }
 0x3a4   : > { %v2912_v50 = vadd.f32 %v2911_v24, %v2836_v44 }
 0x3c1   : > { %v10461_v47 = vpop.f32.mrf.mxu0 }
 0x3c2   : > { %v3013_v63 = vadd.f32 %v10461_v47, %v2917_v49  ;;  %v12834_v47 = vld [vmem:[%s14464_s17] sm:$0xff] }
 0x3c3   : > { %v3003_v53 = vpop.f32.mrf.mxu0  ;;  %v12865_v49 = vld [vmem:[%s14465_s18 + $0x60] sm:$0xff] }
 0x3c4   : > { %v3012_v7 = vadd.f32 %v3003_v53, %v2912_v50  ;;  %v3019_v10 = vadd.f32 %v3017_v2, %v3013_v63  ;;  %v12872_v50 = vld [vmem:[%s14465_s18 + $0x58] sm:$0xff]  ;;  %v12886_v53 = vld [vmem:[%s14465_s18 + $0x48] sm:$0xff]  ;;  %v12893_v63 = vld [vmem:[%s14465_s18 + $0x40] sm:$0xff] }
 0x3c6   : > { %v3018_v13 = vadd.f32 %v3017_v2, %v3012_v7  ;;  %v3023_v15 = vmul.f32 0.2, %v3019_v10  ;;  %vm3021_vm9 = vcmp.ge.f32.partialorder %v3019_v10, 0.0  ;;  %v12900_v2 = vld [vmem:[%s14465_s18 + $0x38] sm:$0xff]  ;;  %v12907_v7 = vld [vmem:[%s14465_s18 + $0x30] sm:$0xff] }
 0x3c8   : > { %v3022_v17 = vmul.f32 0.2, %v3018_v13  ;;  %vm3020_vm10 = vcmp.ge.f32.partialorder %v3018_v13, 0.0  ;;  %v3025_v19 = vsel %vm3021_vm9, %v3019_v10, %v3023_v15  ;;  %v12914_v10 = vld [vmem:[%s14465_s18 + $0x28] sm:$0xff]  ;;  %v12935_v15 = vld [vmem:[%s14465_s18 + $0x98] sm:$0xff] }
 0x3ca   : > { %v3024_v20 = vsel %vm3020_vm10, %v3018_v13, %v3022_v17  ;;  %v12921_v13 = vld [vmem:[%s14465_s18 + $0x20] sm:$0xff]  ;;  %v12944_v17 = vld [vmem:[%s14465_s18 + $0x10] sm:$0xff] }
 0x3cb   : > { %v3183_v21 = vadd.f32 %v3025_v19, %v3024_v20  ;;  %v12949_v19 = vld [vmem:[%s14465_s18 + $0x90] sm:$0xff] }
 0x455   : > { %v3099_v39 = vpop.f32.mrf.mxu1 }
 0x456   : > { %v3103_v40 = vsub.f32 0.0, %v3099_v39 }
 0x457   : > { %v10496_v41 = vpop.f32.mrf.mxu1 }
 0x458   : > { %v3104_v42 = vmul.f32 1.442695, %v3103_v40 }
 0x45a   : > { %11512 = vpow2.f32 %v3104_v42 }
 0x467   : > { %v11513_v45 = vpop.eup %11512 }
 0x468   : > { %v3106_v48 = vadd.f32 1.0, %v11513_v45 }
 0x46a   : > { %11514 = vrcp.f32 %v3106_v48  ;;  %v12840_v48 = vld [vmem:[%s14465_s18 + $0x78] sm:$0xff] }
 0x477   : > { %v11515_v14 = vpop.eup %11514 }
 0x478   : > { %10500 = vmatmul.mubr.msk.f32.vlgmr.msra.gmra.mxu0 %vm3109_vm8, %v11515_v14  ;;  %v12930_v14 = vld [vmem:[%s14465_s18 + $0x18] sm:$0xff] }
 0x479   : > { %10503 = vmatpush3.msra.mxu0 %v12518_v51  ;;  %10534 = vmatprep.mubr.msk.f32.mxu0 %vm11540_vm5, %v11539_v46  ;;  %v3184_v51 = vrot.slane %v3183_v21, 4 }
 0x47a   : > { %10504 = vmatprep.subr.mxu0 %v11539_v46 }
 0x47b   : > { %10505 = vmatpush3.msra.mxu0 %v12531_v4  ;;  %v3185_v4 = vadd.f32 %v3184_v51, %v3183_v21  ;;  %v12958_v21 = vld [vmem:[%s14465_s18 + $0x8] sm:$0xff] }
 0x47c   : > { %10506 = vmatprep.subr.mxu0 %v11539_v46  ;;  %v12963_v51 = vld [vmem:[%s14465_s18 + $0x88] sm:$0xff] }
 0x47d   : > { %10507 = vmatpush3.msra.mxu0 %v12541_v9  ;;  %v3186_v9 = vrot.slane %v3185_v4, 2 }
 0x47e   : > { %10508 = vmatprep.subr.mxu0 %v11539_v46 }
 0x47f   : > { %10509 = vmatpush3.msra.mxu0 %v12551_v12  ;;  %v3187_v12 = vadd.f32 %v3186_v9, %v3185_v4  ;;  %v12972_v9 = vld [vmem:[%s14465_s18] sm:$0xff] }
 0x480   : > { %10510 = vmatprep.subr.mxu0 %v11539_v46 }
 0x481   : > { %10511 = vmatpush3.msra.mxu0 %v12593_v25  ;;  %v3188_v25 = vrot.slane %v3187_v12, 1 }
 0x482   : > { %10512 = vmatprep.subr.mxu0 %v11539_v46 }
 0x483   : > { %10513 = vmatpush3.msra.mxu0 %v12600_v26  ;;  %v3189_v26 = vadd.f32 %v3188_v25, %v3187_v12  ;;  %v12977_v12 = vld [vmem:[%s14465_s18 + $0x80] sm:$0xff] }
 0x484   : > { %10514 = vmatprep.subr.mxu0 %v11539_v46 }
 0x485   : > { %10515 = vmatpush3.msra.mxu0 %v12608_v27  ;;  %v12735_v27 = vld [vmem:[%s14464_s17 + $0x8] sm:$0xff] }
 0x486   : > { %10516 = vmatprep.subr.mxu0 %v11539_v46 }
 0x487   : > { %10517 = vmatpush3.msra.mxu0 %v12616_v28  ;;  %v12744_v28 = vld [vmem:[%s14465_s18 + $0xf8] sm:$0xff] }
 0x488   : > { %10518 = vmatprep.subr.mxu0 %v11539_v46 }
 0x489   : > { %10519 = vmatpush3.msra.mxu0 %v12623_v29  ;;  %v12751_v29 = vld [vmem:[%s14465_s18 + $0xf0] sm:$0xff] }
 0x48a   : > { %10520 = vmatprep.subr.mxu0 %v11539_v46 }
 0x48b   : > { %10521 = vmatpush3.msra.mxu0 %v12630_v30  ;;  %v12758_v30 = vld [vmem:[%s14465_s18 + $0xe8] sm:$0xff] }
 0x48c   : > { %10522 = vmatprep.subr.mxu0 %v11539_v46 }
 0x48d   : > { %10523 = vmatpush3.msra.mxu0 %v12637_v31  ;;  %v12765_v31 = vld [vmem:[%s14465_s18 + $0xe0] sm:$0xff] }
 0x48e   : > { %10524 = vmatprep.subr.mxu0 %v11539_v46 }
 0x48f   : > { %10525 = vmatpush3.msra.mxu0 %v12643_v32  ;;  %v12772_v32 = vld [vmem:[%s14465_s18 + $0xd8] sm:$0xff] }
 0x490   : > { %10526 = vmatprep.subr.mxu0 %v11539_v46 }
 0x491   : > { %10527 = vmatpush3.msra.mxu0 %v12649_v33  ;;  %v12779_v33 = vld [vmem:[%s14465_s18 + $0xd0] sm:$0xff] }
 0x492   : > { %10528 = vmatprep.subr.mxu0 %v11539_v46 }
 0x493   : > { %10529 = vmatpush3.msra.mxu0 %v12660_v34  ;;  %v12786_v34 = vld [vmem:[%s14465_s18 + $0xc8] sm:$0xff] }
 0x494   : > { %10530 = vmatprep.subr.mxu0 %v11539_v46 }
 0x495   : > { %10531 = vmatpush3.msra.mxu0 %v12667_v35  ;;  %v12793_v35 = vld [vmem:[%s14465_s18 + $0xc0] sm:$0xff] }
 0x496   : > { %10532 = vmatprep.subr.mxu0 %v11539_v46 }
 0x497   : > { %10533 = vmatpush3.msra.mxu0 %v12674_v37  ;;  %v12800_v37 = vld [vmem:[%s14465_s18 + $0xb8] sm:$0xff] }
 0x498   : > { %10535 = vmatmul.mubr.f32.vlgmr.msra.gmra.mxu0 %v3189_v26  ;;  %10549 = vmatprep.subr.mxu0 %v11539_v46 }
 0x499   : > { %10550 = vmatpush3.msra.mxu0 %v12180_v54  ;;  %10553 = vmatprep.mubr.msk.f32.mxu0 %vm11540_vm5, %v11539_v46 }
 0x49a   : > { %10551 = vmatprep.subr.mxu0 %v11539_v46 }
 0x49b   : > { %10552 = vmatpush3.msra.mxu0 %v12184_v56 }
 0x49c   : > { %10591 = vmatprep.subr.mxu0 %v11539_v46  ;;  %10554 = vmatmul.mubr.msk.f32.vlgmr.msra.gmra.mxu0 %vm814_vm0, %v12735_v27 }
 0x49d   : > { %10623 = vmatprep.mubr.msk.f32.mxu0 %vm11540_vm5, %v11539_v46  ;;  %10592 = vmatpush3.msra.mxu0 %v12744_v28 }
 0x49e   : > { %10593 = vmatprep.subr.mxu0 %v11539_v46 }
 0x49f   : > { %10594 = vmatpush3.msra.mxu0 %v12751_v29 }
 0x4a0   : > { %10595 = vmatprep.subr.mxu0 %v11539_v46 }
 0x4a1   : > { %10596 = vmatpush3.msra.mxu0 %v12758_v30 }
 0x4a2   : > { %10597 = vmatprep.subr.mxu0 %v11539_v46 }
 0x4a3   : > { %10598 = vmatpush3.msra.mxu0 %v12765_v31 }
 0x4a4   : > { %10599 = vmatprep.subr.mxu0 %v11539_v46 }
 0x4a5   : > { %10600 = vmatpush3.msra.mxu0 %v12772_v32 }
 0x4a6   : > { %10601 = vmatprep.subr.mxu0 %v11539_v46 }
 0x4a7   : > { %10602 = vmatpush3.msra.mxu0 %v12779_v33 }
 0x4a8   : > { %10603 = vmatprep.subr.mxu0 %v11539_v46 }
 0x4a9   : > { %10604 = vmatpush3.msra.mxu0 %v12786_v34 }
 0x4aa   : > { %10605 = vmatprep.subr.mxu0 %v11539_v46 }
 0x4ab   : > { %10606 = vmatpush3.msra.mxu0 %v12793_v35 }
 0x4ac   : > { %10607 = vmatprep.subr.mxu0 %v11539_v46 }
 0x4ad   : > { %10608 = vmatpush3.msra.mxu0 %v12800_v37 }
 0x4ae   : > { %10609 = vmatprep.subr.mxu0 %v11539_v46 }
 0x4af   : > { %10610 = vmatpush3.msra.mxu0 %v12807_v8 }
 0x4b0   : > { %10611 = vmatprep.subr.mxu0 %v11539_v46 }
 0x4b1   : > { %10612 = vmatpush3.msra.mxu0 %v12814_v22 }
 0x4b2   : > { %10613 = vmatprep.subr.mxu0 %v11539_v46 }
 0x4b3   : > { %10614 = vmatpush3.msra.mxu0 %v12821_v11 }
 0x4b4   : > { %10615 = vmatprep.subr.mxu0 %v11539_v46 }
 0x4b5   : > { %10616 = vmatpush3.msra.mxu0 %v12935_v15 }
 0x4b6   : > { %10617 = vmatprep.subr.mxu0 %v11539_v46 }
 0x4b7   : > { %10618 = vmatpush3.msra.mxu0 %v12949_v19 }
 0x4b8   : > { %10619 = vmatprep.subr.mxu0 %v11539_v46 }
 0x4b9   : > { %10620 = vmatpush3.msra.mxu0 %v12963_v51 }
 0x4ba   : > { %10621 = vmatprep.subr.mxu0 %v11539_v46 }
 0x4bb   : > { %10622 = vmatpush3.msra.mxu0 %v12977_v12 }
 0x4bc   : > { %10631 = vmatprep.subr.mxu0 %v11539_v46 }
 0x538   : > { %v12825_v23 = vpop.f32.mrf.mxu0 }
 0x53a   : > { %v10501_v24 = vpop.f32.mrf.mxu0 }
 0x558   : > { %v3256_v39 = vpop.f32.mrf.mxu0 }
 0x559   : > { %v3260_v40 = vsub.f32 0.0, %v3256_v39 }
 0x55a   : > { %v10536_v41 = vpop.f32.mrf.mxu0 }
 0x55b   : > { %v3261_v42 = vmul.f32 1.442695, %v3260_v40 }
 0x55c   : > { %v3484_v20 = vpop.f32.mrf.mxu0 }
 0x55d   : > { %11516 = vpow2.f32 %v3261_v42 }
 0x55e   : > { %v10555_v4 = vpop.f32.mrf.mxu0 }
 0x56a   : > { %v11517_v43 = vpop.eup %11516 }
 0x56b   : > { %v3263_v44 = vadd.f32 1.0, %v11517_v43 }
 0x56d   : > { %11518 = vrcp.f32 %v3263_v44  ;;  %v12994_v44 = vld [vmem:[%s14421_s19] sm:$0xf] }
 0x57a   : > { %v11519_v45 = vpop.eup %11518 }
 0x57b   : > { %10540 = vmatmul.mubr.msk.f32.vlgmr.msra.gmra.mxu1 %vm3109_vm8, %v11519_v45  ;;  %v12999_v45 = vld [vmem:[%s14421_s19 + $0x4] sm:$0xf] }
 0x57c   : > { %10543 = vmatpush3.msra.mxu1 %v12180_v54  ;;  %10546 = vmatprep.mubr.msk.f32.mxu1 %vm11540_vm5, %v11539_v46  ;;  %v12849_v54 = vld [vmem:[%s14465_s18 + $0x70] sm:$0xff] }
 0x57d   : > { %10544 = vmatprep.subr.mxu1 %v11539_v46 }
 0x57e   : > { %10545 = vmatpush3.msra.mxu1 %v12184_v56  ;;  %v12858_v56 = vld [vmem:[%s14465_s18 + $0x68] sm:$0xff] }
 0x57f   : > { %10547 = vmatmul.mubr.msk.f32.vlgmr.msra.gmra.mxu1 %vm814_vm0, %v12834_v47  ;;  %10556 = vmatprep.subr.mxu1 %v11539_v46 }
 0x580   : > { %10557 = vmatpush3.msra.mxu1 %v12840_v48  ;;  %10588 = vmatprep.mubr.msk.f32.mxu1 %vm11540_vm5, %v11539_v46 }
 0x581   : > { %10558 = vmatprep.subr.mxu1 %v11539_v46 }
 0x582   : > { %10559 = vmatpush3.msra.mxu1 %v12849_v54 }
 0x583   : > { %10560 = vmatprep.subr.mxu1 %v11539_v46 }
 0x584   : > { %10561 = vmatpush3.msra.mxu1 %v12858_v56 }
 0x585   : > { %10562 = vmatprep.subr.mxu1 %v11539_v46 }
 0x586   : > { %10563 = vmatpush3.msra.mxu1 %v12865_v49 }
 0x587   : > { %10564 = vmatprep.subr.mxu1 %v11539_v46 }
 0x588   : > { %10565 = vmatpush3.msra.mxu1 %v12872_v50 }
 0x589   : > { %10566 = vmatprep.subr.mxu1 %v11539_v46 }
 0x58a   : > { %10567 = vmatpush3.msra.mxu1 %v12879_v52 }
 0x58b   : > { %10568 = vmatprep.subr.mxu1 %v11539_v46 }
 0x58c   : > { %10569 = vmatpush3.msra.mxu1 %v12886_v53 }
 0x58d   : > { %10570 = vmatprep.subr.mxu1 %v11539_v46 }
 0x58e   : > { %10571 = vmatpush3.msra.mxu1 %v12893_v63 }
 0x58f   : > { %10572 = vmatprep.subr.mxu1 %v11539_v46 }
 0x590   : > { %10573 = vmatpush3.msra.mxu1 %v12900_v2 }
 0x591   : > { %10574 = vmatprep.subr.mxu1 %v11539_v46 }
 0x592   : > { %10575 = vmatpush3.msra.mxu1 %v12907_v7 }
 0x593   : > { %10576 = vmatprep.subr.mxu1 %v11539_v46 }
 0x594   : > { %10577 = vmatpush3.msra.mxu1 %v12914_v10 }
 0x595   : > { %10578 = vmatprep.subr.mxu1 %v11539_v46 }
 0x596   : > { %10579 = vmatpush3.msra.mxu1 %v12921_v13 }
 0x597   : > { %10580 = vmatprep.subr.mxu1 %v11539_v46 }
 0x598   : > { %10581 = vmatpush3.msra.mxu1 %v12930_v14 }
 0x599   : > { %10582 = vmatprep.subr.mxu1 %v11539_v46 }
 0x59a   : > { %10583 = vmatpush3.msra.mxu1 %v12944_v17 }
 0x59b   : > { %10584 = vmatprep.subr.mxu1 %v11539_v46 }
 0x59c   : > { %10585 = vmatpush3.msra.mxu1 %v12958_v21 }
 0x59d   : > { %10586 = vmatprep.subr.mxu1 %v11539_v46 }
 0x59e   : > { %10587 = vmatpush3.msra.mxu1 %v12972_v9 }
 0x59f   : > { %10626 = vmatprep.subr.mxu1 %v11539_v46 }
 0x63b   : > { %v12983_v25 = vpop.f32.mrf.mxu1 }
 0x63d   : > { %v10541_v26 = vpop.f32.mrf.mxu1 }
 0x63e   : > { %v13006_v26 = vld [vmem:[%s14422_s20 + $0x38] sm:$0xff] }
 0x63f   : > { %v3409_v24 = vpop.f32.mrf.mxu1 }
 0x640   : > { %v3488_v39 = vmax.f32 %v3409_v24, %v3484_v20  ;;  %v13017_v24 = vld [vmem:[%s14422_s20 + $0x30] sm:$0xff] }
 0x641   : > { %v10548_v40 = vpop.f32.mrf.mxu1 }
 0x642   : > { %10589 = vmatmul.mubr.f32.vlgmr.msra.gmra.mxu1 %v3488_v39  ;;  %10624 = vmatmul.mubr.f32.vlgmr.msra.gmra.mxu0 %v3488_v39  ;;  %v13026_v39 = vld [vmem:[%s14422_s20 + $0x28] sm:$0xff]  ;;  %v13034_v40 = vld [vmem:[%s14422_s20 + $0x20] sm:$0xff] }
 0x643   : > { %10628 = vmatprep.mubr.msk.f32.mxu1 %vm11540_vm5, %v11539_v46  ;;  %10633 = vmatprep.mubr.msk.f32.mxu0 %vm11540_vm5, %v11539_v46 }
 0x702   : > { %v3571_v41 = vpop.f32.mrf.mxu1  ;;  %v3658_v42 = vpop.f32.mrf.mxu0 }
 0x703   : > { %v12989_v43 = vmax.f32 %v3571_v41, %v3658_v42  ;;  %v13045_v41 = vld [vmem:[%s14422_s20 + $0x18] sm:$0xff]  ;;  %v13055_v42 = vld [vmem:[%s14422_s20 + $0x10] sm:$0xff] }
 0x704   : > { %v10590_v20 = vpop.f32.mrf.mxu1  ;;  %v10625_v4 = vpop.f32.mrf.mxu0 }
 0x705   : > { %10627 = vmatpush3.msra.mxu1 %v12989_v43  ;;  %10632 = vmatpush3.msra.mxu0 %v12989_v43  ;;  %v4596_v4 = vld [vmem:[%s14466_s4 + $0x70] sm:$0xff] }
 0x706   : > { %10629 = vmatmul.mubr.msk.f32.vlgmr.msra.gmra.mxu1 %vm3109_vm8, %v12994_v44  ;;  %10634 = vmatmul.mubr.msk.f32.vlgmr.msra.gmra.mxu0 %vm3109_vm8, %v12999_v45 }
 0x707   : > { %10681 = vmatprep.subr.mxu0 %v11539_v46  ;;  %10636 = vmatprep.subr.mxu1 %v11539_v46 }
 0x708   : > { %10682 = vmatpush3.msra.mxu0 %v12210_v16  ;;  %10637 = vmatpush3.msra.mxu1 %v13006_v26 }
 0x709   : > { %10683 = vmatprep.subr.mxu0 %v11539_v46  ;;  %10638 = vmatprep.subr.mxu1 %v11539_v46 }
 0x70a   : > { %10684 = vmatpush3.msra.mxu0 %v12214_v18  ;;  %10639 = vmatpush3.msra.mxu1 %v13017_v24 }
 0x70b   : > { %10640 = vmatprep.subr.mxu1 %v11539_v46  ;;  %10652 = vmatprep.mubr.msk.f32.mxu1 %vm11540_vm5, %v11539_v46 }
 0x70c   : > { %10641 = vmatpush3.msra.mxu1 %v13026_v39  ;;  %10685 = vmatprep.mubr.msk.f32.mxu0 %vm11540_vm5, %v11539_v46 }
 0x70d   : > { %10642 = vmatprep.subr.mxu1 %v11539_v46  ;;  %10686 = vmatmul.mubr.msk.f32.vlgmr.msra.gmra.mxu0 %vm814_vm0, %v12735_v27  ;;  %v13064_v27 = vld [vmem:[%s14422_s20 + $0x8] sm:$0xff] }
 0x70e   : > { %10643 = vmatpush3.msra.mxu1 %v13034_v40  ;;  %10723 = vmatprep.subr.mxu0 %v11539_v46 }
 0x70f   : > { %10644 = vmatprep.subr.mxu1 %v11539_v46  ;;  %10724 = vmatpush3.msra.mxu0 %v12744_v28  ;;  %v13105_v28 = vld [vmem:[%s14422_s20] sm:$0xff] }
 0x710   : > { %10645 = vmatpush3.msra.mxu1 %v13045_v41  ;;  %10725 = vmatprep.subr.mxu0 %v11539_v46 }
 0x711   : > { %10646 = vmatprep.subr.mxu1 %v11539_v46  ;;  %10726 = vmatpush3.msra.mxu0 %v12751_v29 }
 0x712   : > { %10647 = vmatpush3.msra.mxu1 %v13055_v42  ;;  %10727 = vmatprep.subr.mxu0 %v11539_v46 }
 0x713   : > { %10648 = vmatprep.subr.mxu1 %v11539_v46  ;;  %10728 = vmatpush3.msra.mxu0 %v12758_v30 }
 0x714   : > { %10649 = vmatpush3.msra.mxu1 %v13064_v27  ;;  %10729 = vmatprep.subr.mxu0 %v11539_v46 }
 0x715   : > { %10650 = vmatprep.subr.mxu1 %v11539_v46  ;;  %10730 = vmatpush3.msra.mxu0 %v12765_v31 }
 0x716   : > { %10731 = vmatprep.subr.mxu0 %v11539_v46  ;;  %10755 = vmatprep.mubr.msk.f32.mxu0 %vm11540_vm5, %v11539_v46 }
 0x717   : > { %10732 = vmatpush3.msra.mxu0 %v12772_v32  ;;  %10651 = vmatpush3.msra.mxu1 %v13105_v28  ;;  %v13112_v32 = vld [vmem:[%s14422_s20 + $0x78] sm:$0xff] }
 0x718   : > { %10733 = vmatprep.subr.mxu0 %v11539_v46  ;;  %10655 = vmatprep.subr.mxu1 %v11539_v46 }
 0x719   : > { %10734 = vmatpush3.msra.mxu0 %v12779_v33 }
 0x71a   : > { %10735 = vmatprep.subr.mxu0 %v11539_v46 }
 0x71b   : > { %10736 = vmatpush3.msra.mxu0 %v12786_v34 }
 0x71c   : > { %10737 = vmatprep.subr.mxu0 %v11539_v46 }
 0x71d   : > { %10738 = vmatpush3.msra.mxu0 %v12793_v35  ;;  %v13118_v35 = vld [vmem:[%s14422_s20 + $0x70] sm:$0xff] }
 0x71e   : > { %10739 = vmatprep.subr.mxu0 %v11539_v46 }
 0x71f   : > { %10740 = vmatpush3.msra.mxu0 %v12800_v37  ;;  %v13127_v37 = vld [vmem:[%s14422_s20 + $0x68] sm:$0xff] }
 0x720   : > { %10741 = vmatprep.subr.mxu0 %v11539_v46 }
 0x721   : > { %10742 = vmatpush3.msra.mxu0 %v12807_v8  ;;  %v13134_v8 = vld [vmem:[%s14422_s20 + $0x60] sm:$0xff] }
 0x722   : > { %10743 = vmatprep.subr.mxu0 %v11539_v46 }
 0x723   : > { %10744 = vmatpush3.msra.mxu0 %v12814_v22  ;;  %v13141_v22 = vld [vmem:[%s14422_s20 + $0x58] sm:$0xff] }
 0x724   : > { %10745 = vmatprep.subr.mxu0 %v11539_v46 }
 0x725   : > { %10746 = vmatpush3.msra.mxu0 %v12821_v11  ;;  %v13148_v11 = vld [vmem:[%s14422_s20 + $0x50] sm:$0xff] }
 0x726   : > { %10747 = vmatprep.subr.mxu0 %v11539_v46 }
 0x727   : > { %10748 = vmatpush3.msra.mxu0 %v12935_v15  ;;  %v13155_v15 = vld [vmem:[%s14422_s20 + $0x48] sm:$0xff] }
 0x728   : > { %10749 = vmatprep.subr.mxu0 %v11539_v46 }
 0x729   : > { %10750 = vmatpush3.msra.mxu0 %v12949_v19  ;;  %v13162_v19 = vld [vmem:[%s14422_s20 + $0x40] sm:$0xff] }
 0x72a   : > { %10751 = vmatprep.subr.mxu0 %v11539_v46 }
 0x72b   : > { %10752 = vmatpush3.msra.mxu0 %v12963_v51  ;;  %v13277_v51 = vrot.slane %v12825_v23, %v12171_v38 }
 0x72c   : > { %10753 = vmatprep.subr.mxu0 %v11539_v46 }
 0x72d   : > { %10754 = vmatpush3.msra.mxu0 %v12977_v12  ;;  %v4554_v23 = vmul.f32 %v13277_v51, %v12344_v61  ;;  %v4578_v61 = vld [vmem:[%s14467_s10 + $0x60] sm:$0xff] }
 0x72e   : > { %10763 = vmatprep.subr.mxu0 %v11539_v46 }
 0x7c6   : > { %v3733_v29 = vpop.f32.mrf.mxu1  ;;  %v3808_v30 = vpop.f32.mrf.mxu0 }
 0x7c7   : > { %v3812_v31 = vmax.f32 %v3733_v29, %v3808_v30  ;;  %v4590_v29 = vld [vmem:[%s14466_s4 + $0x40] sm:$0xff] }
 0x7c8   : > { %v10630_v33 = vpop.f32.mrf.mxu1  ;;  %v10635_v34 = vpop.f32.mrf.mxu0  ;;  %v4574_v30 = vld [vmem:[%s14467_s10 + $0x40] sm:$0xff] }
 0x7c9   : > { %10653 = vmatmul.mubr.msk.f32.vlgmr.msra.gmra.mxu1 %vm3821_vm11, %v3812_v31  ;;  %v4588_v33 = vld [vmem:[%s14466_s4 + $0x30] sm:$0xff] }
 0x7ca   : > { %10656 = vmatpush3.msra.mxu1 %v13112_v32  ;;  %10671 = vmatprep.mubr.msk.f32.mxu1 %vm11540_vm5, %v11539_v46  ;;  %v4572_v34 = vld [vmem:[%s14467_s10 + $0x30] sm:$0xff] }
 0x7cb   : > { %10657 = vmatprep.subr.mxu1 %v11539_v46 }
 0x7cc   : > { %10658 = vmatpush3.msra.mxu1 %v13118_v35 }
 0x7cd   : > { %10659 = vmatprep.subr.mxu1 %v11539_v46 }
 0x7ce   : > { %10660 = vmatpush3.msra.mxu1 %v13127_v37 }
 0x7cf   : > { %10661 = vmatprep.subr.mxu1 %v11539_v46 }
 0x7d0   : > { %10662 = vmatpush3.msra.mxu1 %v13134_v8 }
 0x7d1   : > { %10663 = vmatprep.subr.mxu1 %v11539_v46 }
 0x7d2   : > { %10664 = vmatpush3.msra.mxu1 %v13141_v22 }
 0x7d3   : > { %10665 = vmatprep.subr.mxu1 %v11539_v46 }
 0x7d4   : > { %10666 = vmatpush3.msra.mxu1 %v13148_v11 }
 0x7d5   : > { %10667 = vmatprep.subr.mxu1 %v11539_v46 }
 0x7d6   : > { %10668 = vmatpush3.msra.mxu1 %v13155_v15 }
 0x7d7   : > { %10669 = vmatprep.subr.mxu1 %v11539_v46 }
 0x7d8   : > { %10670 = vmatpush3.msra.mxu1 %v13162_v19 }
 0x7d9   : > { %10672 = vmatmul.mubr.msk.f32.vlgmr.msra.gmra.mxu1 %vm3821_vm11, %v3812_v31  ;;  %10674 = vmatprep.subr.mxu1 %v11539_v46  ;;  %v4589_v31 = vld [vmem:[%s14466_s4 + $0x38] sm:$0xff] }
 0x7da   : > { %10675 = vmatpush3.msra.mxu1 %v12210_v16  ;;  %10678 = vmatprep.mubr.msk.f32.mxu1 %vm11540_vm5, %v11539_v46  ;;  %v4111_v16 = vpop.f32.mrf.mxu0 }
 0x7db   : > { %10676 = vmatprep.subr.mxu1 %v11539_v46 }
 0x7dc   : > { %10677 = vmatpush3.msra.mxu1 %v12214_v18  ;;  %v10687_v18 = vpop.f32.mrf.mxu0 }
 0x7dd   : > { %10679 = vmatmul.mubr.msk.f32.vlgmr.msra.gmra.mxu1 %vm814_vm0, %v12834_v47  ;;  %10688 = vmatprep.subr.mxu1 %v11539_v46  ;;  %v4583_v18 = vld [vmem:[%s14466_s4 + $0x8] sm:$0xff] }
 0x7de   : > { %10689 = vmatpush3.msra.mxu1 %v12840_v48  ;;  %10720 = vmatprep.mubr.msk.f32.mxu1 %vm11540_vm5, %v11539_v46 }
 0x7df   : > { %10690 = vmatprep.subr.mxu1 %v11539_v46 }
 0x7e0   : > { %10691 = vmatpush3.msra.mxu1 %v12849_v54 }
 0x7e1   : > { %10692 = vmatprep.subr.mxu1 %v11539_v46 }
 0x7e2   : > { %10693 = vmatpush3.msra.mxu1 %v12858_v56 }
 0x7e3   : > { %10694 = vmatprep.subr.mxu1 %v11539_v46 }
 0x7e4   : > { %10695 = vmatpush3.msra.mxu1 %v12865_v49 }
 0x7e5   : > { %10696 = vmatprep.subr.mxu1 %v11539_v46 }
 0x7e6   : > { %10697 = vmatpush3.msra.mxu1 %v12872_v50 }
 0x7e7   : > { %10698 = vmatprep.subr.mxu1 %v11539_v46 }
 0x7e8   : > { %10699 = vmatpush3.msra.mxu1 %v12879_v52 }
 0x7e9   : > { %10700 = vmatprep.subr.mxu1 %v11539_v46 }
 0x7ea   : > { %10701 = vmatpush3.msra.mxu1 %v12886_v53 }
 0x7eb   : > { %10702 = vmatprep.subr.mxu1 %v11539_v46 }
 0x7ec   : > { %10703 = vmatpush3.msra.mxu1 %v12893_v63 }
 0x7ed   : > { %10704 = vmatprep.subr.mxu1 %v11539_v46 }
 0x7ee   : > { %10705 = vmatpush3.msra.mxu1 %v12900_v2 }
 0x7ef   : > { %10706 = vmatprep.subr.mxu1 %v11539_v46 }
 0x7f0   : > { %10707 = vmatpush3.msra.mxu1 %v12907_v7 }
 0x7f1   : > { %10708 = vmatprep.subr.mxu1 %v11539_v46 }
 0x7f2   : > { %10709 = vmatpush3.msra.mxu1 %v12914_v10 }
 0x7f3   : > { %10710 = vmatprep.subr.mxu1 %v11539_v46 }
 0x7f4   : > { %10711 = vmatpush3.msra.mxu1 %v12921_v13 }
 0x7f5   : > { %10712 = vmatprep.subr.mxu1 %v11539_v46 }
 0x7f6   : > { %10713 = vmatpush3.msra.mxu1 %v12930_v14  ;;  %v4597_v14 = vld [vmem:[%s14466_s4 + $0x78] sm:$0xff] }
 0x7f7   : > { %10714 = vmatprep.subr.mxu1 %v11539_v46 }
 0x7f8   : > { %10715 = vmatpush3.msra.mxu1 %v12944_v17  ;;  %v4581_v17 = vld [vmem:[%s14467_s10 + $0x78] sm:$0xff] }
 0x7f9   : > { %10716 = vmatprep.subr.mxu1 %v11539_v46 }
 0x7fa   : > { %10717 = vmatpush3.msra.mxu1 %v12958_v21  ;;  %v13273_v21 = vrot.slane %v12983_v25, %v12171_v38  ;;  %v4580_v38 = vld [vmem:[%s14467_s10 + $0x70] sm:$0xff] }
 0x7fb   : > { %10718 = vmatprep.subr.mxu1 %v11539_v46 }
 0x7fc   : > { %10719 = vmatpush3.msra.mxu1 %v12972_v9  ;;  %v4560_v25 = vmul.f32 %v13273_v21, %v12503_v58  ;;  %v4594_v58 = vld [vmem:[%s14466_s4 + $0x60] sm:$0xff] }
 0x7fd   : > { %10758 = vmatprep.subr.mxu1 %v11539_v46 }
 0x889   : > { %v13211_v47 = vpop.f32.mrf.mxu1 }
 0x88b   : > { %v10654_v48 = vpop.f32.mrf.mxu1 }
 0x88c   : > { %v4567_v48 = vld [vmem:[%s14467_s10 + $0x8] sm:$0xff] }
 0x899   : > { %v13213_v54 = vpop.f32.mrf.mxu1 }
 0x89a   : > { %v3974_v56 = vmax.f32 %v13211_v47, %v13213_v54  ;;  %v8954_v47 = vld [vmem:[%s14470_s7 + $0x4] sm:$0xf] }
 0x89b   : > { %v10673_v49 = vpop.f32.mrf.mxu1 }
 0x89c   : > { %v4582_v49 = vld [vmem:[%s14466_s4] sm:$0xff] }
 0x89d   : > { %v4041_v50 = vpop.f32.mrf.mxu1 }
 0x89e   : > { %v4115_v52 = vmax.f32 %v4041_v50, %v4111_v16  ;;  %v4568_v16 = vld [vmem:[%s14467_s10 + $0x10] sm:$0xff]  ;;  %v4566_v50 = vld [vmem:[%s14467_s10] sm:$0xff] }
 0x89f   : > { %v10680_v53 = vpop.f32.mrf.mxu1 }
 0x8a0   : > { %10721 = vmatmul.mubr.f32.vlgmr.msra.gmra.mxu1 %v4115_v52  ;;  %10756 = vmatmul.mubr.f32.vlgmr.msra.gmra.mxu0 %v4115_v52  ;;  %v4561_v52 = vmul.f32 %v12499_v55, %v13273_v21  ;;  %v4555_v53 = vmul.f32 %v12340_v60, %v13277_v51  ;;  %v4556_v60 = vmul.f32 %v13277_v51, %v12346_v62  ;;  %v8872_v55 = vld [vmem:[%s14466_s4 + $0xf0] sm:$0xff]  ;;  %v8855_v62 = vld [vmem:[%s14467_s10 + $0xe8] sm:$0xff] }
 0x8a1   : > { %10760 = vmatprep.mubr.msk.f32.mxu1 %vm11540_vm5, %v11539_v46  ;;  %10765 = vmatprep.mubr.msk.f32.mxu0 %vm11540_vm5, %v11539_v46 }
 0x960   : > { %v4182_v63 = vpop.f32.mrf.mxu1  ;;  %v4252_v2 = vpop.f32.mrf.mxu0 }
 0x961   : > { %v13221_v7 = vmax.f32 %v4182_v63, %v4252_v2  ;;  %v8873_v63 = vld [vmem:[%s14466_s4 + $0xf8] sm:$0xff] }
 0x962   : > { %v10722_v10 = vpop.f32.mrf.mxu1  ;;  %v10757_v13 = vpop.f32.mrf.mxu0  ;;  %v8857_v2 = vld [vmem:[%s14467_s10 + $0xf8] sm:$0xff] }
 0x963   : > { %10759 = vmatpush3.msra.mxu1 %v13221_v7  ;;  %10764 = vmatpush3.msra.mxu0 %v13221_v7  ;;  %v4562_v10 = vmul.f32 %v13273_v21, %v12505_v59  ;;  %v8856_v13 = vld [vmem:[%s14467_s10 + $0xf0] sm:$0xff]  ;;  %v8871_v59 = vld [vmem:[%s14466_s4 + $0xe8] sm:$0xff] }
 0x964   : > { %10761 = vmatmul.mubr.msk.f32.vlgmr.msra.gmra.mxu1 %vm3109_vm8, %v12994_v44  ;;  %10766 = vmatmul.mubr.msk.f32.vlgmr.msra.gmra.mxu0 %vm3109_vm8, %v12999_v45 }
 0x965   : > { %10768 = vmatprep.subr.mxu1 %v11539_v46  ;;  %10787 = vmatprep.subr.mxu0 %v11539_v46 }
 0x966   : > { %10769 = vmatpush3.msra.mxu1 %v13006_v26  ;;  %10788 = vmatpush3.msra.mxu0 %v13112_v32  ;;  %v4595_v26 = vld [vmem:[%s14466_s4 + $0x68] sm:$0xff]  ;;  %v4573_v32 = vld [vmem:[%s14467_s10 + $0x38] sm:$0xff] }
 0x967   : > { %10770 = vmatprep.subr.mxu1 %v11539_v46  ;;  %10789 = vmatprep.subr.mxu0 %v11539_v46 }
 0x968   : > { %10771 = vmatpush3.msra.mxu1 %v13017_v24  ;;  %10790 = vmatpush3.msra.mxu0 %v13118_v35  ;;  %v4579_v24 = vld [vmem:[%s14467_s10 + $0x68] sm:$0xff] }
 0x969   : > { %10772 = vmatprep.subr.mxu1 %v11539_v46  ;;  %10791 = vmatprep.subr.mxu0 %v11539_v46  ;;  %v4587_v35 = vld [vmem:[%s14466_s4 + $0x28] sm:$0xff] }
 0x96a   : > { %10773 = vmatpush3.msra.mxu1 %v13026_v39  ;;  %10792 = vmatpush3.msra.mxu0 %v13127_v37  ;;  %v4593_v39 = vld [vmem:[%s14466_s4 + $0x58] sm:$0xff]  ;;  %v4571_v37 = vld [vmem:[%s14467_s10 + $0x28] sm:$0xff] }
 0x96b   : > { %10774 = vmatprep.subr.mxu1 %v11539_v46  ;;  %10793 = vmatprep.subr.mxu0 %v11539_v46 }
 0x96c   : > { %10775 = vmatpush3.msra.mxu1 %v13034_v40  ;;  %10794 = vmatpush3.msra.mxu0 %v13134_v8  ;;  %v4577_v40 = vld [vmem:[%s14467_s10 + $0x58] sm:$0xff]  ;;  %v4586_v8 = vld [vmem:[%s14466_s4 + $0x20] sm:$0xff] }
 0x96d   : > { %10776 = vmatprep.subr.mxu1 %v11539_v46  ;;  %10795 = vmatprep.subr.mxu0 %v11539_v46 }
 0x96e   : > { %10777 = vmatpush3.msra.mxu1 %v13045_v41  ;;  %10796 = vmatpush3.msra.mxu0 %v13141_v22  ;;  %v4592_v41 = vld [vmem:[%s14466_s4 + $0x50] sm:$0xff]  ;;  %v4570_v22 = vld [vmem:[%s14467_s10 + $0x20] sm:$0xff] }
 0x96f   : > { %10778 = vmatprep.subr.mxu1 %v11539_v46  ;;  %10797 = vmatprep.subr.mxu0 %v11539_v46 }
 0x970   : > { %10779 = vmatpush3.msra.mxu1 %v13055_v42  ;;  %10798 = vmatpush3.msra.mxu0 %v13148_v11  ;;  %v4576_v42 = vld [vmem:[%s14467_s10 + $0x50] sm:$0xff]  ;;  %v4585_v11 = vld [vmem:[%s14466_s4 + $0x18] sm:$0xff] }
 0x971   : > { %10780 = vmatprep.subr.mxu1 %v11539_v46  ;;  %10799 = vmatprep.subr.mxu0 %v11539_v46 }
 0x972   : > { %10781 = vmatpush3.msra.mxu1 %v13064_v27  ;;  %10800 = vmatpush3.msra.mxu0 %v13155_v15  ;;  %v4591_v27 = vld [vmem:[%s14466_s4 + $0x48] sm:$0xff]  ;;  %v4569_v15 = vld [vmem:[%s14467_s10 + $0x18] sm:$0xff] }
 0x973   : > { %10782 = vmatprep.subr.mxu1 %v11539_v46  ;;  %10801 = vmatprep.subr.mxu0 %v11539_v46 }
 0x974   : > { %10783 = vmatpush3.msra.mxu1 %v13105_v28  ;;  %10802 = vmatpush3.msra.mxu0 %v13162_v19  ;;  %v4575_v28 = vld [vmem:[%s14467_s10 + $0x48] sm:$0xff]  ;;  %v4584_v19 = vld [vmem:[%s14466_s4 + $0x10] sm:$0xff] }
 0x975   : > { %10784 = vmatprep.mubr.msk.f32.mxu1 %vm11540_vm5, %v11539_v46  ;;  %10803 = vmatprep.mubr.msk.f32.mxu0 %vm11540_vm5, %v11539_v46 }
 0x976   : > { %10806 = vmatprep.subr.mxu1 %v4597_v14  ;;  %10841 = vmatprep.subr.mxu0 %v4581_v17 }
 0xa24   : > { %v4323_v9 = vpop.f32.mrf.mxu1  ;;  %v4393_v12 = vpop.f32.mrf.mxu0 }
 0xa25   : > { %v4397_v44 = vmax.f32 %v4323_v9, %v4393_v12  ;;  %v8869_v9 = vld [vmem:[%s14466_s4 + $0xd8] sm:$0xff] }
 0xa26   : > { %v10762_v45 = vpop.f32.mrf.mxu1  ;;  %v10767_v20 = vpop.f32.mrf.mxu0  ;;  %v8853_v12 = vld [vmem:[%s14467_s10 + $0xd8] sm:$0xff] }
 0xa27   : > { %10785 = vmatmul.mubr.msk.f32.vlgmr.msra.gmra.mxu1 %vm3821_vm11, %v4397_v44  ;;  %10804 = vmatmul.mubr.msk.f32.vlgmr.msra.gmra.mxu0 %vm3821_vm11, %v4397_v44  ;;  %v8868_v44 = vld [vmem:[%s14466_s4 + $0xd0] sm:$0xff]  ;;  %v8867_v20 = vld [vmem:[%s14466_s4 + $0xc8] sm:$0xff] }
 0xa28   : > { %10807 = vmatpush3.msra.mxu1 %v4597_v14  ;;  %10842 = vmatpush3.msra.mxu0 %v4581_v17  ;;  %v8870_v14 = vld [vmem:[%s14466_s4 + $0xe0] sm:$0xff]  ;;  %v8852_v45 = vld [vmem:[%s14467_s10 + $0xd0] sm:$0xff] }
 0xa29   : > { %10808 = vmatprep.subr.mxu1 %v4596_v4  ;;  %10838 = vmatprep.mubr.f32.mxu1 %v4560_v25  ;;  %v8854_v17 = vld [vmem:[%s14467_s10 + $0xe0] sm:$0xff] }
 0xa2a   : > { %10843 = vmatprep.subr.mxu0 %v4580_v38  ;;  %10873 = vmatprep.mubr.f32.mxu0 %v4554_v23  ;;  %v8866_v25 = vld [vmem:[%s14466_s4 + $0xc0] sm:$0xff]  ;;  %v8865_v23 = vld [vmem:[%s14466_s4 + $0xb8] sm:$0xff] }
 0xa2b   : > { %10809 = vmatpush3.msra.mxu1 %v4596_v4  ;;  %10844 = vmatpush3.msra.mxu0 %v4580_v38  ;;  %v8851_v4 = vld [vmem:[%s14467_s10 + $0xc8] sm:$0xff]  ;;  %v8850_v38 = vld [vmem:[%s14467_s10 + $0xc0] sm:$0xff] }
 0xa2c   : > { %10810 = vmatprep.subr.mxu1 %v4595_v26  ;;  %10845 = vmatprep.subr.mxu0 %v4579_v24 }
 0xa2d   : > { %10811 = vmatpush3.msra.mxu1 %v4595_v26  ;;  %10846 = vmatpush3.msra.mxu0 %v4579_v24  ;;  %v8849_v26 = vld [vmem:[%s14467_s10 + $0xb8] sm:$0xff]  ;;  %v8864_v24 = vld [vmem:[%s14466_s4 + $0xb0] sm:$0xff] }
 0xa2e   : > { %10812 = vmatprep.subr.mxu1 %v4594_v58  ;;  %10847 = vmatprep.subr.mxu0 %v4578_v61 }
 0xa2f   : > { %10813 = vmatpush3.msra.mxu1 %v4594_v58  ;;  %10848 = vmatpush3.msra.mxu0 %v4578_v61  ;;  %v8848_v58 = vld [vmem:[%s14467_s10 + $0xb0] sm:$0xff]  ;;  %v8863_v61 = vld [vmem:[%s14466_s4 + $0xa8] sm:$0xff] }
 0xa30   : > { %10814 = vmatprep.subr.mxu1 %v4593_v39  ;;  %10849 = vmatprep.subr.mxu0 %v4577_v40 }
 0xa31   : > { %10815 = vmatpush3.msra.mxu1 %v4593_v39  ;;  %10850 = vmatpush3.msra.mxu0 %v4577_v40  ;;  %v8847_v39 = vld [vmem:[%s14467_s10 + $0xa8] sm:$0xff]  ;;  %v8862_v40 = vld [vmem:[%s14466_s4 + $0xa0] sm:$0xff] }
 0xa32   : > { %10816 = vmatprep.subr.mxu1 %v4592_v41  ;;  %10851 = vmatprep.subr.mxu0 %v4576_v42 }
 0xa33   : > { %10817 = vmatpush3.msra.mxu1 %v4592_v41  ;;  %10852 = vmatpush3.msra.mxu0 %v4576_v42  ;;  %v8846_v41 = vld [vmem:[%s14467_s10 + $0xa0] sm:$0xff]  ;;  %v8861_v42 = vld [vmem:[%s14466_s4 + $0x98] sm:$0xff] }
 0xa34   : > { %10818 = vmatprep.subr.mxu1 %v4591_v27  ;;  %10853 = vmatprep.subr.mxu0 %v4575_v28 }
 0xa35   : > { %10819 = vmatpush3.msra.mxu1 %v4591_v27  ;;  %10854 = vmatpush3.msra.mxu0 %v4575_v28  ;;  %v8845_v27 = vld [vmem:[%s14467_s10 + $0x98] sm:$0xff]  ;;  %v8860_v28 = vld [vmem:[%s14466_s4 + $0x90] sm:$0xff] }
 0xa36   : > { %10820 = vmatprep.subr.mxu1 %v4590_v29  ;;  %10855 = vmatprep.subr.mxu0 %v4574_v30 }
 0xa37   : > { %10821 = vmatpush3.msra.mxu1 %v4590_v29  ;;  %10856 = vmatpush3.msra.mxu0 %v4574_v30  ;;  %v8844_v29 = vld [vmem:[%s14467_s10 + $0x90] sm:$0xff]  ;;  %v8859_v30 = vld [vmem:[%s14466_s4 + $0x88] sm:$0xff] }
 0xa38   : > { %10822 = vmatprep.subr.mxu1 %v4589_v31  ;;  %10857 = vmatprep.subr.mxu0 %v4573_v32 }
 0xa39   : > { %10823 = vmatpush3.msra.mxu1 %v4589_v31  ;;  %10858 = vmatpush3.msra.mxu0 %v4573_v32  ;;  %v8843_v31 = vld [vmem:[%s14467_s10 + $0x88] sm:$0xff]  ;;  %v8858_v32 = vld [vmem:[%s14466_s4 + $0x80] sm:$0xff] }
 0xa3a   : > { %10824 = vmatprep.subr.mxu1 %v4588_v33  ;;  %10859 = vmatprep.subr.mxu0 %v4572_v34 }
 0xa3b   : > { %10825 = vmatpush3.msra.mxu1 %v4588_v33  ;;  %10860 = vmatpush3.msra.mxu0 %v4572_v34  ;;  %v8842_v33 = vld [vmem:[%s14467_s10 + $0x80] sm:$0xff]  ;;  %v4563_v34 = vmul.f32 %v12501_v57, %v13273_v21  ;;  %v8904_v57 = vld [vmem:[%s14466_s4 + $0x170] sm:$0xff] }
 0xa3c   : > { %10826 = vmatprep.subr.mxu1 %v4587_v35  ;;  %10861 = vmatprep.subr.mxu0 %v4571_v37 }
 0xa3d   : > { %10827 = vmatpush3.msra.mxu1 %v4587_v35  ;;  %10862 = vmatpush3.msra.mxu0 %v4571_v37  ;;  %v4557_v35 = vmul.f32 %v12342_v1, %v13277_v51  ;;  %v8905_v37 = vld [vmem:[%s14466_s4 + $0x178] sm:$0xff]  ;;  %v4558_v1 = vmul.f32 %v13277_v51, %v12369_v3  ;;  %v8887_v3 = vld [vmem:[%s14467_s10 + $0x168] sm:$0xff] }
 0xa3e   : > { %10828 = vmatprep.subr.mxu1 %v4586_v8  ;;  %10863 = vmatprep.subr.mxu0 %v4570_v22 }
 0xa3f   : > { %10829 = vmatpush3.msra.mxu1 %v4586_v8  ;;  %10864 = vmatpush3.msra.mxu0 %v4570_v22  ;;  %v8889_v8 = vld [vmem:[%s14467_s10 + $0x178] sm:$0xff]  ;;  %v4564_v22 = vmul.f32 %v13273_v21, %v12525_v6  ;;  %v8903_v6 = vld [vmem:[%s14466_s4 + $0x168] sm:$0xff] }
 0xa40   : > { %10830 = vmatprep.subr.mxu1 %v4585_v11  ;;  %10865 = vmatprep.subr.mxu0 %v4569_v15 }
 0xa41   : > { %10831 = vmatpush3.msra.mxu1 %v4585_v11  ;;  %10866 = vmatpush3.msra.mxu0 %v4569_v15  ;;  %v8888_v11 = vld [vmem:[%s14467_s10 + $0x170] sm:$0xff]  ;;  %v8902_v15 = vld [vmem:[%s14466_s4 + $0x160] sm:$0xff] }
 0xa42   : > { %10832 = vmatprep.subr.mxu1 %v4584_v19  ;;  %10867 = vmatprep.subr.mxu0 %v4568_v16 }
 0xa43   : > { %10833 = vmatpush3.msra.mxu1 %v4584_v19  ;;  %10868 = vmatpush3.msra.mxu0 %v4568_v16  ;;  %v8886_v19 = vld [vmem:[%s14467_s10 + $0x160] sm:$0xff]  ;;  %v8901_v16 = vld [vmem:[%s14466_s4 + $0x158] sm:$0xff] }
 0xa44   : > { %10834 = vmatprep.subr.mxu1 %v4583_v18  ;;  %10869 = vmatprep.subr.mxu0 %v4567_v48 }
 0xa45   : > { %10835 = vmatpush3.msra.mxu1 %v4583_v18  ;;  %10870 = vmatpush3.msra.mxu0 %v4567_v48  ;;  %v8885_v18 = vld [vmem:[%s14467_s10 + $0x158] sm:$0xff]  ;;  %v8900_v48 = vld [vmem:[%s14466_s4 + $0x150] sm:$0xff] }
 0xa46   : > { %10836 = vmatprep.subr.mxu1 %v4582_v49  ;;  %10871 = vmatprep.subr.mxu0 %v4566_v50 }
 0xa47   : > { %10837 = vmatpush3.msra.mxu1 %v4582_v49  ;;  %10872 = vmatpush3.msra.mxu0 %v4566_v50  ;;  %v8884_v49 = vld [vmem:[%s14467_s10 + $0x150] sm:$0xff]  ;;  %v8899_v50 = vld [vmem:[%s14466_s4 + $0x148] sm:$0xff] }
 0xa48   : > { %10839 = vmatmul.mubr.f32.vlgmr.msra.gmra.mxu1 %v4561_v52  ;;  %10874 = vmatmul.mubr.f32.vlgmr.msra.gmra.mxu0 %v4555_v53  ;;  %v8883_v52 = vld [vmem:[%s14467_s10 + $0x148] sm:$0xff]  ;;  %v8898_v53 = vld [vmem:[%s14466_s4 + $0x140] sm:$0xff] }
 0xa49   : > { %10876 = vmatprep.subr.mxu1 %v8873_v63  ;;  %10911 = vmatprep.subr.mxu0 %v8857_v2 }
 0xa4a   : > { %10877 = vmatpush3.msra.mxu1 %v8873_v63  ;;  %10908 = vmatprep.mubr.f32.mxu1 %v4562_v10  ;;  %v8882_v63 = vld [vmem:[%s14467_s10 + $0x140] sm:$0xff]  ;;  %v8881_v10 = vld [vmem:[%s14467_s10 + $0x138] sm:$0xff] }
 0xa4b   : > { %10912 = vmatpush3.msra.mxu0 %v8857_v2  ;;  %10943 = vmatprep.mubr.f32.mxu0 %v4556_v60  ;;  %v8897_v2 = vld [vmem:[%s14466_s4 + $0x138] sm:$0xff]  ;;  %v8896_v60 = vld [vmem:[%s14466_s4 + $0x130] sm:$0xff] }
 0xa4c   : > { %10878 = vmatprep.subr.mxu1 %v8872_v55  ;;  %10913 = vmatprep.subr.mxu0 %v8856_v13 }
 0xa4d   : > { %10879 = vmatpush3.msra.mxu1 %v8872_v55  ;;  %10914 = vmatpush3.msra.mxu0 %v8856_v13  ;;  %v8880_v55 = vld [vmem:[%s14467_s10 + $0x130] sm:$0xff]  ;;  %v8895_v13 = vld [vmem:[%s14466_s4 + $0x128] sm:$0xff] }
 0xa4e   : > { %10880 = vmatprep.subr.mxu1 %v8871_v59  ;;  %10915 = vmatprep.subr.mxu0 %v8855_v62 }
 0xa4f   : > { %10881 = vmatpush3.msra.mxu1 %v8871_v59  ;;  %10916 = vmatpush3.msra.mxu0 %v8855_v62  ;;  %v8879_v59 = vld [vmem:[%s14467_s10 + $0x128] sm:$0xff]  ;;  %v8894_v62 = vld [vmem:[%s14466_s4 + $0x120] sm:$0xff] }
 0xa50   : > { %10882 = vmatprep.subr.mxu1 %v8870_v14  ;;  %10917 = vmatprep.subr.mxu0 %v8854_v17 }
 0xa51   : > { %10883 = vmatpush3.msra.mxu1 %v8870_v14  ;;  %10918 = vmatpush3.msra.mxu0 %v8854_v17  ;;  %v8878_v14 = vld [vmem:[%s14467_s10 + $0x120] sm:$0xff]  ;;  %v8893_v17 = vld [vmem:[%s14466_s4 + $0x118] sm:$0xff] }
 0xa52   : > { %10884 = vmatprep.subr.mxu1 %v8869_v9  ;;  %10919 = vmatprep.subr.mxu0 %v8853_v12 }
 0xa53   : > { %10885 = vmatpush3.msra.mxu1 %v8869_v9  ;;  %10920 = vmatpush3.msra.mxu0 %v8853_v12  ;;  %v8877_v9 = vld [vmem:[%s14467_s10 + $0x118] sm:$0xff]  ;;  %v8892_v12 = vld [vmem:[%s14466_s4 + $0x110] sm:$0xff] }
 0xa54   : > { %10886 = vmatprep.subr.mxu1 %v8868_v44  ;;  %10921 = vmatprep.subr.mxu0 %v8852_v45 }
 0xa55   : > { %10887 = vmatpush3.msra.mxu1 %v8868_v44  ;;  %10922 = vmatpush3.msra.mxu0 %v8852_v45  ;;  %v8876_v44 = vld [vmem:[%s14467_s10 + $0x110] sm:$0xff]  ;;  %v8891_v45 = vld [vmem:[%s14466_s4 + $0x108] sm:$0xff] }
 0xa56   : > { %10888 = vmatprep.subr.mxu1 %v8867_v20  ;;  %10923 = vmatprep.subr.mxu0 %v8851_v4 }
 0xa57   : > { %10889 = vmatpush3.msra.mxu1 %v8867_v20  ;;  %10924 = vmatpush3.msra.mxu0 %v8851_v4  ;;  %v8875_v20 = vld [vmem:[%s14467_s10 + $0x108] sm:$0xff]  ;;  %v8890_v4 = vld [vmem:[%s14466_s4 + $0x100] sm:$0xff] }
 0xa58   : > { %10890 = vmatprep.subr.mxu1 %v8866_v25  ;;  %10925 = vmatprep.subr.mxu0 %v8850_v38 }
 0xa59   : > { %10891 = vmatpush3.msra.mxu1 %v8866_v25  ;;  %10926 = vmatpush3.msra.mxu0 %v8850_v38  ;;  %v8874_v25 = vld [vmem:[%s14467_s10 + $0x100] sm:$0xff]  ;;  %v4565_v38 = vmul.f32 %v12512_v5, %v13273_v21 }
 0xa5a   : > { %10892 = vmatprep.subr.mxu1 %v8865_v23  ;;  %10927 = vmatprep.subr.mxu0 %v8849_v26  ;;  %v5134_v5 = vld [vmem:[%s14468_s2] sm:$0xff] }
 0xa5b   : > { %10893 = vmatpush3.msra.mxu1 %v8865_v23  ;;  %10928 = vmatpush3.msra.mxu0 %v8849_v26  ;;  %v4559_v23 = vmul.f32 %v12361_v0, %v13277_v51  ;;  %v4546_v26 = vmul.f32 %v13277_v51, %v12989_v43  ;;  %v8907_v0 = vld [vmem:[%s14468_s2 + $0x8] sm:$0xff]  ;;  %v4552_v43 = vmul.f32 %v13273_v21, %v13221_v7  ;;  %v5575_v7 = vld [vmem:[%s14469_s9 + $0x38] sm:$0xff] }
 0xa5c   : > { %10894 = vmatprep.subr.mxu1 %v8864_v24  ;;  %10929 = vmatprep.subr.mxu0 %v8848_v58 }
 0xa5d   : > { %10895 = vmatpush3.msra.mxu1 %v8864_v24  ;;  %10930 = vmatpush3.msra.mxu0 %v8848_v58  ;;  %v8909_v24 = vld [vmem:[%s14468_s2 + $0x10] sm:$0xff]  ;;  %s14471_s2 = sshll.u32 %s14473_s3, 4 }
 0xa5e   : > { %10896 = vmatprep.subr.mxu1 %v8863_v61  ;;  %10931 = vmatprep.subr.mxu0 %v8847_v39  ;;  %v5574_v58 = vld [vmem:[%s14469_s9 + $0x30] sm:$0xff]  ;;  %s791_s17 = scalar_lea.vmem %s14428_s26, %s14471_s2 }
 0xa5f   : > { %10897 = vmatpush3.msra.mxu1 %v8863_v61  ;;  %10932 = vmatpush3.msra.mxu0 %v8847_v39  ;;  %v5583_v61 = vld [vmem:[%s14413_s11 + $0x38] sm:$0xff]  ;;  %v5582_v39 = vld [vmem:[%s14413_s11 + $0x30] sm:$0xff] }
 0xa60   : > { %10898 = vmatprep.subr.mxu1 %v8862_v40  ;;  %10933 = vmatprep.subr.mxu0 %v8846_v41 }
 0xa61   : > { %10899 = vmatpush3.msra.mxu1 %v8862_v40  ;;  %10934 = vmatpush3.msra.mxu0 %v8846_v41  ;;  %v5573_v40 = vld [vmem:[%s14469_s9 + $0x28] sm:$0xff] }
 0xa62   : > { %10900 = vmatprep.subr.mxu1 %v8861_v42  ;;  %10935 = vmatprep.subr.mxu0 %v8845_v27  ;;  %v5581_v41 = vld [vmem:[%s14413_s11 + $0x28] sm:$0xff] }
 0xa63   : > { %10901 = vmatpush3.msra.mxu1 %v8861_v42  ;;  %10936 = vmatpush3.msra.mxu0 %v8845_v27  ;;  %v5572_v42 = vld [vmem:[%s14469_s9 + $0x20] sm:$0xff] }
 0xa64   : > { %10902 = vmatprep.subr.mxu1 %v8860_v28  ;;  %10937 = vmatprep.subr.mxu0 %v8844_v29  ;;  %v5580_v27 = vld [vmem:[%s14413_s11 + $0x20] sm:$0xff] }
 0xa65   : > { %10903 = vmatpush3.msra.mxu1 %v8860_v28  ;;  %10938 = vmatpush3.msra.mxu0 %v8844_v29  ;;  %v5571_v28 = vld [vmem:[%s14469_s9 + $0x18] sm:$0xff]  ;;  %v5570_v29 = vld [vmem:[%s14469_s9 + $0x10] sm:$0xff] }
 0xa66   : > { %10904 = vmatprep.subr.mxu1 %v8859_v30  ;;  %10939 = vmatprep.subr.mxu0 %v8843_v31 }
 0xa67   : > { %10905 = vmatpush3.msra.mxu1 %v8859_v30  ;;  %10940 = vmatpush3.msra.mxu0 %v8843_v31  ;;  %v5579_v30 = vld [vmem:[%s14413_s11 + $0x18] sm:$0xff]  ;;  %v5569_v31 = vld [vmem:[%s14469_s9 + $0x8] sm:$0xff] }
 0xa68   : > { %10906 = vmatprep.subr.mxu1 %v8858_v32  ;;  %10941 = vmatprep.subr.mxu0 %v8842_v33 }
 0xa69   : > { %10907 = vmatpush3.msra.mxu1 %v8858_v32  ;;  %10942 = vmatpush3.msra.mxu0 %v8842_v33  ;;  %v5578_v32 = vld [vmem:[%s14413_s11 + $0x10] sm:$0xff]  ;;  %v5568_v33 = vld [vmem:[%s14469_s9] sm:$0xff] }
 0xa6a   : > { %10909 = vmatmul.mubr.f32.vlgmr.msra.gmra.mxu1 %v4563_v34  ;;  %10944 = vmatmul.mubr.f32.vlgmr.msra.gmra.mxu0 %v4557_v35  ;;  %v5577_v34 = vld [vmem:[%s14413_s11 + $0x8] sm:$0xff]  ;;  %v5576_v35 = vld [vmem:[%s14413_s11] sm:$0xff] }
 0xa6b   : > { %10946 = vmatprep.subr.mxu1 %v8905_v37  ;;  %10981 = vmatprep.subr.mxu0 %v8889_v8 }
 0xa6c   : > { %10947 = vmatpush3.msra.mxu1 %v8905_v37  ;;  %10978 = vmatprep.mubr.f32.mxu1 %v4564_v22 }
 0xa6d   : > { %10982 = vmatpush3.msra.mxu0 %v8889_v8  ;;  %11013 = vmatprep.mubr.f32.mxu0 %v4558_v1 }
 0xa6e   : > { %10948 = vmatprep.subr.mxu1 %v8904_v57  ;;  %10983 = vmatprep.subr.mxu0 %v8888_v11 }
 0xa6f   : > { %10949 = vmatpush3.msra.mxu1 %v8904_v57  ;;  %10984 = vmatpush3.msra.mxu0 %v8888_v11 }
 0xa70   : > { %10950 = vmatprep.subr.mxu1 %v8903_v6  ;;  %10985 = vmatprep.subr.mxu0 %v8887_v3 }
 0xa71   : > { %10951 = vmatpush3.msra.mxu1 %v8903_v6  ;;  %10986 = vmatpush3.msra.mxu0 %v8887_v3 }
 0xa72   : > { %10952 = vmatprep.subr.mxu1 %v8902_v15  ;;  %10987 = vmatprep.subr.mxu0 %v8886_v19 }
 0xa73   : > { %10953 = vmatpush3.msra.mxu1 %v8902_v15  ;;  %10988 = vmatpush3.msra.mxu0 %v8886_v19 }
 0xa74   : > { %10954 = vmatprep.subr.mxu1 %v8901_v16  ;;  %10989 = vmatprep.subr.mxu0 %v8885_v18 }
 0xa75   : > { %10955 = vmatpush3.msra.mxu1 %v8901_v16  ;;  %10990 = vmatpush3.msra.mxu0 %v8885_v18 }
 0xa76   : > { %10956 = vmatprep.subr.mxu1 %v8900_v48  ;;  %10991 = vmatprep.subr.mxu0 %v8884_v49 }
 0xa77   : > { %10957 = vmatpush3.msra.mxu1 %v8900_v48  ;;  %10992 = vmatpush3.msra.mxu0 %v8884_v49 }
 0xa78   : > { %10958 = vmatprep.subr.mxu1 %v8899_v50  ;;  %10993 = vmatprep.subr.mxu0 %v8883_v52 }
 0xa79   : > { %10959 = vmatpush3.msra.mxu1 %v8899_v50  ;;  %10994 = vmatpush3.msra.mxu0 %v8883_v52 }
 0xa7a   : > { %10960 = vmatprep.subr.mxu1 %v8898_v53  ;;  %10995 = vmatprep.subr.mxu0 %v8882_v63 }
 0xa7b   : > { %10961 = vmatpush3.msra.mxu1 %v8898_v53  ;;  %10996 = vmatpush3.msra.mxu0 %v8882_v63 }
 0xa7c   : > { %10962 = vmatprep.subr.mxu1 %v8897_v2  ;;  %10997 = vmatprep.subr.mxu0 %v8881_v10 }
 0xa7d   : > { %10963 = vmatpush3.msra.mxu1 %v8897_v2  ;;  %10998 = vmatpush3.msra.mxu0 %v8881_v10 }
 0xa7e   : > { %10964 = vmatprep.subr.mxu1 %v8896_v60  ;;  %10999 = vmatprep.subr.mxu0 %v8880_v55 }
 0xa7f   : > { %10965 = vmatpush3.msra.mxu1 %v8896_v60  ;;  %11000 = vmatpush3.msra.mxu0 %v8880_v55 }
 0xa80   : > { %10966 = vmatprep.subr.mxu1 %v8895_v13  ;;  %11001 = vmatprep.subr.mxu0 %v8879_v59 }
 0xa81   : > { %10967 = vmatpush3.msra.mxu1 %v8895_v13  ;;  %11002 = vmatpush3.msra.mxu0 %v8879_v59 }
 0xa82   : > { %10968 = vmatprep.subr.mxu1 %v8894_v62  ;;  %11003 = vmatprep.subr.mxu0 %v8878_v14 }
 0xa83   : > { %10969 = vmatpush3.msra.mxu1 %v8894_v62  ;;  %11004 = vmatpush3.msra.mxu0 %v8878_v14 }
 0xa84   : > { %10970 = vmatprep.subr.mxu1 %v8893_v17  ;;  %11005 = vmatprep.subr.mxu0 %v8877_v9 }
 0xa85   : > { %10971 = vmatpush3.msra.mxu1 %v8893_v17  ;;  %11006 = vmatpush3.msra.mxu0 %v8877_v9  ;;  %v8923_v17 = vld [vmem:[%s14469_s9 + $0x78] sm:$0xff] }
 0xa86   : > { %10972 = vmatprep.subr.mxu1 %v8892_v12  ;;  %11007 = vmatprep.subr.mxu0 %v8876_v44 }
 0xa87   : > { %10973 = vmatpush3.msra.mxu1 %v8892_v12  ;;  %11008 = vmatpush3.msra.mxu0 %v8876_v44 }
 0xa88   : > { %10974 = vmatprep.subr.mxu1 %v8891_v45  ;;  %11009 = vmatprep.subr.mxu0 %v8875_v20 }
 0xa89   : > { %10975 = vmatpush3.msra.mxu1 %v8891_v45  ;;  %11010 = vmatpush3.msra.mxu0 %v8875_v20  ;;  %v8922_v45 = vld [vmem:[%s14469_s9 + $0x70] sm:$0xff] }
 0xa8a   : > { %10976 = vmatprep.subr.mxu1 %v8890_v4  ;;  %11011 = vmatprep.subr.mxu0 %v8874_v25 }
 0xa8b   : > { %10977 = vmatpush3.msra.mxu1 %v8890_v4  ;;  %11012 = vmatpush3.msra.mxu0 %v8874_v25  ;;  %v8931_v25 = vld [vmem:[%s14413_s11 + $0x78] sm:$0xff] }
 0xa8c   : > { %10979 = vmatmul.mubr.f32.vlgmr.msra.gmra.mxu1 %v4565_v38  ;;  %11014 = vmatmul.mubr.f32.vlgmr.msra.gmra.mxu0 %v4559_v23  ;;  %v8921_v38 = vld [vmem:[%s14469_s9 + $0x68] sm:$0xff] }
 0xa8d   : > { %11016 = vmatprep.subr.mxu1 %v11539_v46  ;;  %11021 = vmatprep.subr.mxu0 %v11539_v46 }
 0xa8e   : > { %11017 = vmatpush3.msra.mxu1 %v4546_v26  ;;  %11022 = vmatpush3.msra.mxu0 %v4546_v26 }
 0xa8f   : > { %11018 = vmatprep.mubr.msk.f32.mxu1 %vm11540_vm5, %v11539_v46  ;;  %11023 = vmatprep.mubr.msk.f32.mxu0 %vm11540_vm5, %v11539_v46 }
 0xa90   : > { %11026 = vmatprep.subr.mxu1 %v11539_v46  ;;  %11031 = vmatprep.subr.mxu0 %v11539_v46 }
 0xa91   : > { %11019 = vmatmul.mubr.msk.f32.vlgmr.msra.gmra.mxu1 %vm3109_vm8, %v5134_v5  ;;  %11024 = vmatmul.mubr.msk.f32.vlgmr.msra.gmra.mxu0 %vm3109_vm8, %v8907_v0 }
 0xa92   : > { %11027 = vmatpush3.msra.mxu1 %v4546_v26  ;;  %11032 = vmatpush3.msra.mxu0 %v4552_v43 }
 0xa93   : > { %11028 = vmatprep.mubr.msk.f32.mxu1 %vm11540_vm5, %v11539_v46  ;;  %11033 = vmatprep.mubr.msk.f32.mxu0 %vm11540_vm5, %v11539_v46 }
 0xa94   : > { %11036 = vmatprep.subr.mxu1 %v11539_v46  ;;  %11041 = vmatprep.subr.mxu0 %v11539_v46 }
 0xa95   : > { %11029 = vmatmul.mubr.msk.f32.vlgmr.msra.gmra.mxu1 %vm3109_vm8, %v8909_v24  ;;  %11034 = vmatmul.mubr.msk.f32.vlgmr.msra.gmra.mxu0 %vm3109_vm8, %v5134_v5  ;;  %v8930_v5 = vld [vmem:[%s14413_s11 + $0x70] sm:$0xff] }
 0xa96   : > { %11037 = vmatpush3.msra.mxu1 %v4552_v43  ;;  %11042 = vmatpush3.msra.mxu0 %v4552_v43 }
 0xa97   : > { %11038 = vmatprep.mubr.msk.f32.mxu1 %vm11540_vm5, %v11539_v46  ;;  %11043 = vmatprep.mubr.msk.f32.mxu0 %vm11540_vm5, %v11539_v46 }
 0xa98   : > { %11065 = vmatprep.subr.mxu0 %v11539_v46  ;;  %11046 = vmatprep.subr.mxu1 %v11539_v46 }
 0xa99   : > { %11039 = vmatmul.mubr.msk.f32.vlgmr.msra.gmra.mxu1 %vm3109_vm8, %v8907_v0  ;;  %11044 = vmatmul.mubr.msk.f32.vlgmr.msra.gmra.mxu0 %vm3109_vm8, %v8909_v24  ;;  %v8920_v0 = vld [vmem:[%s14469_s9 + $0x60] sm:$0xff] }
 0xa9a   : > { %11081 = vmatprep.mubr.msk.f32.mxu0 %vm11540_vm5, %v11539_v46  ;;  %11062 = vmatprep.mubr.msk.f32.mxu1 %vm11540_vm5, %v11539_v46 }
 0xa9b   : > { %11066 = vmatpush3.msra.mxu0 %v5575_v7  ;;  %11047 = vmatpush3.msra.mxu1 %v5583_v61  ;;  %v8929_v7 = vld [vmem:[%s14413_s11 + $0x68] sm:$0xff] }
 0xa9c   : > { %11067 = vmatprep.subr.mxu0 %v11539_v46  ;;  %11048 = vmatprep.subr.mxu1 %v11539_v46 }
 0xa9d   : > { %11068 = vmatpush3.msra.mxu0 %v5574_v58  ;;  %11049 = vmatpush3.msra.mxu1 %v5582_v39  ;;  %v8919_v58 = vld [vmem:[%s14469_s9 + $0x58] sm:$0xff] }
 0xa9e   : > { %11069 = vmatprep.subr.mxu0 %v11539_v46  ;;  %11050 = vmatprep.subr.mxu1 %v11539_v46 }
 0xa9f   : > { %11070 = vmatpush3.msra.mxu0 %v5573_v40  ;;  %11051 = vmatpush3.msra.mxu1 %v5581_v41  ;;  %v8928_v40 = vld [vmem:[%s14413_s11 + $0x60] sm:$0xff]  ;;  %v8918_v41 = vld [vmem:[%s14469_s9 + $0x50] sm:$0xff] }
 0xaa0   : > { %11071 = vmatprep.subr.mxu0 %v11539_v46  ;;  %11052 = vmatprep.subr.mxu1 %v11539_v46 }
 0xaa1   : > { %11072 = vmatpush3.msra.mxu0 %v5572_v42  ;;  %11053 = vmatpush3.msra.mxu1 %v5580_v27 }
 0xaa2   : > { %11073 = vmatprep.subr.mxu0 %v11539_v46  ;;  %11054 = vmatprep.subr.mxu1 %v11539_v46 }
 0xaa3   : > { %11074 = vmatpush3.msra.mxu0 %v5571_v28  ;;  %11055 = vmatpush3.msra.mxu1 %v5579_v30  ;;  %v8927_v28 = vld [vmem:[%s14413_s11 + $0x58] sm:$0xff]  ;;  %v8926_v30 = vld [vmem:[%s14413_s11 + $0x50] sm:$0xff] }
 0xaa4   : > { %11075 = vmatprep.subr.mxu0 %v11539_v46  ;;  %11056 = vmatprep.subr.mxu1 %v11539_v46 }
 0xaa5   : > { %11076 = vmatpush3.msra.mxu0 %v5570_v29  ;;  %11057 = vmatpush3.msra.mxu1 %v5578_v32  ;;  %v8917_v29 = vld [vmem:[%s14469_s9 + $0x48] sm:$0xff] }
 0xaa6   : > { %11077 = vmatprep.subr.mxu0 %v11539_v46  ;;  %11058 = vmatprep.subr.mxu1 %v11539_v46  ;;  %v8925_v32 = vld [vmem:[%s14413_s11 + $0x48] sm:$0xff] }
 0xaa7   : > { %11078 = vmatpush3.msra.mxu0 %v5569_v31  ;;  %11059 = vmatpush3.msra.mxu1 %v5577_v34  ;;  %v8916_v31 = vld [vmem:[%s14469_s9 + $0x40] sm:$0xff] }
 0xaa8   : > { %11079 = vmatprep.subr.mxu0 %v11539_v46  ;;  %11060 = vmatprep.subr.mxu1 %v11539_v46  ;;  %v8924_v34 = vld [vmem:[%s14413_s11 + $0x40] sm:$0xff] }
 0xaa9   : > { %11080 = vmatpush3.msra.mxu0 %v5568_v33  ;;  %11061 = vmatpush3.msra.mxu1 %v5576_v35  ;;  %v8941_v33 = vld [vmem:[%s14469_s9 + $0xb8] sm:$0xff]  ;;  %v8940_v35 = vld [vmem:[%s14469_s9 + $0xb0] sm:$0xff] }
 0xaaa   : > { %11103 = vmatprep.subr.mxu0 %v11539_v46  ;;  %11084 = vmatprep.subr.mxu1 %v11539_v46 }
 0xae7   : > { %v13694_v37 = vpop.f32.mrf.mxu1  ;;  %v13696_v8 = vpop.f32.mrf.mxu0 }
 0xae8   : > { %v4541_v22 = vmax.f32 %v13694_v37, %v13696_v8  ;;  %v6514_v37 = vld [vmem:[%s14414_s12 + $0x18] sm:$0xff]  ;;  %v6517_v8 = vld [vmem:[%s14415_s13 + $0x10] sm:$0xff] }
 0xae9   : > { %v10786_v1 = vpop.f32.mrf.mxu1  ;;  %v10805_v57 = vpop.f32.mrf.mxu0 }
 0xaea   : > { %v8949_v1 = vld [vmem:[%s14413_s11 + $0xb8] sm:$0xff]  ;;  %v8939_v57 = vld [vmem:[%s14469_s9 + $0xa8] sm:$0xff]  ;;  %v4553_v54 = vmul.f32 %v13273_v21, %v4541_v22  ;;  %v6513_v22 = vld [vmem:[%s14414_s12 + $0x10] sm:$0xff] }
 0xaeb   : > { %v8957_v21 = vld [vmem:[%s14470_s7 + $0x8] sm:$0xf] }
 0xb08   : > { %v10840_v11 = vpop.f32.mrf.mxu1  ;;  %v10875_v6 = vpop.f32.mrf.mxu0 }
 0xb09   : > { %v4745_v3 = vadd.f32 %v10875_v6, %v10840_v11  ;;  %v8948_v11 = vld [vmem:[%s14413_s11 + $0xb0] sm:$0xff]  ;;  %v8938_v6 = vld [vmem:[%s14469_s9 + $0xa0] sm:$0xff] }
 0xb0a   : > { %v4664_v15 = vpop.f32.mrf.mxu1  ;;  %v4739_v19 = vpop.f32.mrf.mxu0 }
 0xb0b   : > { %v4740_v16 = vadd.f32 %v4739_v19, %v4664_v15  ;;  %v8937_v15 = vld [vmem:[%s14469_s9 + $0x98] sm:$0xff]  ;;  %v8946_v19 = vld [vmem:[%s14413_s11 + $0xa0] sm:$0xff] }
 0xb2a   : > { %v10910_v18 = vpop.f32.mrf.mxu1  ;;  %v10945_v48 = vpop.f32.mrf.mxu0 }
 0xb2b   : > { %v4931_v49 = vadd.f32 %v10945_v48, %v10910_v18  ;;  %v8945_v18 = vld [vmem:[%s14413_s11 + $0x98] sm:$0xff]  ;;  %v8935_v48 = vld [vmem:[%s14469_s9 + $0x88] sm:$0xff] }
 0xb2c   : > { %v4850_v50 = vpop.f32.mrf.mxu1  ;;  %v4925_v52 = vpop.f32.mrf.mxu0 }
 0xb2d   : > { %v4935_v53 = vadd.f32 %v4931_v49, %v4745_v3  ;;  %v4926_v63 = vadd.f32 %v4925_v52, %v4850_v50  ;;  %v8947_v3 = vld [vmem:[%s14413_s11 + $0xa8] sm:$0xff]  ;;  %v8944_v49 = vld [vmem:[%s14413_s11 + $0x90] sm:$0xff]  ;;  %v8934_v50 = vld [vmem:[%s14469_s9 + $0x80] sm:$0xff] }
 0xb2e   : > { %v8943_v52 = vld [vmem:[%s14413_s11 + $0x88] sm:$0xff] }
 0xb2f   : > { %v4934_v2 = vadd.f32 %v4926_v63, %v4740_v16  ;;  %v8936_v16 = vld [vmem:[%s14469_s9 + $0x90] sm:$0xff]  ;;  %v8942_v63 = vld [vmem:[%s14413_s11 + $0x80] sm:$0xff] }
 0xb4c   : > { %v10980_v10 = vpop.f32.mrf.mxu1  ;;  %v11015_v60 = vpop.f32.mrf.mxu0 }
 0xb4d   : > { %v5117_v55 = vadd.f32 %v11015_v60, %v10980_v10  ;;  %v6512_v10 = vld [vmem:[%s14414_s12 + $0x8] sm:$0xff]  ;;  %v6515_v60 = vld [vmem:[%s14415_s13] sm:$0xff] }
 0xb4e   : > { %v5036_v13 = vpop.f32.mrf.mxu1  ;;  %v5111_v59 = vpop.f32.mrf.mxu0 }
 0xb4f   : > { %v13700_v62 = vadd.f32 %v5117_v55, %v4935_v53  ;;  %v5112_v14 = vadd.f32 %v5111_v59, %v5036_v13  ;;  %v4547_v53 = vmul.f32 %v13277_v51, %v3974_v56  ;;  %v6069_v56 = vld [vmem:[%s14470_s7] sm:$0xf]  ;;  %v6518_v51 = vld [vmem:[%s14415_s13 + $0x18] sm:$0xff] }
 0xb50   : > { %v6511_v55 = vld [vmem:[%s14414_s12] sm:$0xff] }
 0xb51   : > { %v13705_v9 = vadd.f32 %v5112_v14, %v4934_v2  ;;  %v5204_v12 = vpop.f32.mrf.mxu1  ;;  %v5279_v44 = vpop.f32.mrf.mxu0  ;;  %v6516_v2 = vld [vmem:[%s14415_s13 + $0x8] sm:$0xff] }
 0xb52   : > { %11082 = vmatmul.mubr.msk.f32.vlgmr.msra.gmra.mxu0 %vm3821_vm11, %v5204_v12 }
 0xb53   : > { %11104 = vmatpush3.msra.mxu0 %v8923_v17  ;;  %v11020_v20 = vpop.f32.mrf.mxu1  ;;  %v11025_v4 = vpop.f32.mrf.mxu0  ;;  %11119 = vmatprep.mubr.msk.f32.mxu0 %vm11540_vm5, %v11539_v46 }
 0xb54   : > { %11105 = vmatprep.subr.mxu0 %v11539_v46 }
 0xb55   : > { %11106 = vmatpush3.msra.mxu0 %v8922_v45  ;;  %v5424_v23 = vpop.f32.mrf.mxu0  ;;  %v13720_v26 = vpop.f32.mrf.mxu1 }
 0xb56   : > { %11107 = vmatprep.subr.mxu0 %v11539_v46  ;;  %11063 = vmatmul.mubr.msk.f32.vlgmr.msra.gmra.mxu1 %vm3821_vm11, %v5424_v23 }
 0xb57   : > { %11085 = vmatpush3.msra.mxu1 %v8931_v25  ;;  %11108 = vmatpush3.msra.mxu0 %v8921_v38  ;;  %v11035_v43 = vpop.f32.mrf.mxu0  ;;  %v11030_v24 = vpop.f32.mrf.mxu1 }
 0xb58   : > { %11086 = vmatprep.subr.mxu1 %v11539_v46  ;;  %11109 = vmatprep.subr.mxu0 %v11539_v46  ;;  %v8975_v24 = vld [vmem:[%s14415_s13 + $0x38] sm:$0xff] }
 0xb59   : > { %11087 = vmatpush3.msra.mxu1 %v8930_v5  ;;  %11110 = vmatpush3.msra.mxu0 %v8920_v0  ;;  %v5494_v61 = vpop.f32.mrf.mxu1  ;;  %v13738_v39 = vpop.f32.mrf.mxu0  ;;  %v8971_v0 = vld [vmem:[%s14414_s12 + $0x38] sm:$0xff] }
 0xb5a   : > { %11088 = vmatprep.subr.mxu1 %v11539_v46  ;;  %11111 = vmatprep.subr.mxu0 %v11539_v46 }
 0xb5b   : > { %11089 = vmatpush3.msra.mxu1 %v8929_v7  ;;  %11112 = vmatpush3.msra.mxu0 %v8919_v58  ;;  %v11040_v42 = vpop.f32.mrf.mxu1  ;;  %v11045_v27 = vpop.f32.mrf.mxu0  ;;  %v8970_v58 = vld [vmem:[%s14414_s12 + $0x30] sm:$0xff] }
 0xb5c   : > { %11090 = vmatprep.subr.mxu1 %v11539_v46  ;;  %11113 = vmatprep.subr.mxu0 %v11539_v46  ;;  %v5124_v42 = vsub.s32 4, %v12168_v36 }
 0xb5d   : > { %11091 = vmatpush3.msra.mxu1 %v8928_v40  ;;  %11114 = vmatpush3.msra.mxu0 %v8918_v41  ;;  %v8969_v41 = vld [vmem:[%s14414_s12 + $0x28] sm:$0xff] }
 0xb5e   : > { %11092 = vmatprep.subr.mxu1 %v11539_v46  ;;  %11115 = vmatprep.subr.mxu0 %v11539_v46 }
 0xb5f   : > { %11093 = vmatpush3.msra.mxu1 %v8927_v28  ;;  %11116 = vmatpush3.msra.mxu0 %v8917_v29  ;;  %v8973_v28 = vld [vmem:[%s14415_s13 + $0x28] sm:$0xff]  ;;  %v8968_v29 = vld [vmem:[%s14414_s12 + $0x20] sm:$0xff] }
 0xb60   : > { %11094 = vmatprep.subr.mxu1 %v11539_v46  ;;  %11117 = vmatprep.subr.mxu0 %v11539_v46 }
 0xb61   : > { %11095 = vmatpush3.msra.mxu1 %v8926_v30  ;;  %11118 = vmatpush3.msra.mxu0 %v8916_v31  ;;  %v8972_v31 = vld [vmem:[%s14415_s13 + $0x20] sm:$0xff] }
 0xb62   : > { %11096 = vmatprep.subr.mxu1 %v11539_v46  ;;  %11120 = vmatmul.mubr.msk.f32.vlgmr.msra.gmra.mxu0 %vm3821_vm11, %v5279_v44 }
 0xb63   : > { %11141 = vmatprep.subr.mxu0 %v11539_v46  ;;  %11097 = vmatpush3.msra.mxu1 %v8925_v32 }
 0xb64   : > { %11142 = vmatpush3.msra.mxu0 %v8941_v33  ;;  %11098 = vmatprep.subr.mxu1 %v11539_v46  ;;  %v13972_v33 = vld [vmem:[%s14427_s25] sm:$0xff] }
 0xb65   : > { %11143 = vmatprep.subr.mxu0 %v11539_v46  ;;  %11099 = vmatpush3.msra.mxu1 %v8924_v34  ;;  %v5125_v34 = vrot.slane %v13972_v33, %v5124_v42 }
 0xb66   : > { %11100 = vmatprep.mubr.msk.f32.mxu1 %vm11540_vm5, %v11539_v46  ;;  %11144 = vmatpush3.msra.mxu0 %v8940_v35 }
 0xb67   : > { %11101 = vmatmul.mubr.msk.f32.vlgmr.msra.gmra.mxu1 %vm3821_vm11, %v5494_v61  ;;  %11122 = vmatprep.subr.mxu1 %v11539_v46 }
 0xb68   : > { %11145 = vmatprep.subr.mxu0 %v11539_v46  ;;  %11123 = vmatpush3.msra.mxu1 %v8949_v1 }
 0xb69   : > { %11146 = vmatpush3.msra.mxu0 %v8939_v57  ;;  %11124 = vmatprep.subr.mxu1 %v11539_v46 }
 0xb6a   : > { %11147 = vmatprep.subr.mxu0 %v11539_v46  ;;  %11125 = vmatpush3.msra.mxu1 %v8948_v11  ;;  %v8981_v11 = vld [vmem:[%s14414_s12 + $0x58] sm:$0xff] }
 0xb6b   : > { %11148 = vmatpush3.msra.mxu0 %v8938_v6  ;;  %11126 = vmatprep.subr.mxu1 %v11539_v46 }
 0xb6c   : > { %11149 = vmatprep.subr.mxu0 %v11539_v46  ;;  %11127 = vmatpush3.msra.mxu1 %v8947_v3 }
 0xb6d   : > { %11150 = vmatpush3.msra.mxu0 %v8937_v15  ;;  %11128 = vmatprep.subr.mxu1 %v11539_v46  ;;  %v6063_v15 = vsub.s32 5, %v12168_v36 }
 0xb6e   : > { %11151 = vmatprep.subr.mxu0 %v11539_v46  ;;  %11129 = vmatpush3.msra.mxu1 %v8946_v19  ;;  %v8985_v19 = vld [vmem:[%s14415_s13 + $0x58] sm:$0xff] }
 0xb6f   : > { %11152 = vmatpush3.msra.mxu0 %v8936_v16  ;;  %11130 = vmatprep.subr.mxu1 %v11539_v46 }
 0xb70   : > { %11153 = vmatprep.subr.mxu0 %v11539_v46  ;;  %11131 = vmatpush3.msra.mxu1 %v8945_v18  ;;  %v8980_v18 = vld [vmem:[%s14414_s12 + $0x50] sm:$0xff] }
 0xb71   : > { %11154 = vmatpush3.msra.mxu0 %v8935_v48  ;;  %11132 = vmatprep.subr.mxu1 %v11539_v46  ;;  %v5127_v48 = vadd.f32 %v5125_v34, %v13700_v62  ;;  %v6064_v62 = vrot.slane %v13972_v33, %v6063_v15  ;;  %v9012_v15 = vld [vmem:[%s14424_s22 + $0x20] sm:$0xff] }
 0xb72   : > { %11155 = vmatprep.subr.mxu0 %v11539_v46  ;;  %11133 = vmatpush3.msra.mxu1 %v8944_v49 }
 0xb73   : > { %11156 = vmatpush3.msra.mxu0 %v8934_v50  ;;  %11157 = vmatprep.mubr.msk.f32.mxu0 %vm11540_vm5, %v11539_v46  ;;  %v8984_v50 = vld [vmem:[%s14415_s13 + $0x50] sm:$0xff]  ;;  %vm5129_vm15 = vcmp.ge.f32.partialorder %v5127_v48, 0.0 }
 0xb74   : > { %11134 = vmatprep.subr.mxu1 %v11539_v46  ;;  %11158 = vmatmul.mubr.msk.f32.vlgmr.msra.gmra.mxu0 %vm3821_vm11, %v13720_v26 }
 0xb75   : > { %11165 = vmatprep.subr.mxu0 %v11539_v46  ;;  %11135 = vmatpush3.msra.mxu1 %v8943_v52  ;;  %v8979_v52 = vld [vmem:[%s14414_s12 + $0x48] sm:$0xff] }
 0xb76   : > { %11166 = vmatpush3.msk.msra.mxu0 %vm6074_vm12, %v4547_v53  ;;  %11136 = vmatprep.subr.mxu1 %v11539_v46 }
 0xb77   : > { %11137 = vmatpush3.msra.mxu1 %v8942_v63  ;;  %11138 = vmatprep.mubr.msk.f32.mxu1 %vm11540_vm5, %v11539_v46 }
 0xb78   : > { %11167 = vmatprep.mubr.msk.f32.mxu0 %vm11540_vm5, %v11539_v46  ;;  %11175 = vmatprep.subr.mxu0 %v11539_v46 }
 0xb79   : > { %11139 = vmatmul.mubr.msk.f32.vlgmr.msra.gmra.mxu1 %vm3821_vm11, %v13738_v39  ;;  %11160 = vmatprep.subr.mxu1 %v11539_v46  ;;  %v8974_v39 = vld [vmem:[%s14415_s13 + $0x30] sm:$0xff] }
 0xb7a   : > { %11168 = vmatmul.mubr.msk.f32.vlgmr.msra.gmra.mxu0 %vm6070_vm13, %v8954_v47  ;;  %11161 = vmatpush3.msk.msra.mxu1 %vm6074_vm12, %v4547_v53 }
 0xb7b   : > { %11176 = vmatpush3.msk.msra.mxu0 %vm6074_vm12, %v4553_v54  ;;  %11162 = vmatprep.mubr.msk.f32.mxu1 %vm11540_vm5, %v11539_v46 }
 0xb7c   : > { %11170 = vmatprep.subr.mxu1 %v11539_v46  ;;  %11177 = vmatprep.mubr.msk.f32.mxu0 %vm11540_vm5, %v11539_v46 }
 0xb7d   : > { %11185 = vmatprep.subr.mxu0 %v11539_v46  ;;  %11163 = vmatmul.mubr.msk.f32.vlgmr.msra.gmra.mxu1 %vm6070_vm13, %v6069_v56 }
 0xb7e   : > { %11171 = vmatpush3.msk.msra.mxu1 %vm6074_vm12, %v4547_v53  ;;  %11178 = vmatmul.mubr.msk.f32.vlgmr.msra.gmra.mxu0 %vm6070_vm13, %v6069_v56  ;;  %v5126_v53 = vadd.f32 %v5125_v34, %v13705_v9  ;;  %v8982_v9 = vld [vmem:[%s14415_s13 + $0x40] sm:$0xff] }
 0xb7f   : > { %11186 = vmatpush3.msk.msra.mxu0 %vm6074_vm12, %v4553_v54  ;;  %11172 = vmatprep.mubr.msk.f32.mxu1 %vm11540_vm5, %v11539_v46  ;;  %v8978_v56 = vld [vmem:[%s14414_s12 + $0x40] sm:$0xff] }
 0xb80   : > { %11180 = vmatprep.subr.mxu1 %v11539_v46  ;;  %11187 = vmatprep.mubr.msk.f32.mxu0 %vm11540_vm5, %v11539_v46  ;;  %vm5128_vm1 = vcmp.ge.f32.partialorder %v5126_v53, 0.0 }
 0xb81   : > { %11173 = vmatmul.mubr.msk.f32.vlgmr.msra.gmra.mxu1 %vm6070_vm13, %v8957_v21  ;;  %11201 = vmatprep.subr.mxu0 %v11539_v46 }
 0xb82   : > { %11181 = vmatpush3.msk.msra.mxu1 %vm6074_vm12, %v4553_v54  ;;  %11182 = vmatprep.mubr.msk.f32.mxu1 %vm11540_vm5, %v11539_v46  ;;  %v5131_v54 = vmul.f32 0.2, %v5127_v48 }
 0xb83   : > { %11188 = vmatmul.mubr.msk.f32.vlgmr.msra.gmra.mxu0 %vm6070_vm13, %v8957_v21  ;;  %11190 = vmatprep.subr.mxu1 %v11539_v46  ;;  %v5130_v21 = vmul.f32 0.2, %v5126_v53 }
 0xb84   : > { %11209 = vmatprep.mubr.msk.f32.mxu0 %vm11540_vm5, %v11539_v46  ;;  %11202 = vmatpush3.msra.mxu0 %v6514_v37  ;;  %v5133_v37 = vsel %vm5129_vm15, %v5127_v48, %v5131_v54  ;;  %v9013_v48 = vld [vmem:[%s14424_s22 + $0x28] sm:$0xff]  ;;  %v7739_v54 = vld [vmem:[%s14417_s15 + $0x20] sm:$0xff] }
 0xb85   : > { %11183 = vmatmul.mubr.msk.f32.vlgmr.msra.gmra.mxu1 %vm6070_vm13, %v8954_v47  ;;  %11203 = vmatprep.subr.mxu0 %v11539_v46  ;;  %v8983_v47 = vld [vmem:[%s14415_s13 + $0x48] sm:$0xff] }
 0xb86   : > { %11198 = vmatprep.mubr.msk.f32.mxu1 %vm11540_vm5, %v11539_v46  ;;  %11191 = vmatpush3.msra.mxu1 %v6518_v51 }
 0xb87   : > { %11192 = vmatprep.subr.mxu1 %v11539_v46  ;;  %11204 = vmatpush3.msra.mxu0 %v6513_v22  ;;  %v5132_v22 = vsel %vm5128_vm1, %v5126_v53, %v5130_v21  ;;  %v7741_v53 = vld [vmem:[%s14417_s15 + $0x30] sm:$0xff] }
 0xb88   : > { %11193 = vmatpush3.msra.mxu1 %v6517_v8  ;;  %11205 = vmatprep.subr.mxu0 %v11539_v46  ;;  %v7729_v21 = vld [vmem:[%s14416_s14 + $0x50] sm:$0xff] }
 0xb89   : > { %11194 = vmatprep.subr.mxu1 %v11539_v46  ;;  %11206 = vmatpush3.msra.mxu0 %v6512_v10  ;;  %v11525_v10 = vld [vmem:[%s14458_s8 + $0x28] sm:$0xff] }
 0xb8a   : > { %11195 = vmatpush3.msra.mxu1 %v6516_v2  ;;  %11207 = vmatprep.subr.mxu0 %v11539_v46  ;;  %v11524_v2 = vld [vmem:[%s14458_s8 + $0x10] sm:$0xff] }
 0xb8b   : > { %11196 = vmatprep.subr.mxu1 %v11539_v46  ;;  %11208 = vmatpush3.msra.mxu0 %v6511_v55  ;;  %v7214_v55 = vld [vmem:[%s14423_s21] sm:$0xff] }
 0xb8c   : > { %11197 = vmatpush3.msra.mxu1 %v6515_v60  ;;  %11223 = vmatprep.subr.mxu0 %v11539_v46 }
 0xb8d   : > { %11212 = vmatprep.subr.mxu1 %v11539_v46 }
 0xc12   : > { %v5726_v13 = vpop.f32.mrf.mxu0 }
 0xc14   : > { %v11083_v59 = vpop.f32.mrf.mxu0 }
 0xc15   : > { %v7215_v59 = vld [vmem:[%s14423_s21 + $0x8] sm:$0xff] }
 0xc16   : > { %v5653_v14 = vpop.f32.mrf.mxu1 }
 0xc17   : > { %v5727_v6 = vadd.f32 %v5726_v13, %v5653_v14  ;;  %v11526_v13 = vld [vmem:[%s14458_s8 + $0x18] sm:$0xff]  ;;  %v11527_v14 = vld [vmem:[%s14458_s8 + $0x30] sm:$0xff] }
 0xc18   : > { %v11064_v17 = vpop.f32.mrf.mxu1 }
 0xc19   : > { %v11528_v17 = vld [vmem:[%s14458_s8 + $0x38] sm:$0xff] }
 0xc22   : > { %v5891_v12 = vpop.f32.mrf.mxu0 }
 0xc24   : > { %v11121_v44 = vpop.f32.mrf.mxu0 }
 0xc25   : > { %v8997_v44 = vld [vmem:[%s14423_s21 + $0x18] sm:$0xff] }
 0xc27   : > { %v5818_v45 = vpop.f32.mrf.mxu1 }
 0xc28   : > { %v5892_v35 = vadd.f32 %v5891_v12, %v5818_v45  ;;  %v8996_v12 = vld [vmem:[%s14423_s21 + $0x10] sm:$0xff]  ;;  %v9000_v45 = vld [vmem:[%s14423_s21 + $0x20] sm:$0xff] }
 0xc29   : > { %v11102_v20 = vpop.f32.mrf.mxu1 }
 0xc2a   : > { %v5895_v49 = vadd.f32 %v5892_v35, %v5727_v6  ;;  %v9001_v20 = vld [vmem:[%s14423_s21 + $0x28] sm:$0xff]  ;;  %v9008_v6 = vld [vmem:[%s14424_s22 + $0x18] sm:$0xff] }
 0xc34   : > { %v6056_v4 = vpop.f32.mrf.mxu0 }
 0xc36   : > { %v11159_v25 = vpop.f32.mrf.mxu0 }
 0xc37   : > { %v9007_v25 = vld [vmem:[%s14424_s22 + $0x10] sm:$0xff] }
 0xc39   : > { %v5983_v38 = vpop.f32.mrf.mxu1 }
 0xc3a   : > { %v6219_v23 = vpop.f32.mrf.mxu0  ;;  %v6057_v3 = vadd.f32 %v6056_v4, %v5983_v38  ;;  %v7465_v4 = vld [vmem:[%s14424_s22] sm:$0xff] }
 0xc3b   : > { %v11140_v26 = vpop.f32.mrf.mxu1 }
 0xc3c   : > { %v11169_v5 = vpop.f32.mrf.mxu0  ;;  %v6060_v63 = vadd.f32 %v6057_v3, %v5895_v49 }
 0xc3d   : > { %v6144_v43 = vpop.f32.mrf.mxu1 }
 0xc3e   : > { %v6367_v7 = vpop.f32.mrf.mxu0  ;;  %11210 = vmatmul.mubr.msk.f32.vlgmr.msra.gmra.mxu0 %vm6519_vm14, %v6144_v43  ;;  %v6065_v51 = vadd.f32 %v6064_v62, %v6060_v63  ;;  %v7732_v63 = vld [vmem:[%s14416_s14 + $0x68] sm:$0xff] }
 0xc3f   : > { %11199 = vmatmul.mubr.msk.f32.vlgmr.msra.gmra.mxu1 %vm6519_vm14, %v6367_v7  ;;  %11224 = vmatpush3.msra.mxu0 %v8971_v0  ;;  %v11164_v61 = vpop.f32.mrf.mxu1  ;;  %v7740_v62 = vld [vmem:[%s14417_s15 + $0x28] sm:$0xff] }
 0xc40   : > { %11213 = vmatpush3.msra.mxu1 %v8975_v24  ;;  %v11179_v40 = vpop.f32.mrf.mxu0  ;;  %11225 = vmatprep.subr.mxu0 %v11539_v46  ;;  %v6067_v8 = vmul.f32 0.2, %v6065_v51  ;;  %vm6066_vm2 = vcmp.ge.f32.partialorder %v6065_v51, 0.0  ;;  %v6983_v61 = vsub.s32 6, %v12168_v36 }
 0xc41   : > { %11214 = vmatprep.subr.mxu1 %v11539_v46  ;;  %11226 = vmatpush3.msra.mxu0 %v8970_v58  ;;  %v13955_v27 = vpop.f32.mrf.mxu1 }
 0xc42   : > { %11215 = vmatpush3.msra.mxu1 %v8974_v39  ;;  %11227 = vmatprep.subr.mxu0 %v11539_v46  ;;  %v6068_v60 = vsel %vm6066_vm2, %v6065_v51, %v6067_v8  ;;  %v7737_v51 = vld [vmem:[%s14417_s15 + $0x10] sm:$0xff]  ;;  %v7736_v8 = vld [vmem:[%s14417_s15 + $0x8] sm:$0xff] }
 0xc43   : > { %11216 = vmatprep.subr.mxu1 %v11539_v46  ;;  %11228 = vmatpush3.msra.mxu0 %v8969_v41  ;;  %v11174_v30 = vpop.f32.mrf.mxu1  ;;  %v6507_v32 = vpop.f32.mrf.mxu0 }
 0xc44   : > { %11217 = vmatpush3.msra.mxu1 %v8973_v28  ;;  %11229 = vmatprep.subr.mxu0 %v11539_v46  ;;  %v6984_v28 = vrot.slane %v13972_v33, %v6983_v61  ;;  %v9024_v61 = vld [vmem:[%s14416_s14 + $0x98] sm:$0xff] }
 0xc45   : > { %11218 = vmatprep.subr.mxu1 %v11539_v46  ;;  %11230 = vmatpush3.msra.mxu0 %v8968_v29  ;;  %v6437_v1 = vpop.f32.mrf.mxu1  ;;  %v11189_v57 = vpop.f32.mrf.mxu0 }
 0xc46   : > { %11219 = vmatpush3.msra.mxu1 %v8972_v31  ;;  %11231 = vmatprep.mubr.msk.f32.mxu0 %vm11540_vm5, %v11539_v46 }
 0xc47   : > { %11220 = vmatprep.mubr.msk.f32.mxu1 %vm11540_vm5, %v11539_v46  ;;  %11232 = vmatmul.mubr.msk.f32.vlgmr.msra.gmra.mxu0 %vm6519_vm14, %v6219_v23  ;;  %v11184_v16 = vpop.f32.mrf.mxu1 }
 0xc48   : > { %11234 = vmatprep.subr.mxu1 %v11539_v46  ;;  %11245 = vmatprep.subr.mxu0 %v11539_v46 }
 0xc49   : > { %11221 = vmatmul.mubr.msk.f32.vlgmr.msra.gmra.mxu1 %vm6519_vm14, %v6437_v1  ;;  %11246 = vmatpush3.msra.mxu0 %v8981_v11  ;;  %v7466_v11 = vld [vmem:[%s14424_s22 + $0x8] sm:$0xff] }
 0xc4a   : > { %11235 = vmatpush3.msra.mxu1 %v8985_v19  ;;  %11247 = vmatprep.subr.mxu0 %v11539_v46  ;;  %v7734_v19 = vld [vmem:[%s14416_s14 + $0x78] sm:$0xff] }
 0xc4b   : > { %11236 = vmatprep.subr.mxu1 %v11539_v46  ;;  %11248 = vmatpush3.msra.mxu0 %v8980_v18  ;;  %v7742_v18 = vld [vmem:[%s14417_s15 + $0x38] sm:$0xff] }
 0xc4c   : > { %11237 = vmatpush3.msra.mxu1 %v8984_v50  ;;  %11249 = vmatprep.subr.mxu0 %v11539_v46 }
 0xc4d   : > { %11238 = vmatprep.subr.mxu1 %v11539_v46  ;;  %11250 = vmatpush3.msra.mxu0 %v8979_v52  ;;  %v7733_v52 = vld [vmem:[%s14416_s14 + $0x70] sm:$0xff] }
 0xc4e   : > { %11239 = vmatpush3.msra.mxu1 %v8983_v47  ;;  %11251 = vmatprep.subr.mxu0 %v11539_v46  ;;  %v7731_v47 = vld [vmem:[%s14416_s14 + $0x60] sm:$0xff] }
 0xc4f   : > { %11240 = vmatprep.subr.mxu1 %v11539_v46  ;;  %11242 = vmatprep.mubr.msk.f32.mxu1 %vm11540_vm5, %v11539_v46 }
 0xc50   : > { %11241 = vmatpush3.msra.mxu1 %v8982_v9  ;;  %11252 = vmatpush3.msra.mxu0 %v8978_v56  ;;  %v7730_v9 = vld [vmem:[%s14416_s14 + $0x58] sm:$0xff] }
 0xc51   : > { %11253 = vmatprep.mubr.msk.f32.mxu0 %vm11540_vm5, %v11539_v46  ;;  %11243 = vmatmul.mubr.msk.f32.vlgmr.msra.gmra.mxu1 %vm6519_vm14, %v6507_v32  ;;  %v11523_v46 = vld [vmem:[%s14458_s8 + $0x20] sm:$0xff]  ;;  %v7738_v56 = vld [vmem:[%s14417_s15 + $0x18] sm:$0xff] }
 0xc52   : > { %11254 = vmatmul.mubr.msk.f32.vlgmr.msra.gmra.mxu0 %vm6519_vm14, %v13955_v27  ;;  %11256 = vmatprep.subr.mxu1 %v5133_v37 }
 0xc53   : > { %11263 = vmatprep.subr.mxu0 %v5133_v37  ;;  %11257 = vmatpush3.msra.mxu1 %v5133_v37 }
 0xc54   : > { %11264 = vmatpush3.msra.mxu0 %v5133_v37  ;;  %11258 = vmatprep.subr.mxu1 %v5132_v22 }
 0xc55   : > { %11265 = vmatprep.subr.mxu0 %v5132_v22  ;;  %11259 = vmatpush3.msra.mxu1 %v5132_v22 }
 0xc56   : > { %11266 = vmatpush3.msra.mxu0 %v5132_v22  ;;  %11267 = vmatprep.mubr.msk.f32.mxu0 %vm814_vm0, %v11523_v46  ;;  %v7735_v46 = vld [vmem:[%s14417_s15] sm:$0xff] }
 0xc57   : > { %11260 = vmatprep.mubr.msk.f32.mxu1 %vm814_vm0, %v11524_v2  ;;  %11268 = vmatmul.mubr.msk.f32.vlgmr.msra.gmra.mxu0 %vm814_vm0, %v11525_v10  ;;  %v7726_v2 = vld [vmem:[%s14416_s14 + $0x38] sm:$0xff] }
 0xc58   : > { %11270 = vmatprep.subr.mxu1 %v5133_v37  ;;  %11277 = vmatprep.subr.mxu0 %v6068_v60  ;;  %v7902_v10 = vld [vmem:[%s14418_s16 + $0x18] sm:$0xff] }
 0xc59   : > { %11261 = vmatmul.mubr.msk.f32.vlgmr.msra.gmra.mxu1 %vm814_vm0, %v11526_v13  ;;  %11278 = vmatpush3.msra.mxu0 %v6068_v60  ;;  %v7724_v13 = vld [vmem:[%s14416_s14 + $0x28] sm:$0xff] }
 0xc5a   : > { %11271 = vmatpush3.msra.mxu1 %v5133_v37  ;;  %11287 = vmatprep.subr.mxu0 %v6068_v60  ;;  %v7728_v37 = vld [vmem:[%s14416_s14 + $0x48] sm:$0xff] }
 0xc5b   : > { %11272 = vmatprep.subr.mxu1 %v5132_v22  ;;  %11279 = vmatprep.mubr.msk.f32.mxu0 %vm3109_vm8, %v7214_v55  ;;  %v7901_v55 = vld [vmem:[%s14418_s16 + $0x10] sm:$0xff] }
 0xc5c   : > { %11273 = vmatpush3.msra.mxu1 %v5132_v22  ;;  %11274 = vmatprep.mubr.msk.f32.mxu1 %vm814_vm0, %v11527_v14  ;;  %v7727_v22 = vld [vmem:[%s14416_s14 + $0x40] sm:$0xff] }
 0xc5d   : > { %11280 = vmatmul.mubr.msk.f32.vlgmr.msra.gmra.mxu0 %vm3109_vm8, %v7215_v59  ;;  %11282 = vmatprep.subr.mxu1 %v6068_v60  ;;  %v7900_v59 = vld [vmem:[%s14418_s16 + $0x8] sm:$0xff]  ;;  %v7723_v14 = vld [vmem:[%s14416_s14 + $0x20] sm:$0xff] }
 0xc5e   : > { %11288 = vmatpush3.msra.mxu0 %v6068_v60  ;;  %11275 = vmatmul.mubr.msk.f32.vlgmr.msra.gmra.mxu1 %vm814_vm0, %v11528_v17  ;;  %v7722_v17 = vld [vmem:[%s14416_s14 + $0x18] sm:$0xff] }
 0xc5f   : > { %11283 = vmatpush3.msra.mxu1 %v6068_v60  ;;  %11284 = vmatprep.mubr.msk.f32.mxu1 %vm3109_vm8, %v8996_v12  ;;  %v7725_v60 = vld [vmem:[%s14416_s14 + $0x30] sm:$0xff] }
 0xc60   : > { %11289 = vmatprep.mubr.msk.f32.mxu0 %vm3109_vm8, %v9000_v45  ;;  %v7721_v12 = vld [vmem:[%s14416_s14 + $0x10] sm:$0xff]  ;;  %v7719_v45 = vld [vmem:[%s14416_s14] sm:$0xff] }
 0xc61   : > { %11290 = vmatmul.mubr.msk.f32.vlgmr.msra.gmra.mxu0 %vm3109_vm8, %v9001_v20  ;;  %v9036_v20 = vld [vmem:[%s14416_s14 + $0xf8] sm:$0xff] }
 0xc62   : > { %11285 = vmatmul.mubr.msk.f32.vlgmr.msra.gmra.mxu1 %vm3109_vm8, %v8997_v44  ;;  %11299 = vmatprep.mubr.msk.f32.mxu0 %vm6070_vm13, %v9007_v25  ;;  %v7720_v44 = vld [vmem:[%s14416_s14 + $0x8] sm:$0xff] }
 0xc63   : > { %11294 = vmatprep.mubr.msk.f32.mxu1 %vm6070_vm13, %v7465_v4  ;;  %v9035_v4 = vld [vmem:[%s14416_s14 + $0xf0] sm:$0xff]  ;;  %v9034_v25 = vld [vmem:[%s14416_s14 + $0xe8] sm:$0xff] }
 0xcfe   : > { %v6662_v38 = vpop.f32.mrf.mxu0 }
 0xcff   : > { %v6589_v23 = vpop.f32.mrf.mxu1 }
 0xd00   : > { %v11211_v26 = vpop.f32.mrf.mxu0  ;;  %v6663_v39 = vadd.f32 %v6662_v38, %v6589_v23  ;;  %v9033_v38 = vld [vmem:[%s14416_s14 + $0xe0] sm:$0xff]  ;;  %v9032_v23 = vld [vmem:[%s14416_s14 + $0xd8] sm:$0xff] }
 0xd01   : > { %v11200_v5 = vpop.f32.mrf.mxu1  ;;  %v9031_v26 = vld [vmem:[%s14416_s14 + $0xd0] sm:$0xff] }
 0xd02   : > { %v9030_v5 = vld [vmem:[%s14416_s14 + $0xc8] sm:$0xff] }
 0xd07   : > { %v6819_v0 = vpop.f32.mrf.mxu0 }
 0xd09   : > { %v6746_v43 = vpop.f32.mrf.mxu1  ;;  %v11233_v24 = vpop.f32.mrf.mxu0 }
 0xd0a   : > { %v6820_v58 = vadd.f32 %v6819_v0, %v6746_v43  ;;  %v9029_v0 = vld [vmem:[%s14416_s14 + $0xc0] sm:$0xff]  ;;  %v9028_v43 = vld [vmem:[%s14416_s14 + $0xb8] sm:$0xff]  ;;  %v9027_v24 = vld [vmem:[%s14416_s14 + $0xb0] sm:$0xff] }
 0xd0b   : > { %v11222_v7 = vpop.f32.mrf.mxu1 }
 0xd0c   : > { %v6823_v42 = vadd.f32 %v6820_v58, %v6663_v39  ;;  %v9026_v7 = vld [vmem:[%s14416_s14 + $0xa8] sm:$0xff]  ;;  %v9025_v58 = vld [vmem:[%s14416_s14 + $0xa0] sm:$0xff]  ;;  %v9023_v39 = vld [vmem:[%s14416_s14 + $0x90] sm:$0xff] }
 0xd11   : > { %v6903_v40 = vpop.f32.mrf.mxu1 }
 0xd12   : > { %v6976_v41 = vpop.f32.mrf.mxu0 }
 0xd13   : > { %v6977_v27 = vadd.f32 %v6976_v41, %v6903_v40  ;;  %v11244_v29 = vpop.f32.mrf.mxu1  ;;  %v9022_v40 = vld [vmem:[%s14416_s14 + $0x88] sm:$0xff]  ;;  %v9021_v41 = vld [vmem:[%s14416_s14 + $0x80] sm:$0xff] }
 0xd14   : > { %v11255_v30 = vpop.f32.mrf.mxu0  ;;  %v9081_v29 = vld [vmem:[%s14418_s16 + $0x50] sm:$0xff] }
 0xd15   : > { %v6980_v31 = vadd.f32 %v6977_v27, %v6823_v42  ;;  %v7899_v42 = vld [vmem:[%s14418_s16] sm:$0xff]  ;;  %v9044_v27 = vld [vmem:[%s14417_s15 + $0x78] sm:$0xff]  ;;  %v9080_v30 = vld [vmem:[%s14418_s16 + $0x48] sm:$0xff] }
 0xd17   : > { %v6985_v32 = vadd.f32 %v6984_v28, %v6980_v31  ;;  %v14083_v34 = vpop.f32.mrf.mxu0  ;;  %v9082_v28 = vld [vmem:[%s14418_s16 + $0x58] sm:$0xff]  ;;  %v9079_v31 = vld [vmem:[%s14418_s16 + $0x40] sm:$0xff] }
 0xd19   : > { %vm6986_vm0 = vcmp.ge.f32.partialorder %v6985_v32, 0.0  ;;  %v6987_v35 = vmul.f32 0.2, %v6985_v32  ;;  %v14085_v1 = vpop.f32.mrf.mxu0  ;;  %v14095_v3 = vpop.f32.mrf.mxu1 }
 0xd1b   : > { %v6988_v57 = vsel %vm6986_vm0, %v6985_v32, %v6987_v35  ;;  %v7055_v50 = vpop.f32.mrf.mxu1 }
 0xd1c   : > { %11292 = vmatprep.subr.msk.mxu1 %vm6074_vm12, %v6988_v57  ;;  %11297 = vmatprep.subr.msk.mxu0 %vm6074_vm12, %v6988_v57 }
 0xd1d   : > { %11293 = vmatpush3.msk.msra.mxu1 %vm6074_vm12, %v6988_v57  ;;  %11298 = vmatpush3.msk.msra.mxu0 %vm6074_vm12, %v6988_v57  ;;  %v14105_v16 = vpop.f32.mrf.mxu0 }
 0xd1e   : > { %11295 = vmatmul.mubr.msk.f32.vlgmr.msra.gmra.mxu1 %vm6070_vm13, %v7466_v11  ;;  %11302 = vmatprep.subr.msk.mxu1 %vm6074_vm12, %v6988_v57  ;;  %v14266_v32 = vpop.f32.mrf.mxu1 }
 0xd1f   : > { %11303 = vmatpush3.msk.msra.mxu1 %vm6074_vm12, %v6988_v57  ;;  %11300 = vmatmul.mubr.msk.f32.vlgmr.msra.gmra.mxu0 %vm6070_vm13, %v9008_v6  ;;  %v7288_v49 = vpop.f32.mrf.mxu0  ;;  %v9043_v6 = vld [vmem:[%s14417_s15 + $0x70] sm:$0xff] }
 0xd20   : > { %11304 = vmatprep.mubr.msk.f32.mxu1 %vm6070_vm13, %v9012_v15  ;;  %11326 = vmatprep.subr.mxu1 %v7734_v19  ;;  %v9042_v15 = vld [vmem:[%s14417_s15 + $0x68] sm:$0xff] }
 0xd21   : > { %11307 = vmatprep.subr.mxu0 %v7742_v18  ;;  %11323 = vmatprep.mubr.msk.f32.mxu0 %vm3821_vm11, %v7288_v49 }
 0xd22   : > { %11305 = vmatmul.mubr.msk.f32.vlgmr.msra.gmra.mxu1 %vm6070_vm13, %v9013_v48  ;;  %11308 = vmatpush3.msra.mxu0 %v7742_v18  ;;  %v9041_v18 = vld [vmem:[%s14417_s15 + $0x60] sm:$0xff]  ;;  %v9040_v48 = vld [vmem:[%s14417_s15 + $0x58] sm:$0xff] }
 0xd23   : > { %11327 = vmatpush3.msra.mxu1 %v7734_v19  ;;  %11358 = vmatprep.mubr.f32.mxu1 %v7055_v50  ;;  %v14279_v19 = vpop.f32.mrf.mxu0  ;;  %v9039_v50 = vld [vmem:[%s14417_s15 + $0x50] sm:$0xff] }
 0xd24   : > { %11328 = vmatprep.subr.mxu1 %v7733_v52  ;;  %11309 = vmatprep.subr.mxu0 %v7741_v53 }
 0xd25   : > { %11329 = vmatpush3.msra.mxu1 %v7733_v52  ;;  %11310 = vmatpush3.msra.mxu0 %v7741_v53  ;;  %v7456_v49 = vpop.f32.mrf.mxu0  ;;  %v9038_v52 = vld [vmem:[%s14417_s15 + $0x48] sm:$0xff] }
 0xd26   : > { %11330 = vmatprep.subr.mxu1 %v7732_v63  ;;  %11311 = vmatprep.subr.mxu0 %v7740_v62 }
 0xd27   : > { %11331 = vmatpush3.msra.mxu1 %v7732_v63  ;;  %11312 = vmatpush3.msra.mxu0 %v7740_v62  ;;  %v9037_v63 = vld [vmem:[%s14417_s15 + $0x40] sm:$0xff]  ;;  %v9050_v62 = vld [vmem:[%s14418_s16 + $0x38] sm:$0xff] }
 0xd28   : > { %11332 = vmatprep.subr.mxu1 %v7731_v47  ;;  %11313 = vmatprep.subr.mxu0 %v7739_v54 }
 0xd29   : > { %11333 = vmatpush3.msra.mxu1 %v7731_v47  ;;  %11314 = vmatpush3.msra.mxu0 %v7739_v54  ;;  %v9049_v54 = vld [vmem:[%s14418_s16 + $0x30] sm:$0xff] }
 0xd2a   : > { %11334 = vmatprep.subr.mxu1 %v7730_v9  ;;  %11315 = vmatprep.subr.mxu0 %v7738_v56 }
 0xd2b   : > { %11335 = vmatpush3.msra.mxu1 %v7730_v9  ;;  %11316 = vmatpush3.msra.mxu0 %v7738_v56  ;;  %v9048_v9 = vld [vmem:[%s14418_s16 + $0x28] sm:$0xff]  ;;  %v9047_v56 = vld [vmem:[%s14418_s16 + $0x20] sm:$0xff] }
 0xd2c   : > { %11336 = vmatprep.subr.mxu1 %v7729_v21  ;;  %11317 = vmatprep.subr.mxu0 %v7737_v51 }
 0xd2d   : > { %11337 = vmatpush3.msra.mxu1 %v7729_v21  ;;  %11318 = vmatpush3.msra.mxu0 %v7737_v51  ;;  %v9076_v21 = vld [vmem:[%s14417_s15 + $0xb8] sm:$0xff]  ;;  %v9075_v51 = vld [vmem:[%s14417_s15 + $0xb0] sm:$0xff] }
 0xd2e   : > { %11338 = vmatprep.subr.mxu1 %v7728_v37  ;;  %11319 = vmatprep.subr.mxu0 %v7736_v8 }
 0xd2f   : > { %11339 = vmatpush3.msra.mxu1 %v7728_v37  ;;  %11320 = vmatpush3.msra.mxu0 %v7736_v8  ;;  %v9074_v37 = vld [vmem:[%s14417_s15 + $0xa8] sm:$0xff]  ;;  %v9073_v8 = vld [vmem:[%s14417_s15 + $0xa0] sm:$0xff] }
 0xd30   : > { %11340 = vmatprep.subr.mxu1 %v7727_v22  ;;  %11321 = vmatprep.subr.mxu0 %v7735_v46 }
 0xd31   : > { %11341 = vmatpush3.msra.mxu1 %v7727_v22  ;;  %11322 = vmatpush3.msra.mxu0 %v7735_v46  ;;  %v9072_v22 = vld [vmem:[%s14417_s15 + $0x98] sm:$0xff]  ;;  %v9071_v46 = vld [vmem:[%s14417_s15 + $0x90] sm:$0xff] }
 0xd32   : > { %11342 = vmatprep.subr.mxu1 %v7726_v2  ;;  %11324 = vmatmul.mubr.msk.f32.vlgmr.msra.gmra.mxu0 %vm3821_vm11, %v14105_v16 }
 0xd33   : > { %11343 = vmatpush3.msra.mxu1 %v7726_v2  ;;  %11361 = vmatprep.subr.mxu0 %v7902_v10  ;;  %v9070_v2 = vld [vmem:[%s14417_s15 + $0x88] sm:$0xff] }
 0xd34   : > { %11344 = vmatprep.subr.mxu1 %v7725_v60  ;;  %11362 = vmatpush3.msra.mxu0 %v7902_v10  ;;  %v9069_v10 = vld [vmem:[%s14417_s15 + $0x80] sm:$0xff] }
 0xd35   : > { %11345 = vmatpush3.msra.mxu1 %v7725_v60  ;;  %11363 = vmatprep.subr.mxu0 %v7901_v55  ;;  %v9068_v60 = vld [vmem:[%s14416_s14 + $0x178] sm:$0xff] }
 0xd36   : > { %11346 = vmatprep.subr.mxu1 %v7724_v13  ;;  %11364 = vmatpush3.msra.mxu0 %v7901_v55  ;;  %v9067_v55 = vld [vmem:[%s14416_s14 + $0x170] sm:$0xff] }
 0xd37   : > { %11347 = vmatpush3.msra.mxu1 %v7724_v13  ;;  %11365 = vmatprep.subr.mxu0 %v7900_v59  ;;  %v9066_v13 = vld [vmem:[%s14416_s14 + $0x168] sm:$0xff] }
 0xd38   : > { %11348 = vmatprep.subr.mxu1 %v7723_v14  ;;  %11366 = vmatpush3.msra.mxu0 %v7900_v59  ;;  %v9065_v59 = vld [vmem:[%s14416_s14 + $0x160] sm:$0xff] }
 0xd39   : > { %11349 = vmatpush3.msra.mxu1 %v7723_v14  ;;  %11367 = vmatprep.subr.mxu0 %v7899_v42  ;;  %v9064_v14 = vld [vmem:[%s14416_s14 + $0x158] sm:$0xff] }
 0xd3a   : > { %11350 = vmatprep.subr.mxu1 %v7722_v17  ;;  %11368 = vmatpush3.msra.mxu0 %v7899_v42 }
 0xd3b   : > { %11351 = vmatpush3.msra.mxu1 %v7722_v17  ;;  %11372 = vmatprep.subr.mxu0 %v9044_v27  ;;  %v9063_v17 = vld [vmem:[%s14416_s14 + $0x150] sm:$0xff] }
 0xd3c   : > { %11352 = vmatprep.subr.mxu1 %v7721_v12 }
 0xd3d   : > { %11353 = vmatpush3.msra.mxu1 %v7721_v12  ;;  %v9062_v12 = vld [vmem:[%s14416_s14 + $0x148] sm:$0xff] }
 0xd3e   : > { %11354 = vmatprep.subr.mxu1 %v7720_v44 }
 0xd3f   : > { %11355 = vmatpush3.msra.mxu1 %v7720_v44  ;;  %v9061_v44 = vld [vmem:[%s14416_s14 + $0x140] sm:$0xff] }
 0xd40   : > { %11356 = vmatprep.subr.mxu1 %v7719_v45 }
 0xd41   : > { %11357 = vmatpush3.msra.mxu1 %v7719_v45  ;;  %v9060_v45 = vld [vmem:[%s14416_s14 + $0x138] sm:$0xff] }
 0xd42   : > { %11391 = vmatprep.subr.mxu1 %v9036_v20  ;;  %11359 = vmatmul.mubr.f32.vlgmr.msra.gmra.mxu1 %v14095_v3 }
 0xd43   : > { %11392 = vmatpush3.msra.mxu1 %v9036_v20  ;;  %11423 = vmatprep.mubr.f32.mxu1 %v14085_v1  ;;  %v9059_v20 = vld [vmem:[%s14416_s14 + $0x130] sm:$0xff] }
 0xd44   : > { %11393 = vmatprep.subr.mxu1 %v9035_v4 }
 0xd45   : > { %11394 = vmatpush3.msra.mxu1 %v9035_v4  ;;  %v9058_v4 = vld [vmem:[%s14416_s14 + $0x128] sm:$0xff] }
 0xd46   : > { %11395 = vmatprep.subr.mxu1 %v9034_v25 }
 0xd47   : > { %11396 = vmatpush3.msra.mxu1 %v9034_v25  ;;  %v9057_v25 = vld [vmem:[%s14416_s14 + $0x120] sm:$0xff] }
 0xd48   : > { %11397 = vmatprep.subr.mxu1 %v9033_v38 }
 0xd49   : > { %11398 = vmatpush3.msra.mxu1 %v9033_v38  ;;  %v9056_v38 = vld [vmem:[%s14416_s14 + $0x118] sm:$0xff] }
 0xd4a   : > { %11399 = vmatprep.subr.mxu1 %v9032_v23 }
 0xd4b   : > { %11400 = vmatpush3.msra.mxu1 %v9032_v23  ;;  %v9055_v23 = vld [vmem:[%s14416_s14 + $0x110] sm:$0xff] }
 0xd4c   : > { %11401 = vmatprep.subr.mxu1 %v9031_v26 }
 0xd4d   : > { %11402 = vmatpush3.msra.mxu1 %v9031_v26  ;;  %v9054_v26 = vld [vmem:[%s14416_s14 + $0x108] sm:$0xff] }
 0xd4e   : > { %11403 = vmatprep.subr.mxu1 %v9030_v5 }
 0xd4f   : > { %11404 = vmatpush3.msra.mxu1 %v9030_v5  ;;  %v9053_v5 = vld [vmem:[%s14416_s14 + $0x100] sm:$0xff] }
 0xd50   : > { %11405 = vmatprep.subr.mxu1 %v9029_v0 }
 0xd51   : > { %11406 = vmatpush3.msra.mxu1 %v9029_v0 }
 0xd52   : > { %11407 = vmatprep.subr.mxu1 %v9028_v43 }
 0xd53   : > { %11408 = vmatpush3.msra.mxu1 %v9028_v43 }
 0xd54   : > { %11409 = vmatprep.subr.mxu1 %v9027_v24 }
 0xd55   : > { %11410 = vmatpush3.msra.mxu1 %v9027_v24 }
 0xd56   : > { %11411 = vmatprep.subr.mxu1 %v9026_v7 }
 0xd57   : > { %11412 = vmatpush3.msra.mxu1 %v9026_v7 }
 0xd58   : > { %11413 = vmatprep.subr.mxu1 %v9025_v58 }
 0xd59   : > { %11414 = vmatpush3.msra.mxu1 %v9025_v58 }
 0xd5a   : > { %11415 = vmatprep.subr.mxu1 %v9024_v61 }
 0xd5b   : > { %11416 = vmatpush3.msra.mxu1 %v9024_v61 }
 0xd5c   : > { %11417 = vmatprep.subr.mxu1 %v9023_v39 }
 0xd5d   : > { %11418 = vmatpush3.msra.mxu1 %v9023_v39 }
 0xd5e   : > { %11419 = vmatprep.subr.mxu1 %v9022_v40 }
 0xd5f   : > { %11420 = vmatpush3.msra.mxu1 %v9022_v40 }
 0xd60   : > { %11421 = vmatprep.subr.mxu1 %v9021_v41 }
 0xd61   : > { %11422 = vmatpush3.msra.mxu1 %v9021_v41 }
 0xd62   : > { %11424 = vmatmul.mubr.f32.vlgmr.msra.gmra.mxu1 %v14083_v34  ;;  %11491 = vmatprep.subr.mxu1 %v9082_v28  ;;  %v14268_v34 = vpop.f32.mrf.mxu1 }
 0xd63   : > { %11492 = vmatpush3.msra.mxu1 %v9082_v28 }
 0xd64   : > { %11493 = vmatprep.subr.mxu1 %v9081_v29  ;;  %v11286_v35 = vpop.f32.mrf.mxu1 }
 0xd65   : > { %11494 = vmatpush3.msra.mxu1 %v9081_v29 }
 0xd66   : > { %11495 = vmatprep.subr.mxu1 %v9080_v30  ;;  %v7372_v1 = vpop.f32.mrf.mxu1 }
 0xd67   : > { %11496 = vmatpush3.msra.mxu1 %v9080_v30 }
 0xd68   : > { %11497 = vmatprep.subr.mxu1 %v9079_v31 }
 0xd69   : > { %11498 = vmatpush3.msra.mxu1 %v9079_v31 }
 0xdde   : > { %v11296_v57 = vpop.f32.mrf.mxu1 }
 0xddf   : > { %v11301_v53 = vpop.f32.mrf.mxu0 }
 0xde0   : > { %v7542_v11 = vpop.f32.mrf.mxu1 }
 0xde1   : > { %11369 = vmatprep.mubr.msk.f32.mxu0 %vm6519_vm14, %v7542_v11  ;;  %v7626_v47 = vpop.f32.mrf.mxu0 }
 0xde2   : > { %11370 = vmatmul.mubr.msk.f32.vlgmr.msra.gmra.mxu0 %vm6519_vm14, %v11296_v57  ;;  %v11306_v3 = vpop.f32.mrf.mxu1 }
 0xde3   : > { %11373 = vmatpush3.msra.mxu0 %v9044_v27  ;;  %11388 = vmatprep.mubr.msk.f32.mxu0 %vm3821_vm11, %v7372_v1 }
 0xde4   : > { %11374 = vmatprep.subr.mxu0 %v9043_v6  ;;  %v7710_v16 = vpop.f32.mrf.mxu1 }
 0xde5   : > { %11375 = vmatpush3.msra.mxu0 %v9043_v6  ;;  %11499 = vmatprep.mubr.msk.f32.mxu1 %vm6519_vm14, %v7710_v16 }
 0xde6   : > { %11376 = vmatprep.subr.mxu0 %v9042_v15  ;;  %11500 = vmatmul.mubr.msk.f32.vlgmr.msra.gmra.mxu1 %vm6519_vm14, %v11306_v3 }
 0xde7   : > { %11377 = vmatpush3.msra.mxu0 %v9042_v15 }
 0xde8   : > { %11378 = vmatprep.subr.mxu0 %v9041_v18 }
 0xde9   : > { %11379 = vmatpush3.msra.mxu0 %v9041_v18 }
 0xdea   : > { %11380 = vmatprep.subr.mxu0 %v9040_v48 }
 0xdeb   : > { %11381 = vmatpush3.msra.mxu0 %v9040_v48 }
 0xdec   : > { %11382 = vmatprep.subr.mxu0 %v9039_v50 }
 0xded   : > { %11383 = vmatpush3.msra.mxu0 %v9039_v50 }
 0xdee   : > { %11384 = vmatprep.subr.mxu0 %v9038_v52 }
 0xdef   : > { %11385 = vmatpush3.msra.mxu0 %v9038_v52 }
 0xdf0   : > { %11386 = vmatprep.subr.mxu0 %v9037_v63 }
 0xdf1   : > { %11387 = vmatpush3.msra.mxu0 %v9037_v63 }
 0xdf2   : > { %11389 = vmatmul.mubr.msk.f32.vlgmr.msra.gmra.mxu0 %vm3821_vm11, %v11286_v35  ;;  %11426 = vmatprep.subr.mxu0 %v9050_v62  ;;  %v11325_v0 = vpop.f32.mrf.mxu0 }
 0xdf3   : > { %11427 = vmatpush3.msra.mxu0 %v9050_v62  ;;  %11434 = vmatprep.mubr.msk.f32.mxu0 %vm6519_vm14, %v7626_v47 }
 0xdf4   : > { %11428 = vmatprep.subr.mxu0 %v9049_v54  ;;  %v7815_v43 = vpop.f32.mrf.mxu0 }
 0xdf5   : > { %11429 = vmatpush3.msra.mxu0 %v9049_v54 }
 0xdf6   : > { %11430 = vmatprep.subr.mxu0 %v9048_v9 }
 0xdf7   : > { %11431 = vmatpush3.msra.mxu0 %v9048_v9 }
 0xdf8   : > { %11432 = vmatprep.subr.mxu0 %v9047_v56 }
 0xdf9   : > { %11433 = vmatpush3.msra.mxu0 %v9047_v56 }
 0xdfa   : > { %11435 = vmatmul.mubr.msk.f32.vlgmr.msra.gmra.mxu0 %vm6519_vm14, %v11301_v53  ;;  %11437 = vmatprep.subr.mxu0 %v9076_v21 }
 0xdfb   : > { %11438 = vmatpush3.msra.mxu0 %v9076_v21  ;;  %11453 = vmatprep.mubr.msk.f32.mxu0 %vm3821_vm11, %v7456_v49 }
 0xdfc   : > { %11439 = vmatprep.subr.mxu0 %v9075_v51 }
 0xdfd   : > { %11440 = vmatpush3.msra.mxu0 %v9075_v51  ;;  %v11529_v51 = vld [vmem:[%s11703_s5 + $0x8] sm:$0xff] }
 0xdfe   : > { %11441 = vmatprep.subr.mxu0 %v9074_v37 }
 0xdff   : > { %11442 = vmatpush3.msra.mxu0 %v9074_v37 }
 0xe00   : > { %11443 = vmatprep.subr.mxu0 %v9073_v8 }
 0xe01   : > { %11444 = vmatpush3.msra.mxu0 %v9073_v8 }
 0xe02   : > { %11445 = vmatprep.subr.mxu0 %v9072_v22  ;;  %v11360_v61 = vpop.f32.mrf.mxu1 }
 0xe03   : > { %11446 = vmatpush3.msra.mxu0 %v9072_v22  ;;  %v7896_v35 = vadd.f32 %v11360_v61, %v11325_v0  ;;  %v11530_v22 = vld [vmem:[%s11703_s5] sm:$0xff] }
 0xe04   : > { %11447 = vmatprep.subr.mxu0 %v9071_v46  ;;  %v7890_v41 = vpop.f32.mrf.mxu1 }
 0xe05   : > { %11448 = vmatpush3.msra.mxu0 %v9071_v46  ;;  %v7891_v6 = vadd.f32 %v7890_v41, %v7815_v43 }
 0xe06   : > { %11449 = vmatprep.subr.mxu0 %v9070_v2 }
 0xe07   : > { %11450 = vmatpush3.msra.mxu0 %v9070_v2 }
 0xe08   : > { %11451 = vmatprep.subr.mxu0 %v9069_v10 }
 0xe09   : > { %11452 = vmatpush3.msra.mxu0 %v9069_v10 }
 0xe0a   : > { %11454 = vmatmul.mubr.msk.f32.vlgmr.msra.gmra.mxu0 %vm3821_vm11, %v14279_v19  ;;  %11456 = vmatprep.subr.mxu0 %v9068_v60 }
 0xe0b   : > { %11457 = vmatpush3.msra.mxu0 %v9068_v60  ;;  %11488 = vmatprep.mubr.f32.mxu0 %v14268_v34  ;;  %v8534_v34 = vsub.s32 7, %v12168_v36 }
 0xe0c   : > { %11458 = vmatprep.subr.mxu0 %v9067_v55 }
 0xe0d   : > { %11459 = vmatpush3.msra.mxu0 %v9067_v55  ;;  %v8535_v16 = vrot.slane %v13972_v33, %v8534_v34 }
 0xe0e   : > { %11460 = vmatprep.subr.mxu0 %v9066_v13 }
 0xe0f   : > { %11461 = vmatpush3.msra.mxu0 %v9066_v13 }
 0xe10   : > { %11462 = vmatprep.subr.mxu0 %v9065_v59 }
 0xe11   : > { %11463 = vmatpush3.msra.mxu0 %v9065_v59 }
 0xe12   : > { %11464 = vmatprep.subr.mxu0 %v9064_v14 }
 0xe13   : > { %11465 = vmatpush3.msra.mxu0 %v9064_v14 }
 0xe14   : > { %11466 = vmatprep.subr.mxu0 %v9063_v17 }
 0xe15   : > { %11467 = vmatpush3.msra.mxu0 %v9063_v17 }
 0xe16   : > { %11468 = vmatprep.subr.mxu0 %v9062_v12 }
 0xe17   : > { %11469 = vmatpush3.msra.mxu0 %v9062_v12 }
 0xe18   : > { %11470 = vmatprep.subr.mxu0 %v9061_v44 }
 0xe19   : > { %11471 = vmatpush3.msra.mxu0 %v9061_v44 }
 0xe1a   : > { %11472 = vmatprep.subr.mxu0 %v9060_v45 }
 0xe1b   : > { %11473 = vmatpush3.msra.mxu0 %v9060_v45 }
 0xe1c   : > { %11474 = vmatprep.subr.mxu0 %v9059_v20 }
 0xe1d   : > { %11475 = vmatpush3.msra.mxu0 %v9059_v20 }
 0xe1e   : > { %11476 = vmatprep.subr.mxu0 %v9058_v4 }
 0xe1f   : > { %11477 = vmatpush3.msra.mxu0 %v9058_v4 }
 0xe20   : > { %11478 = vmatprep.subr.mxu0 %v9057_v25 }
 0xe21   : > { %11479 = vmatpush3.msra.mxu0 %v9057_v25 }
 0xe22   : > { %11480 = vmatprep.subr.mxu0 %v9056_v38  ;;  %v11425_v27 = vpop.f32.mrf.mxu1 }
 0xe23   : > { %11481 = vmatpush3.msra.mxu0 %v9056_v38 }
 0xe24   : > { %11482 = vmatprep.subr.mxu0 %v9055_v23  ;;  %v8161_v30 = vpop.f32.mrf.mxu1 }
 0xe25   : > { %11483 = vmatpush3.msra.mxu0 %v9055_v23 }
 0xe26   : > { %11484 = vmatprep.subr.mxu0 %v9054_v26 }
 0xe27   : > { %11485 = vmatpush3.msra.mxu0 %v9054_v26 }
 0xe28   : > { %11486 = vmatprep.subr.mxu0 %v9053_v5 }
 0xe29   : > { %11487 = vmatpush3.msra.mxu0 %v9053_v5 }
 0xe2a   : > { %11489 = vmatmul.mubr.f32.vlgmr.msra.gmra.mxu0 %v14266_v32 }
 0xea2   : > { %v11371_v24 = vpop.f32.mrf.mxu0 }
 0xea3   : > { %v7985_v3 = vadd.f32 %v11371_v24, %v7896_v35 }
 0xea4   : > { %v7975_v7 = vpop.f32.mrf.mxu0 }
 0xea5   : > { %v7984_v48 = vadd.f32 %v7975_v7, %v7891_v6 }
 0xea6   : > { %v11501_v11 = vpop.f32.mrf.mxu1 }
 0xea8   : > { %v8519_v53 = vpop.f32.mrf.mxu1 }
 0xeb2   : > { %v11390_v58 = vpop.f32.mrf.mxu0 }
 0xeb3   : > { %v8167_v29 = vadd.f32 %v11425_v27, %v11390_v58 }
 0xeb4   : > { %v8086_v39 = vpop.f32.mrf.mxu0 }
 0xeb5   : > { %v8162_v1 = vadd.f32 %v8161_v30, %v8086_v39 }
 0xeba   : > { %v11436_v40 = vpop.f32.mrf.mxu0 }
 0xebb   : > { %v8257_v32 = vadd.f32 %v11436_v40, %v8167_v29 }
 0xebc   : > { %v8247_v42 = vpop.f32.mrf.mxu0 }
 0xebd   : > { %v8256_v15 = vadd.f32 %v8247_v42, %v8162_v1  ;;  %v8259_v49 = vadd.f32 %v8257_v32, %v7985_v3 }
 0xebf   : > { %v8258_v36 = vadd.f32 %v8256_v15, %v7984_v48 }
 0xeca   : > { %v11455_v28 = vpop.f32.mrf.mxu0 }
 0xecc   : > { %v8358_v31 = vpop.f32.mrf.mxu0 }
 0xeea   : > { %v11490_v57 = vpop.f32.mrf.mxu0 }
 0xeeb   : > { %v8439_v19 = vadd.f32 %v11490_v57, %v11455_v28 }
 0xeec   : > { %v8433_v18 = vpop.f32.mrf.mxu0 }
 0xeed   : > { %v8529_v50 = vadd.f32 %v11501_v11, %v8439_v19  ;;  %v8434_v52 = vadd.f32 %v8433_v18, %v8358_v31 }
 0xeef   : > { %v8531_v63 = vadd.f32 %v8529_v50, %v8259_v49  ;;  %v8528_v62 = vadd.f32 %v8519_v53, %v8434_v52 }
 0xef1   : > { %v8537_v47 = vadd.f32 %v8535_v16, %v8531_v63  ;;  %v8530_v54 = vadd.f32 %v8528_v62, %v8258_v36 }
 0xef3   : > { %vm8539_vm3 = vcmp.ge.f32.partialorder %v8537_v47, 0.0  ;;  %v8541_v9 = vmul.f32 0.2, %v8537_v47  ;;  %v8536_v56 = vadd.f32 %v8535_v16, %v8530_v54 }
 0xef5   : > { %v8543_v33 = vsel %vm8539_vm3, %v8537_v47, %v8541_v9  ;;  %vm8538_vm4 = vcmp.ge.f32.partialorder %v8536_v56, 0.0  ;;  %v8540_v21 = vmul.f32 0.2, %v8536_v56 }
 0xef6   : > { %v8545_v37 = vadd.f32 %v11529_v51, %v8543_v33 }
 0xef7   : > { %v8542_v8 = vsel %vm8538_vm4, %v8536_v56, %v8540_v21 }
 0xef8   : > { %8547 = vst [vmem:[%s791_s17 + $0x8] sm:$0xff] %v8545_v37  ;;  %v8544_v46 = vadd.f32 %v11530_v22, %v8542_v8 }
 0xefa   : > { %8546 = vst [vmem:[%s791_s17] sm:$0xff] %v8544_v46 }
 0xefb PF: > { %s36_s27 = sadd.s32 1, %s11537_s27  }
 0xefc   : > { %p33_p4 = scmp.ge.s32.totalorder %s36_s27, 4  }
 0xefe   :  { %35 = sbr.rel (!%p33_p4) target bundleno = 14 (0xe), region = 198 }

</bundles_post_ra>
